<compile_context>
chip_gen: v7x
topology: tpu7x:2x2x1
jax: 0.10.0
libtpu: 0.0.40
codegen_flags: <defaults>
</compile_context>

<pallas_src>
import functools

import numpy as np
import jax
import jax.numpy as jnp
from jax import lax
from jax.experimental import pallas as pl
from jax.experimental.pallas import tpu as pltpu

EMBED_DIM = 768
LN_EPS = 1e-12          # nn.LayerNorm(eps=1e-12)
NORM_EPS = 1e-12        # F.normalize default eps
_INV_SQRT2 = 0.7071067811865476


def _round_up(x, m):
    return ((x + m - 1) // m) * m


def _gelu_exact(x):
    # HuggingFace ACT2FN['gelu'] == exact erf-based GELU
    return 0.5 * x * (1.0 + lax.erf(x * _INV_SQRT2))


def mfm_head_kernel(x_ref, lab_rows_ref, labels_ref, w1_ref, b1_ref, gamma_ref,
                    beta_ref, w2_ref, b2_ref, vc_ref, bias_valid_ref,
                    bias_masked_ref, sel_ref, loss_ref,
                    emb_ref, diag_ref, m_ref, l_ref,
                    *, inv_temp, normalize, matmul_dtype):
    f32 = jnp.float32
    k = pl.program_id(1)

    # ---- column step 0: MFMBlock forward + diag for this row tile -----------
    @pl.when(k == 0)
    def _():
        x = x_ref[...]                                            # (TM, D) mm dtype
        h = jnp.dot(x, w1_ref[...], preferred_element_type=f32)   # MXU, f32 acc
        h = h + b1_ref[...]
        h = _gelu_exact(h)                                        # f32 VPU/EUP

        mean = jnp.mean(h, axis=-1, keepdims=True)
        var = jnp.mean(jnp.square(h - mean), axis=-1, keepdims=True)
        h = (h - mean) * lax.rsqrt(var + LN_EPS)
        h = h * gamma_ref[...] + beta_ref[...]

        emb = jnp.dot(h.astype(matmul_dtype), w2_ref[...],
                      preferred_element_type=f32)                 # (TM, 768)
        emb = emb + b2_ref[...]

        if normalize:
            # F.normalize: x / max(||x||, eps) == x * rsqrt(max(||x||^2, eps^2))
            sumsq = jnp.sum(emb * emb, axis=-1, keepdims=True)
            emb = emb * lax.rsqrt(jnp.maximum(sumsq, NORM_EPS * NORM_EPS))
            # Pre-scale by 1/temp so both logits and diag inherit the scale
            # (reference divides logits by temp only when normalize=True).
            emb = emb * inv_temp

        # diag(i) = emb_i . labels_i in f32 (row-pipelined f32 label rows),
        # plus the reference's (1 - m_i*m_i)*(-1e4) term when vmask_i == 0.
        diag = jnp.sum(emb * lab_rows_ref[...], axis=-1, keepdims=True)
        diag_ref[...] = diag + jnp.where(vc_ref[...] > 0.0, 0.0, -10000.0)

        emb_ref[...] = emb.astype(matmul_dtype)
        m_ref[...] = jnp.full_like(m_ref, -jnp.inf)
        l_ref[...] = jnp.zeros_like(l_ref)

    # ---- every column step: partial logits + masked online logsumexp --------
    logits = lax.dot_general(emb_ref[...], labels_ref[...],
                             (((1,), (1,)), ((), ())),
                             preferred_element_type=f32)          # (TM, TC)
    # fused mask: rows with vmask_i==1 see (1-vmask_j)*(-1e4), rows with
    # vmask_i==0 see a uniform -1e4; padded columns carry a -1e30 kill term.
    masked = logits + jnp.where(vc_ref[...] > 0.0,
                                bias_valid_ref[...], bias_masked_ref[...])

    m_prev = m_ref[...]
    m_new = jnp.maximum(m_prev, jnp.max(masked, axis=-1, keepdims=True))
    alpha = jnp.exp(m_prev - m_new)
    l_ref[...] = alpha * l_ref[...] + jnp.sum(jnp.exp(masked - m_new),
                                              axis=-1, keepdims=True)
    m_ref[...] = m_new

    # ---- last column tile: finalize row loss = lse - diag, sel-weighted -----
    @pl.when(k == pl.num_programs(1) - 1)
    def _():
        lse = m_ref[...] + jnp.log(l_ref[...])
        loss_ref[...] = (lse - diag_ref[...]) * sel_ref[...]


def mfm_head_pallas(mfm_emb, mfm_labels, mfm_labels_index, visual_attn_mask,
                    params, temp=1.0, normalize=False,
                    matmul_dtype=jnp.bfloat16, row_tile=256, col_tile=512):
    w1, b1, gamma, beta, w2, b2 = params
    b, n, d = mfm_emb.shape
    assert d == EMBED_DIM
    M = b * n

    # Row tiling (>=16 so bf16 tiles stay layout-native (16,128)).
    tm = int(min(row_tile, max(16, _round_up(M, 8))))
    m_pad_r = _round_up(M, tm)
    # Column tiling for the contrastive logits / online logsumexp.
    if M <= col_tile:
        tc = max(16, _round_up(M, 8))       # single full-extent column block
        m_pad_c = tc
    else:
        tc = int(col_tile)                  # multiple of 128 for lane layout
        assert tc % 128 == 0
        m_pad_c = _round_up(M, tc)
    grid = (m_pad_r // tm, m_pad_c // tc)

    # ---- operand prep (wrapper) ---------------------------------------------
    x2 = mfm_emb.reshape(M, d).astype(matmul_dtype)        # pre-cast activations
    labels2 = mfm_labels.reshape(M, d).astype(jnp.float32)
    if normalize:
        sumsq = jnp.sum(labels2 * labels2, axis=-1, keepdims=True)
        labels2 = labels2 * lax.rsqrt(jnp.maximum(sumsq, NORM_EPS * NORM_EPS))

    vmask = visual_attn_mask.astype(jnp.float32).reshape(M)
    sel = (mfm_labels_index.reshape(M) != -100).astype(jnp.float32)

    # Row-padded operands (rows of the logits matrix).
    pad_r = m_pad_r - M
    if pad_r:
        x2p = jnp.pad(x2, ((0, pad_r), (0, 0)))
        lab_rows = jnp.pad(labels2, ((0, pad_r), (0, 0)))
        vmask_r = jnp.pad(vmask, (0, pad_r))
        sel_r = jnp.pad(sel, (0, pad_r))
    else:
        x2p, lab_rows, vmask_r, sel_r = x2, labels2, vmask, sel
    vc = vmask_r.reshape(m_pad_r, 1)
    sel_col = sel_r.reshape(m_pad_r, 1)

    # Column-padded operands (columns of the logits = label rows), pre-cast to
    # the matmul dtype so the kernel never re-casts them.
    pad_c = m_pad_c - M
    labels_cols = jnp.pad(labels2, ((0, pad_c), (0, 0))) if pad_c else labels2
    labels_mm = labels_cols.astype(matmul_dtype)
    vmask_c = jnp.pad(vmask, (0, pad_c)) if pad_c else vmask
    pad_kill = jnp.where(jnp.arange(m_pad_c) < M, 0.0, -1e30).reshape(1, m_pad_c)
    bias_valid = (1.0 - vmask_c).reshape(1, m_pad_c) * (-10000.0) + pad_kill
    bias_masked = jnp.full((1, m_pad_c), -10000.0, jnp.float32) + pad_kill

    w1c = w1.astype(matmul_dtype)
    w2c = w2.astype(matmul_dtype)
    b1r = b1.reshape(1, d).astype(jnp.float32)
    gr = gamma.reshape(1, d).astype(jnp.float32)
    br = beta.reshape(1, d).astype(jnp.float32)
    b2r = b2.reshape(1, d).astype(jnp.float32)

    # ---- VMEM budget: tile-sized only (no O(M) residents any more) ----------
    mmb = jnp.dtype(matmul_dtype).itemsize
    f32b = 4
    est = (2 * (tm * d * mmb                 # x row tile (double-buffered)
                + tm * d * f32b              # f32 label rows for diag
                + tc * d * mmb               # label column tile
                + 2 * tc * f32b              # bias rows for this column tile
                + 3 * tm * f32b)             # vc / sel / per-row loss
           + 2 * 2 * d * d * mmb             # w1, w2 (double-buffered residents)
           + tm * d * (mmb + 6 * f32b)       # emb scratch + MFMBlock f32 temps
           + 3 * tm * f32b                   # diag / m / l scratch
           + 4 * tm * tc * f32b)             # logits / masked / exp temporaries
    try:
        cap = int(pltpu.get_tpu_info().vmem_capacity_bytes) - (16 << 20)
    except Exception:
        cap = 48 << 20                       # safe floor (v7x per-TC is 64 MiB)
    vmem_limit = int(min(max(est + (8 << 20), 32 << 20), max(cap, 32 << 20)))

    kernel = functools.partial(
        mfm_head_kernel, inv_temp=float(1.0 / temp), normalize=bool(normalize),
        matmul_dtype=matmul_dtype)

    const = lambda i, k: (0, 0)
    row_map = lambda i, k: (i, 0)
    col_map = lambda i, k: (k, 0)
    colrow_map = lambda i, k: (0, k)

    out = pl.pallas_call(
        kernel,
        out_shape=jax.ShapeDtypeStruct((m_pad_r, 1), jnp.float32),
        grid_spec=pltpu.PrefetchScalarGridSpec(
            num_scalar_prefetch=0,
            grid=grid,
            in_specs=[
                pl.BlockSpec((tm, d), row_map),      # mfm_emb rows (mm dtype)
                pl.BlockSpec((tm, d), row_map),      # f32 label rows (diag)
                pl.BlockSpec((tc, d), col_map),      # label columns (mm dtype)
                pl.BlockSpec((d, d), const),         # w1
                pl.BlockSpec((1, d), const),         # b1
                pl.BlockSpec((1, d), const),         # LayerNorm gamma
                pl.BlockSpec((1, d), const),         # LayerNorm beta
                pl.BlockSpec((d, d), const),         # w2 / decoder
                pl.BlockSpec((1, d), const),         # decoder bias
                pl.BlockSpec((tm, 1), row_map),      # vmask for this row tile
                pl.BlockSpec((1, tc), colrow_map),   # column bias (vmask_i == 1)
                pl.BlockSpec((1, tc), colrow_map),   # column bias (vmask_i == 0)
                pl.BlockSpec((tm, 1), row_map),      # sel = (labels_index != -100)
            ],
            out_specs=pl.BlockSpec((tm, 1), row_map),
            scratch_shapes=[
                pltpu.VMEM((tm, d), matmul_dtype),   # cached emb for this row tile
                pltpu.VMEM((tm, 1), jnp.float32),    # diag
                pltpu.VMEM((tm, 1), jnp.float32),    # running max
                pltpu.VMEM((tm, 1), jnp.float32),    # running sum
            ],
        ),
        compiler_params=pltpu.CompilerParams(
            dimension_semantics=("parallel", "arbitrary"),
            vmem_limit_bytes=vmem_limit,
        ),
    )(x2p, lab_rows, labels_mm, w1c, b1r, gr, br, w2c, b2r,
      vc, bias_valid, bias_masked, sel_col)

    # Masked mean is O(M) and done outside the grid; padded rows are exact
    # zeros.  (NaN if every label index is -100 — same as the reference.)
    return jnp.sum(out) / jnp.sum(sel)


def mfm_head_reference(mfm_emb, mfm_labels, mfm_labels_index, visual_attn_mask,
                       params, temp=1.0, normalize=False):
    w1, b1, gamma, beta, w2, b2 = params
    b, n, d = mfm_emb.shape
    h = jnp.dot(mfm_emb, w1) + b1
    h = 0.5 * h * (1.0 + lax.erf(h / np.sqrt(2.0)))
    mean = jnp.mean(h, axis=-1, keepdims=True)
    var = jnp.mean(jnp.square(h - mean), axis=-1, keepdims=True)
    h = (h - mean) / jnp.sqrt(var + LN_EPS) * gamma + beta
    emb = jnp.dot(h, w2) + b2
    labels = mfm_labels
    if normalize:
        emb = emb / jnp.maximum(jnp.linalg.norm(emb, axis=-1, keepdims=True), NORM_EPS)
        labels = labels / jnp.maximum(jnp.linalg.norm(labels, axis=-1, keepdims=True), NORM_EPS)
    emb = emb.reshape(b * n, d)
    labels = labels.reshape(b * n, d)
    logits = emb @ labels.T
    if normalize:
        logits = logits / temp
    vm = visual_attn_mask.astype(jnp.float32).reshape(-1)
    mask_matrix = vm[:, None] * vm[None, :]
    masked = logits + (1.0 - mask_matrix) * (-10000.0)
    logpt = jax.nn.log_softmax(masked, axis=-1)
    diag = jnp.diag(logpt)
    sel = (mfm_labels_index.reshape(-1) != -100).astype(jnp.float32)
    return jnp.sum(-diag * sel) / jnp.sum(sel)


if __name__ == "__main__":
    B, N, D = 2, 8, EMBED_DIM  # D fixed to 768 by the module definition
    key = jax.random.PRNGKey(0)
    k = jax.random.split(key, 8)

    mfm_emb = jax.random.normal(k[0], (B, N, D), jnp.float32)
    mfm_labels = jax.random.normal(k[1], (B, N, D), jnp.float32)

    # visual attention mask: last two tokens of each sequence are padding
    visual_attn_mask = jnp.ones((B, N), jnp.float32).at[:, -2:].set(0.0)
    # labels index: -100 (ignored) at padded positions and at one extra spot
    mfm_labels_index = jnp.zeros((B, N), jnp.int32)
    mfm_labels_index = mfm_labels_index.at[:, -2:].set(-100)
    mfm_labels_index = mfm_labels_index.at[0, 1].set(-100)

    # Deterministic parameter init (weights stored pre-transposed: y = x @ W + b)
    w1 = 0.02 * jax.random.normal(k[2], (D, D), jnp.float32)
    b1 = 0.01 * jax.random.normal(k[3], (D,), jnp.float32)
    gamma = 1.0 + 0.1 * jax.random.normal(k[4], (D,), jnp.float32)
    beta = 0.1 * jax.random.normal(k[5], (D,), jnp.float32)
    w2 = 0.02 * jax.random.normal(k[6], (D, 768), jnp.float32)
    b2 = jnp.zeros((768,), jnp.float32)  # module inits decoder bias to zeros
    params = (w1, b1, gamma, beta, w2, b2)

    cases = [
        # (temp, normalize, matmul_dtype, rtol, atol)
        (1.0, False, jnp.float32, 1e-3, 1e-3),     # exact-precision path
        (0.07, True, jnp.float32, 1e-3, 1e-3),     # normalize + temperature path
        (1.0, False, jnp.bfloat16, 5e-2, 5e-2),    # MXU-native bf16 matmuls, f32 acc
    ]
    for temp, normalize, mmdt, rtol, atol in cases:
        loss = mfm_head_pallas(mfm_emb, mfm_labels, mfm_labels_index,
                               visual_attn_mask, params, temp=temp,
                               normalize=normalize, matmul_dtype=mmdt)
        loss = jax.block_until_ready(loss)
        ref = mfm_head_reference(mfm_emb, mfm_labels, mfm_labels_index,
                                 visual_attn_mask, params, temp=temp,
                                 normalize=normalize)
        assert np.isfinite(float(loss)), (temp, normalize, mmdt, float(loss))
        assert np.allclose(float(loss), float(ref), rtol=rtol, atol=atol), \
            (temp, normalize, mmdt, float(loss), float(ref))

    print("KERNEL_OK")
</pallas_src>

<mosaic_0001>
module attributes {stable_mosaic.version = 11 : i64} {
  func.func @mfm_head_kernel(%arg0: i32, %arg1: i32, %arg2: memref<16x768xf32, #tpu.memory_space<vmem>>, %arg3: memref<16x768xf32, #tpu.memory_space<vmem>>, %arg4: memref<16x768xf32, #tpu.memory_space<vmem>>, %arg5: memref<768x768xf32, #tpu.memory_space<vmem>>, %arg6: memref<1x768xf32, #tpu.memory_space<vmem>>, %arg7: memref<1x768xf32, #tpu.memory_space<vmem>>, %arg8: memref<1x768xf32, #tpu.memory_space<vmem>>, %arg9: memref<768x768xf32, #tpu.memory_space<vmem>>, %arg10: memref<1x768xf32, #tpu.memory_space<vmem>>, %arg11: memref<16x1xf32, #tpu.memory_space<vmem>>, %arg12: memref<1x16xf32, #tpu.memory_space<vmem>>, %arg13: memref<1x16xf32, #tpu.memory_space<vmem>>, %arg14: memref<16x1xf32, #tpu.memory_space<vmem>>, %arg15: memref<16x1xf32, #tpu.memory_space<vmem>>, %arg16: memref<16x768xf32, #tpu.memory_space<vmem>>, %arg17: memref<16x1xf32, #tpu.memory_space<vmem>>, %arg18: memref<16x1xf32, #tpu.memory_space<vmem>>, %arg19: memref<16x1xf32, #tpu.memory_space<vmem>>) attributes {dimension_semantics = [#tpu.dimension_semantics<parallel>, #tpu.dimension_semantics<arbitrary>], iteration_bounds = array<i64: 1, 1>, scalar_prefetch = 0 : i64, scratch_operands = 4 : i64, tpu.core_type = #tpu.core_type<tc>, window_params = [{transform_indices = @transform_0, window_bounds = array<i64: 16, 768>}, {transform_indices = @transform_1, window_bounds = array<i64: 16, 768>}, {transform_indices = @transform_2, window_bounds = array<i64: 16, 768>}, {pipeline_mode = #tpu.pipeline_mode<synchronous>, transform_indices = @transform_3, window_bounds = array<i64: 768, 768>}, {pipeline_mode = #tpu.pipeline_mode<synchronous>, transform_indices = @transform_4, window_bounds = array<i64: 1, 768>}, {pipeline_mode = #tpu.pipeline_mode<synchronous>, transform_indices = @transform_5, window_bounds = array<i64: 1, 768>}, {pipeline_mode = #tpu.pipeline_mode<synchronous>, transform_indices = @transform_6, window_bounds = array<i64: 1, 768>}, {pipeline_mode = #tpu.pipeline_mode<synchronous>, transform_indices = @transform_7, window_bounds = array<i64: 768, 768>}, {pipeline_mode = #tpu.pipeline_mode<synchronous>, transform_indices = @transform_8, window_bounds = array<i64: 1, 768>}, {transform_indices = @transform_9, window_bounds = array<i64: 16, 1>}, {transform_indices = @transform_10, window_bounds = array<i64: 1, 16>}, {transform_indices = @transform_11, window_bounds = array<i64: 1, 16>}, {transform_indices = @transform_12, window_bounds = array<i64: 16, 1>}, {transform_indices = @transform_13, window_bounds = array<i64: 16, 1>}]} {
    %c0_i32 = arith.constant 0 : i32
    %0 = arith.cmpi eq, %arg1, %c0_i32 : i32
    %1 = arith.extui %0 : i1 to i32
    %c0_i32_0 = arith.constant 0 : i32
    %2 = arith.cmpi ne, %1, %c0_i32_0 : i32
    scf.if %2 {
      %c0_23 = arith.constant 0 : index
      %c0_24 = arith.constant 0 : index
      %38 = vector.load %arg2[%c0_23, %c0_24] : memref<16x768xf32, #tpu.memory_space<vmem>>, vector<16x768xf32>
      %c0_25 = arith.constant 0 : index
      %c0_26 = arith.constant 0 : index
      %39 = vector.load %arg5[%c0_25, %c0_26] : memref<768x768xf32, #tpu.memory_space<vmem>>, vector<768x768xf32>
      %cst_27 = arith.constant dense<0.000000e+00> : vector<16x768xf32>
      %40 = tpu.matmul %38, %39, %cst_27 {dimension_numbers = #tpu.dot_dimension_numbers<[1], [0], [0], [1], [0, 0, 1, 1], [], []>} : vector<16x768xf32>, vector<768x768xf32>, vector<16x768xf32> -> vector<16x768xf32>
      %c0_28 = arith.constant 0 : index
      %c0_29 = arith.constant 0 : index
      %41 = vector.load %arg6[%c0_28, %c0_29] : memref<1x768xf32, #tpu.memory_space<vmem>>, vector<1x768xf32>
      %42 = vector.broadcast %41 : vector<1x768xf32> to vector<16x768xf32>
      %43 = arith.addf %40, %42 : vector<16x768xf32>
      %cst_30 = arith.constant 5.000000e-01 : f32
      %44 = vector.broadcast %cst_30 : f32 to vector<16x768xf32>
      %45 = arith.mulf %44, %43 : vector<16x768xf32>
      %cst_31 = arith.constant 0.707106769 : f32
      %46 = vector.broadcast %cst_31 : f32 to vector<16x768xf32>
      %47 = arith.mulf %43, %46 : vector<16x768xf32>
      %48 = math.erf %47 : vector<16x768xf32>
      %cst_32 = arith.constant 1.000000e+00 : f32
      %49 = vector.broadcast %cst_32 : f32 to vector<16x768xf32>
      %50 = arith.addf %49, %48 : vector<16x768xf32>
      %51 = arith.mulf %45, %50 : vector<16x768xf32>
      %cst_33 = arith.constant dense<0.000000e+00> : vector<16xf32>
      %52 = vector.multi_reduction <add>, %51, %cst_33 [1] : vector<16x768xf32> to vector<16xf32>
      %53 = vector.shape_cast %52 : vector<16xf32> to vector<16x1xf32>
      %cst_34 = arith.constant 7.680000e+02 : f32
      %54 = vector.broadcast %cst_34 : f32 to vector<16x1xf32>
      %55 = arith.divf %53, %54 : vector<16x1xf32>
      %56 = vector.broadcast %55 : vector<16x1xf32> to vector<16x768xf32>
      %57 = arith.subf %51, %56 : vector<16x768xf32>
      %58 = arith.mulf %57, %57 : vector<16x768xf32>
      %cst_35 = arith.constant dense<0.000000e+00> : vector<16xf32>
      %59 = vector.multi_reduction <add>, %58, %cst_35 [1] : vector<16x768xf32> to vector<16xf32>
      %60 = vector.shape_cast %59 : vector<16xf32> to vector<16x1xf32>
      %cst_36 = arith.constant 7.680000e+02 : f32
      %61 = vector.broadcast %cst_36 : f32 to vector<16x1xf32>
      %62 = arith.divf %60, %61 : vector<16x1xf32>
      %63 = vector.broadcast %55 : vector<16x1xf32> to vector<16x768xf32>
      %64 = arith.subf %51, %63 : vector<16x768xf32>
      %cst_37 = arith.constant 9.99999996E-13 : f32
      %65 = vector.broadcast %cst_37 : f32 to vector<16x1xf32>
      %66 = arith.addf %62, %65 : vector<16x1xf32>
      %67 = math.rsqrt %66 : vector<16x1xf32>
      %68 = vector.broadcast %67 : vector<16x1xf32> to vector<16x768xf32>
      %69 = arith.mulf %64, %68 : vector<16x768xf32>
      %c0_38 = arith.constant 0 : index
      %c0_39 = arith.constant 0 : index
      %70 = vector.load %arg7[%c0_38, %c0_39] : memref<1x768xf32, #tpu.memory_space<vmem>>, vector<1x768xf32>
      %71 = vector.broadcast %70 : vector<1x768xf32> to vector<16x768xf32>
      %72 = arith.mulf %69, %71 : vector<16x768xf32>
      %c0_40 = arith.constant 0 : index
      %c0_41 = arith.constant 0 : index
      %73 = vector.load %arg8[%c0_40, %c0_41] : memref<1x768xf32, #tpu.memory_space<vmem>>, vector<1x768xf32>
      %74 = vector.broadcast %73 : vector<1x768xf32> to vector<16x768xf32>
      %75 = arith.addf %72, %74 : vector<16x768xf32>
      %c0_42 = arith.constant 0 : index
      %c0_43 = arith.constant 0 : index
      %76 = vector.load %arg9[%c0_42, %c0_43] : memref<768x768xf32, #tpu.memory_space<vmem>>, vector<768x768xf32>
      %cst_44 = arith.constant dense<0.000000e+00> : vector<16x768xf32>
      %77 = tpu.matmul %75, %76, %cst_44 {dimension_numbers = #tpu.dot_dimension_numbers<[1], [0], [0], [1], [0, 0, 1, 1], [], []>} : vector<16x768xf32>, vector<768x768xf32>, vector<16x768xf32> -> vector<16x768xf32>
      %c0_45 = arith.constant 0 : index
      %c0_46 = arith.constant 0 : index
      %78 = vector.load %arg10[%c0_45, %c0_46] : memref<1x768xf32, #tpu.memory_space<vmem>>, vector<1x768xf32>
      %79 = vector.broadcast %78 : vector<1x768xf32> to vector<16x768xf32>
      %80 = arith.addf %77, %79 : vector<16x768xf32>
      %c0_47 = arith.constant 0 : index
      %c0_48 = arith.constant 0 : index
      %81 = vector.load %arg3[%c0_47, %c0_48] : memref<16x768xf32, #tpu.memory_space<vmem>>, vector<16x768xf32>
      %82 = arith.mulf %80, %81 : vector<16x768xf32>
      %cst_49 = arith.constant dense<0.000000e+00> : vector<16xf32>
      %83 = vector.multi_reduction <add>, %82, %cst_49 [1] : vector<16x768xf32> to vector<16xf32>
      %84 = vector.shape_cast %83 : vector<16xf32> to vector<16x1xf32>
      %c0_50 = arith.constant 0 : index
      %c0_51 = arith.constant 0 : index
      %85 = vector.load %arg11[%c0_50, %c0_51] : memref<16x1xf32, #tpu.memory_space<vmem>>, vector<16x1xf32>
      %cst_52 = arith.constant 0.000000e+00 : f32
      %86 = vector.broadcast %cst_52 : f32 to vector<16x1xf32>
      %87 = arith.cmpf ogt, %85, %86 : vector<16x1xf32>
      %cst_53 = arith.constant 0.000000e+00 : f32
      %cst_54 = arith.constant -1.000000e+04 : f32
      %88 = vector.broadcast %cst_53 : f32 to vector<16x1xf32>
      %89 = vector.broadcast %cst_54 : f32 to vector<16x1xf32>
      %90 = arith.select %87, %88, %89 : vector<16x1xi1>, vector<16x1xf32>
      %91 = arith.addf %84, %90 : vector<16x1xf32>
      %c0_55 = arith.constant 0 : index
      %c0_56 = arith.constant 0 : index
      %92 = vector.load %arg17[%c0_55, %c0_56] : memref<16x1xf32, #tpu.memory_space<vmem>>, vector<16x1xf32>
      tpu.vector_store %arg17[%c0_55, %c0_56], %91 {strides = array<i32>} : memref<16x1xf32, #tpu.memory_space<vmem>>, vector<16x1xf32>,
      %c0_57 = arith.constant 0 : index
      %c0_58 = arith.constant 0 : index
      %93 = vector.load %arg16[%c0_57, %c0_58] : memref<16x768xf32, #tpu.memory_space<vmem>>, vector<16x768xf32>
      tpu.vector_store %arg16[%c0_57, %c0_58], %80 {strides = array<i32>} : memref<16x768xf32, #tpu.memory_space<vmem>>, vector<16x768xf32>,
      %cst_59 = arith.constant 0xFF800000 : f32
      %94 = vector.broadcast %cst_59 : f32 to vector<16x1xf32>
      %c0_60 = arith.constant 0 : index
      %c0_61 = arith.constant 0 : index
      %95 = vector.load %arg18[%c0_60, %c0_61] : memref<16x1xf32, #tpu.memory_space<vmem>>, vector<16x1xf32>
      tpu.vector_store %arg18[%c0_60, %c0_61], %94 {strides = array<i32>} : memref<16x1xf32, #tpu.memory_space<vmem>>, vector<16x1xf32>,
      %cst_62 = arith.constant 0.000000e+00 : f32
      %96 = vector.broadcast %cst_62 : f32 to vector<16x1xf32>
      %c0_63 = arith.constant 0 : index
      %c0_64 = arith.constant 0 : index
      %97 = vector.load %arg19[%c0_63, %c0_64] : memref<16x1xf32, #tpu.memory_space<vmem>>, vector<16x1xf32>
      tpu.vector_store %arg19[%c0_63, %c0_64], %96 {strides = array<i32>} : memref<16x1xf32, #tpu.memory_space<vmem>>, vector<16x1xf32>,
    } else {
    }
    %c0 = arith.constant 0 : index
    %c0_1 = arith.constant 0 : index
    %3 = vector.load %arg16[%c0, %c0_1] : memref<16x768xf32, #tpu.memory_space<vmem>>, vector<16x768xf32>
    %c0_2 = arith.constant 0 : index
    %c0_3 = arith.constant 0 : index
    %4 = vector.load %arg4[%c0_2, %c0_3] : memref<16x768xf32, #tpu.memory_space<vmem>>, vector<16x768xf32>
    %cst = arith.constant dense<0.000000e+00> : vector<16x16xf32>
    %5 = tpu.matmul %3, %4, %cst {dimension_numbers = #tpu.dot_dimension_numbers<[1], [1], [0], [0], [0, 0, 1, 0], [], []>} : vector<16x768xf32>, vector<16x768xf32>, vector<16x16xf32> -> vector<16x16xf32>
    %c0_4 = arith.constant 0 : index
    %c0_5 = arith.constant 0 : index
    %6 = vector.load %arg11[%c0_4, %c0_5] : memref<16x1xf32, #tpu.memory_space<vmem>>, vector<16x1xf32>
    %cst_6 = arith.constant 0.000000e+00 : f32
    %7 = vector.broadcast %cst_6 : f32 to vector<16x1xf32>
    %8 = arith.cmpf ogt, %6, %7 : vector<16x1xf32>
    %c0_7 = arith.constant 0 : index
    %c0_8 = arith.constant 0 : index
    %9 = vector.load %arg12[%c0_7, %c0_8] : memref<1x16xf32, #tpu.memory_space<vmem>>, vector<1x16xf32>
    %c0_9 = arith.constant 0 : index
    %c0_10 = arith.constant 0 : index
    %10 = vector.load %arg13[%c0_9, %c0_10] : memref<1x16xf32, #tpu.memory_space<vmem>>, vector<1x16xf32>
    %11 = vector.shape_cast %8 : vector<16x1xi1> to vector<16x1xi1>
    %12 = vector.broadcast %11 : vector<16x1xi1> to vector<16x16xi1>
    %13 = vector.shape_cast %9 : vector<1x16xf32> to vector<1x16xf32>
    %14 = vector.broadcast %13 : vector<1x16xf32> to vector<16x16xf32>
    %15 = vector.shape_cast %10 : vector<1x16xf32> to vector<1x16xf32>
    %16 = vector.broadcast %15 : vector<1x16xf32> to vector<16x16xf32>
    %17 = arith.select %12, %14, %16 : vector<16x16xi1>, vector<16x16xf32>
    %18 = arith.addf %5, %17 : vector<16x16xf32>
    %c0_11 = arith.constant 0 : index
    %c0_12 = arith.constant 0 : index
    %19 = vector.load %arg18[%c0_11, %c0_12] : memref<16x1xf32, #tpu.memory_space<vmem>>, vector<16x1xf32>
    %cst_13 = arith.constant dense<0xFF800000> : vector<16xf32>
    %20 = vector.multi_reduction <maximumf>, %18, %cst_13 [1] : vector<16x16xf32> to vector<16xf32>
    %21 = vector.shape_cast %20 : vector<16xf32> to vector<16x1xf32>
    %22 = arith.maximumf %19, %21 : vector<16x1xf32>
    %23 = arith.subf %19, %22 : vector<16x1xf32>
    %24 = math.exp %23 : vector<16x1xf32>
    %c0_14 = arith.constant 0 : index
    %c0_15 = arith.constant 0 : index
    %25 = vector.load %arg19[%c0_14, %c0_15] : memref<16x1xf32, #tpu.memory_space<vmem>>, vector<16x1xf32>
    %26 = arith.mulf %24, %25 : vector<16x1xf32>
    %27 = vector.broadcast %22 : vector<16x1xf32> to vector<16x16xf32>
    %28 = arith.subf %18, %27 : vector<16x16xf32>
    %29 = math.exp %28 : vector<16x16xf32>
    %cst_16 = arith.constant dense<0.000000e+00> : vector<16xf32>
    %30 = vector.multi_reduction <add>, %29, %cst_16 [1] : vector<16x16xf32> to vector<16xf32>
    %31 = vector.shape_cast %30 : vector<16xf32> to vector<16x1xf32>
    %32 = arith.addf %26, %31 : vector<16x1xf32>
    %c0_17 = arith.constant 0 : index
    %c0_18 = arith.constant 0 : index
    %33 = vector.load %arg19[%c0_17, %c0_18] : memref<16x1xf32, #tpu.memory_space<vmem>>, vector<16x1xf32>
    tpu.vector_store %arg19[%c0_17, %c0_18], %32 {strides = array<i32>} : memref<16x1xf32, #tpu.memory_space<vmem>>, vector<16x1xf32>,
    %c0_19 = arith.constant 0 : index
    %c0_20 = arith.constant 0 : index
    %34 = vector.load %arg18[%c0_19, %c0_20] : memref<16x1xf32, #tpu.memory_space<vmem>>, vector<16x1xf32>
    tpu.vector_store %arg18[%c0_19, %c0_20], %22 {strides = array<i32>} : memref<16x1xf32, #tpu.memory_space<vmem>>, vector<16x1xf32>,
    %c0_i32_21 = arith.constant 0 : i32
    %35 = arith.cmpi eq, %arg1, %c0_i32_21 : i32
    %36 = arith.extui %35 : i1 to i32
    %c0_i32_22 = arith.constant 0 : i32
    %37 = arith.cmpi ne, %36, %c0_i32_22 : i32
    scf.if %37 {
      %c0_23 = arith.constant 0 : index
      %c0_24 = arith.constant 0 : index
      %38 = vector.load %arg18[%c0_23, %c0_24] : memref<16x1xf32, #tpu.memory_space<vmem>>, vector<16x1xf32>
      %c0_25 = arith.constant 0 : index
      %c0_26 = arith.constant 0 : index
      %39 = vector.load %arg19[%c0_25, %c0_26] : memref<16x1xf32, #tpu.memory_space<vmem>>, vector<16x1xf32>
      %40 = math.log %39 : vector<16x1xf32>
      %41 = arith.addf %38, %40 : vector<16x1xf32>
      %c0_27 = arith.constant 0 : index
      %c0_28 = arith.constant 0 : index
      %42 = vector.load %arg17[%c0_27, %c0_28] : memref<16x1xf32, #tpu.memory_space<vmem>>, vector<16x1xf32>
      %43 = arith.subf %41, %42 : vector<16x1xf32>
      %c0_29 = arith.constant 0 : index
      %c0_30 = arith.constant 0 : index
      %44 = vector.load %arg14[%c0_29, %c0_30] : memref<16x1xf32, #tpu.memory_space<vmem>>, vector<16x1xf32>
      %45 = arith.mulf %43, %44 : vector<16x1xf32>
      %c0_31 = arith.constant 0 : index
      %c0_32 = arith.constant 0 : index
      %46 = vector.load %arg15[%c0_31, %c0_32] : memref<16x1xf32, #tpu.memory_space<vmem>>, vector<16x1xf32>
      tpu.vector_store %arg15[%c0_31, %c0_32], %45 {strides = array<i32>} : memref<16x1xf32, #tpu.memory_space<vmem>>, vector<16x1xf32>,
    } else {
    }
    return
  }
  func.func @transform_0(%arg0: i32, %arg1: i32) -> (i32, i32) {
    %c0_i32 = arith.constant 0 : i32
    %c0_i32_0 = arith.constant 0 : i32
    return %arg0, %c0_i32 : i32, i32
  }
  func.func @transform_1(%arg0: i32, %arg1: i32) -> (i32, i32) {
    %c0_i32 = arith.constant 0 : i32
    %c0_i32_0 = arith.constant 0 : i32
    return %arg0, %c0_i32 : i32, i32
  }
  func.func @transform_2(%arg0: i32, %arg1: i32) -> (i32, i32) {
    %c0_i32 = arith.constant 0 : i32
    %c0_i32_0 = arith.constant 0 : i32
    return %arg1, %c0_i32 : i32, i32
  }
  func.func @transform_3(%arg0: i32, %arg1: i32) -> (i32, i32) {
    %c0_i32 = arith.constant 0 : i32
    %c0_i32_0 = arith.constant 0 : i32
    %c0_i32_1 = arith.constant 0 : i32
    return %c0_i32, %c0_i32_0 : i32, i32
  }
  func.func @transform_4(%arg0: i32, %arg1: i32) -> (i32, i32) {
    %c0_i32 = arith.constant 0 : i32
    %c0_i32_0 = arith.constant 0 : i32
    %c0_i32_1 = arith.constant 0 : i32
    return %c0_i32, %c0_i32_0 : i32, i32
  }
  func.func @transform_5(%arg0: i32, %arg1: i32) -> (i32, i32) {
    %c0_i32 = arith.constant 0 : i32
    %c0_i32_0 = arith.constant 0 : i32
    %c0_i32_1 = arith.constant 0 : i32
    return %c0_i32, %c0_i32_0 : i32, i32
  }
  func.func @transform_6(%arg0: i32, %arg1: i32) -> (i32, i32) {
    %c0_i32 = arith.constant 0 : i32
    %c0_i32_0 = arith.constant 0 : i32
    %c0_i32_1 = arith.constant 0 : i32
    return %c0_i32, %c0_i32_0 : i32, i32
  }
  func.func @transform_7(%arg0: i32, %arg1: i32) -> (i32, i32) {
    %c0_i32 = arith.constant 0 : i32
    %c0_i32_0 = arith.constant 0 : i32
    %c0_i32_1 = arith.constant 0 : i32
    return %c0_i32, %c0_i32_0 : i32, i32
  }
  func.func @transform_8(%arg0: i32, %arg1: i32) -> (i32, i32) {
    %c0_i32 = arith.constant 0 : i32
    %c0_i32_0 = arith.constant 0 : i32
    %c0_i32_1 = arith.constant 0 : i32
    return %c0_i32, %c0_i32_0 : i32, i32
  }
  func.func @transform_9(%arg0: i32, %arg1: i32) -> (i32, i32) {
    %c0_i32 = arith.constant 0 : i32
    %c0_i32_0 = arith.constant 0 : i32
    return %arg0, %c0_i32 : i32, i32
  }
  func.func @transform_10(%arg0: i32, %arg1: i32) -> (i32, i32) {
    %c0_i32 = arith.constant 0 : i32
    %c0_i32_0 = arith.constant 0 : i32
    return %c0_i32, %arg1 : i32, i32
  }
  func.func @transform_11(%arg0: i32, %arg1: i32) -> (i32, i32) {
    %c0_i32 = arith.constant 0 : i32
    %c0_i32_0 = arith.constant 0 : i32
    return %c0_i32, %arg1 : i32, i32
  }
  func.func @transform_12(%arg0: i32, %arg1: i32) -> (i32, i32) {
    %c0_i32 = arith.constant 0 : i32
    %c0_i32_0 = arith.constant 0 : i32
    return %arg0, %c0_i32 : i32, i32
  }
  func.func @transform_13(%arg0: i32, %arg1: i32) -> (i32, i32) {
    %c0_i32 = arith.constant 0 : i32
    %c0_i32_0 = arith.constant 0 : i32
    return %arg0, %c0_i32 : i32, i32
  }
}

</mosaic_0001>

<bundles_post_ra>
// kernel: tpu_custom_call.1
= control target key start
LH: loop header
LB: loop body
LE: loop exit
PB: predicated region body
PF: predicated region fallthrough
CT: control target
= control target key end

     0   :  { %18 = vsyncpa [#allocation7], 0  ;;  %s5577_s0 = inlined_call_operand.hbm [shape: f32[16,768], index: 0, kind: input, shape index: {}]   ;;  %s5578_s1 = inlined_call_operand.hbm [shape: f32[16,768], index: 1, kind: input, shape index: {}]   ;;  %s5579_s2 = inlined_call_operand.hbm [shape: f32[16,768], index: 2, kind: input, shape index: {}]   ;;  %s5580_s3 = inlined_call_operand.hbm [shape: f32[768,768], index: 3, kind: input, shape index: {}]   ;;  %s5581_s4 = inlined_call_operand.hbm [shape: f32[1,768], index: 4, kind: input, shape index: {}]   ;;  %s5582_s5 = inlined_call_operand.hbm [shape: f32[1,768], index: 5, kind: input, shape index: {}]   ;;  %s5583_s6 = inlined_call_operand.hbm [shape: f32[1,768], index: 6, kind: input, shape index: {}]   ;;  %s5584_s7 = inlined_call_operand.hbm [shape: f32[768,768], index: 7, kind: input, shape index: {}]   ;;  %s5585_s8 = inlined_call_operand.hbm [shape: f32[1,768], index: 8, kind: input, shape index: {}]   ;;  %s5586_s9 = inlined_call_operand.vmem [shape: f32[16,1], index: 9, kind: input, shape index: {}]   ;;  %s5587_s10 = inlined_call_operand.hbm [shape: f32[1,16], index: 10, kind: input, shape index: {}]   ;;  %s5588_s11 = inlined_call_operand.hbm [shape: f32[1,16], index: 11, kind: input, shape index: {}]   ;;  %s5589_s12 = inlined_call_operand.vmem [shape: f32[16,1], index: 12, kind: input, shape index: {}]   ;;  %s5590_s13 = inlined_call_operand.vmem [shape: f32[16,1], index: 13, kind: output, shape index: {}]  }
   0x1   :  { %19 = vsyncpa [#allocation9], 0 }
   0x2   :  { %20 = vsyncpa [#allocation12], 0 }
   0x3   :  { %21 = vsyncpa [#allocation15], 0 }
   0x4   :  { %22 = vsyncpa [#allocation18], 0 }
   0x5   :  { %23 = vsyncpa [#allocation21], 0  ;;  %s5016_s25 = smov [#allocation8]   ;;  %s5017_s27 = smov [#allocation11]  }
   0x6   :  { %s41_s26 = sshll.u32 %s5016_s25, 4  ;;  %s65_s28 = sshll.u32 %s5017_s27, 4  ;;  %s42_s26 = int_to_ptr.vmem [resolvable:$true] %s41_s26  ;;  %s5103_s28 = int_to_ptr.vmem [resolvable:$true] %s65_s28 }
   0x7   :  { %s4762_s14 = scalar_lea.hbm %s5578_s1, 1536 }
   0x8   :  { %p4763_p0 = scmp.ne.s32.totalorder %s5578_s1, %s4762_s14  ;;  %p4766_p1 = scmp.lt.u32.totalorder %s4762_s14, %s5578_s1 }
   0xa   :  { %p4768_p2 = pnand %p4766_p1, %p4763_p0 }
   0xc   :  { %4771 = shalt.err (!%p4768_p2)
}
   0xd   :  { %s4772_s19 = scalar_lea.vmem %s42_s26, 1536  ;;  %p4777_p4 = scmp.lt.s32.totalorder %s42_s26, %s42_s26 }
   0xe   :  { %p4773_p3 = scmp.ne.s32.totalorder %s42_s26, %s4772_s19  ;;  %p4778_p5 = scmp.lt.s32.totalorder %s4772_s19, %s4772_s19 }
  0x10   :  { %p4779_p6 = por %p4778_p5, %p4777_p4 }
  0x12   :  { %p4780_p7 = pnand %p4779_p6, %p4773_p3 }
  0x14   :  { %4783 = shalt.err (!%p4780_p7)
}
  0x15   :  { %s5018_s20 = smov 768   ;;  %s5019_s21 = smov 48  }
  0x16   :  { %47 = dma.hbm_to_vmem [thread:$0]  %s5578_s1, 1536, %s42_s26, [#allocation9], %s5018_s20, %s5018_s20, %s5019_s21  }
  0x17   :  { %s4784_s27 = scalar_lea.hbm %s5580_s3, 73728 }
  0x18   :  { %p4785_p8 = scmp.ne.s32.totalorder %s5580_s3, %s4784_s27  ;;  %p4788_p9 = scmp.lt.u32.totalorder %s4784_s27, %s5580_s3 }
  0x1a   :  { %p4790_p10 = pnand %p4788_p9, %p4785_p8 }
  0x1c   :  { %4793 = shalt.err (!%p4790_p10)
}
  0x1d   :  { %s4794_s16 = scalar_lea.vmem %s5103_s28, 73728  ;;  %p4799_p12 = scmp.lt.s32.totalorder %s5103_s28, %s5103_s28 }
  0x1e   :  { %p4795_p11 = scmp.ne.s32.totalorder %s5103_s28, %s4794_s16  ;;  %p4800_p13 = scmp.lt.s32.totalorder %s4794_s16, %s4794_s16 }
  0x20   :  { %p4801_p0 = por %p4800_p13, %p4799_p12 }
  0x22   :  { %p4802_p1 = pnand %p4801_p0, %p4795_p11 }
  0x24   :  { %4805 = shalt.err (!%p4802_p1)
}
  0x25   :  { %71 = dma.hbm_to_vmem [thread:$0]  %s5580_s3, 73728, %s5103_s28, [#allocation12], %s5018_s20, %s5018_s20, %s5019_s21  }
  0x26   :  { %s5020_s17 = smov [#allocation14]   ;;  %s5021_s19 = smov [#allocation17]  }
  0x27   :  { %s88_s18 = sshll.u32 %s5020_s17, 4  ;;  %s107_s22 = sshll.u32 %s5021_s19, 4  ;;  %s89_s18 = int_to_ptr.vmem [resolvable:$true] %s88_s18  ;;  %s5140_s22 = int_to_ptr.vmem [resolvable:$true] %s107_s22 }
  0x28   :  { %s4806_s25 = scalar_lea.hbm %s5582_s5, 96 }
  0x29   :  { %p4807_p2 = scmp.ne.s32.totalorder %s5582_s5, %s4806_s25  ;;  %p4810_p3 = scmp.lt.u32.totalorder %s4806_s25, %s5582_s5 }
  0x2b   :  { %p4812_p4 = pnand %p4810_p3, %p4807_p2 }
  0x2d   :  { %4815 = shalt.err (!%p4812_p4)
}
  0x2e   :  { %s4816_s3 = scalar_lea.vmem %s89_s18, 96  ;;  %p4821_p6 = scmp.lt.s32.totalorder %s89_s18, %s89_s18 }
  0x2f   :  { %p4817_p5 = scmp.ne.s32.totalorder %s89_s18, %s4816_s3  ;;  %p4822_p7 = scmp.lt.s32.totalorder %s4816_s3, %s4816_s3 }
  0x31   :  { %p4823_p8 = por %p4822_p7, %p4821_p6 }
  0x33   :  { %p4824_p9 = pnand %p4823_p8, %p4817_p5 }
  0x35   :  { %4827 = shalt.err (!%p4824_p9)
}
  0x36   :  { %91 = dma.hbm_to_vmem [thread:$0]  %s5582_s5, 96, %s89_s18, [#allocation15]  }
  0x37   :  { %s4828_s26 = scalar_lea.hbm %s5584_s7, 73728 }
  0x38   :  { %p4829_p10 = scmp.ne.s32.totalorder %s5584_s7, %s4828_s26  ;;  %p4832_p11 = scmp.lt.u32.totalorder %s4828_s26, %s5584_s7 }
  0x3a   :  { %p4834_p12 = pnand %p4832_p11, %p4829_p10 }
  0x3c   :  { %4837 = shalt.err (!%p4834_p12)
}
  0x3d   :  { %s4838_s25 = scalar_lea.vmem %s5140_s22, 73728  ;;  %p4843_p0 = scmp.lt.s32.totalorder %s5140_s22, %s5140_s22 }
  0x3e   :  { %p4839_p13 = scmp.ne.s32.totalorder %s5140_s22, %s4838_s25  ;;  %p4844_p1 = scmp.lt.s32.totalorder %s4838_s25, %s4838_s25 }
  0x40   :  { %p4845_p2 = por %p4844_p1, %p4843_p0 }
  0x42   :  { %p4846_p3 = pnand %p4845_p2, %p4839_p13 }
  0x44   :  { %4849 = shalt.err (!%p4846_p3)
}
  0x45   :  { %113 = dma.hbm_to_vmem [thread:$0]  %s5584_s7, 73728, %s5140_s22, [#allocation18], %s5018_s20, %s5018_s20, %s5019_s21  }
  0x46   :  { %s5022_s27 = smov [#allocation20]   ;;  %s5023_s30 = smov [#allocation6]  }
  0x47   :  { %s132_s29 = sshll.u32 %s5022_s27, 4  ;;  %s29_s14 = sshll.u32 %s5023_s30, 4  ;;  %s133_s29 = int_to_ptr.vmem [resolvable:$true] %s132_s29  ;;  %s5174_s14 = int_to_ptr.vmem [resolvable:$true] %s29_s14 }
  0x48   :  { %s4850_s15 = scalar_lea.hbm %s5587_s10, 16 }
  0x49   :  { %p4851_p4 = scmp.ne.s32.totalorder %s5587_s10, %s4850_s15  ;;  %p4854_p5 = scmp.lt.u32.totalorder %s4850_s15, %s5587_s10 }
  0x4b   :  { %p4856_p6 = pnand %p4854_p5, %p4851_p4 }
  0x4d   :  { %4859 = shalt.err (!%p4856_p6)
}
  0x4e   :  { %s4860_s7 = scalar_lea.vmem %s133_s29, 16  ;;  %s4864_s22 = scalar_lea.vmem %s133_s29, 32 }
  0x4f   :  { %p4861_p7 = scmp.ne.s32.totalorder %s133_s29, %s4860_s7  ;;  %p4865_p8 = scmp.lt.s32.totalorder %s133_s29, %s133_s29 }
  0x50   :  { %p4866_p9 = scmp.lt.s32.totalorder %s4864_s22, %s4860_s7 }
  0x52   :  { %p4867_p10 = por %p4866_p9, %p4865_p8 }
  0x54   :  { %p4868_p11 = pnand %p4867_p10, %p4861_p7 }
  0x56   :  { %4871 = shalt.err (!%p4868_p11)
}
  0x57   :  { %135 = dma.hbm_to_vmem [thread:$0]  %s5587_s10, 16, %s133_s29, [#allocation21]  }
  0x58   :  { %s4872_s5 = scalar_lea.hbm %s5577_s0, 1536 }
  0x59   :  { %p4873_p12 = scmp.ne.s32.totalorder %s5577_s0, %s4872_s5  ;;  %p4876_p13 = scmp.lt.u32.totalorder %s4872_s5, %s5577_s0 }
  0x5b   :  { %p4878_p0 = pnand %p4876_p13, %p4873_p12 }
  0x5d   :  { %4881 = shalt.err (!%p4878_p0)
}
  0x5e   :  { %s4882_s28 = scalar_lea.vmem %s5174_s14, 1536  ;;  %p4887_p2 = scmp.lt.s32.totalorder %s5174_s14, %s5174_s14 }
  0x5f   :  { %p4883_p1 = scmp.ne.s32.totalorder %s5174_s14, %s4882_s28  ;;  %p4888_p3 = scmp.lt.s32.totalorder %s4882_s28, %s4882_s28 }
  0x61   :  { %p4889_p4 = por %p4888_p3, %p4887_p2 }
  0x63   :  { %p4890_p5 = pnand %p4889_p4, %p4883_p1 }
  0x65   :  { %4893 = shalt.err (!%p4890_p5)
}
  0x66   :  { %35 = dma.hbm_to_vmem [thread:$0]  %s5577_s0, 1536, %s5174_s14, [#allocation7], %s5018_s20, %s5018_s20, %s5019_s21  }
  0x67   :  { %s5024_s15 = smov [#allocation10]   ;;  %s5025_s1 = smov [#allocation13]  }
  0x68   :  { %s53_s16 = sshll.u32 %s5024_s15, 4  ;;  %s78_s26 = sshll.u32 %s5025_s1, 4  ;;  %s54_s16 = int_to_ptr.vmem [resolvable:$true] %s53_s16  ;;  %s79_s26 = int_to_ptr.vmem [resolvable:$true] %s78_s26 }
  0x69   :  { %s4894_s22 = scalar_lea.hbm %s5579_s2, 1536 }
  0x6a   :  { %p4895_p6 = scmp.ne.s32.totalorder %s5579_s2, %s4894_s22  ;;  %p4898_p7 = scmp.lt.u32.totalorder %s4894_s22, %s5579_s2 }
  0x6c   :  { %p4900_p8 = pnand %p4898_p7, %p4895_p6 }
  0x6e   :  { %4903 = shalt.err (!%p4900_p8)
}
  0x6f   :  { %s4904_s0 = scalar_lea.vmem %s54_s16, 1536  ;;  %p4909_p10 = scmp.lt.s32.totalorder %s54_s16, %s54_s16 }
  0x70   :  { %p4905_p9 = scmp.ne.s32.totalorder %s54_s16, %s4904_s0  ;;  %p4910_p11 = scmp.lt.s32.totalorder %s4904_s0, %s4904_s0 }
  0x72   :  { %p4911_p12 = por %p4910_p11, %p4909_p10 }
  0x74   :  { %p4912_p13 = pnand %p4911_p12, %p4905_p9 }
  0x76   :  { %4915 = shalt.err (!%p4912_p13)
}
  0x77   :  { %59 = dma.hbm_to_vmem [thread:$0]  %s5579_s2, 1536, %s54_s16, [#allocation9], %s5018_s20, %s5018_s20, %s5019_s21  }
  0x78   :  { %s4916_s30 = scalar_lea.hbm %s5581_s4, 96 }
  0x79   :  { %p4917_p0 = scmp.ne.s32.totalorder %s5581_s4, %s4916_s30  ;;  %p4920_p1 = scmp.lt.u32.totalorder %s4916_s30, %s5581_s4 }
  0x7b   :  { %p4922_p2 = pnand %p4920_p1, %p4917_p0 }
  0x7d   :  { %4925 = shalt.err (!%p4922_p2)
}
  0x7e   :  { %s4926_s15 = scalar_lea.vmem %s79_s26, 96  ;;  %p4931_p4 = scmp.lt.s32.totalorder %s79_s26, %s79_s26 }
  0x7f   :  { %p4927_p3 = scmp.ne.s32.totalorder %s79_s26, %s4926_s15  ;;  %p4932_p5 = scmp.lt.s32.totalorder %s4926_s15, %s4926_s15 }
  0x81   :  { %p4933_p6 = por %p4932_p5, %p4931_p4 }
  0x83   :  { %p4934_p7 = pnand %p4933_p6, %p4927_p3 }
  0x85   :  { %4937 = shalt.err (!%p4934_p7)
}
  0x86   :  { %81 = dma.hbm_to_vmem [thread:$0]  %s5581_s4, 96, %s79_s26, [#allocation12]  }
  0x87   :  { %s5026_s21 = smov [#allocation16]   ;;  %s5027_s1 = smov [#allocation19]  }
  0x88   :  { %s98_s16 = sshll.u32 %s5026_s21, 4  ;;  %s120_s17 = sshll.u32 %s5027_s1, 4  ;;  %s99_s16 = int_to_ptr.vmem [resolvable:$true] %s98_s16  ;;  %s121_s17 = int_to_ptr.vmem [resolvable:$true] %s120_s17 }
  0x89   :  { %s4938_s19 = scalar_lea.hbm %s5583_s6, 96 }
  0x8a   :  { %p4939_p8 = scmp.ne.s32.totalorder %s5583_s6, %s4938_s19  ;;  %p4942_p9 = scmp.lt.u32.totalorder %s4938_s19, %s5583_s6 }
  0x8c   :  { %p4944_p10 = pnand %p4942_p9, %p4939_p8 }
  0x8e   :  { %4947 = shalt.err (!%p4944_p10)
}
  0x8f   :  { %s4948_s4 = scalar_lea.vmem %s99_s16, 96  ;;  %p4953_p12 = scmp.lt.s32.totalorder %s99_s16, %s99_s16 }
  0x90   :  { %p4949_p11 = scmp.ne.s32.totalorder %s99_s16, %s4948_s4  ;;  %p4954_p13 = scmp.lt.s32.totalorder %s4948_s4, %s4948_s4 }
  0x92   :  { %p4955_p0 = por %p4954_p13, %p4953_p12 }
  0x94   :  { %p4956_p1 = pnand %p4955_p0, %p4949_p11 }
  0x96   :  { %4959 = shalt.err (!%p4956_p1)
}
  0x97   :  { %101 = dma.hbm_to_vmem [thread:$0]  %s5583_s6, 96, %s99_s16, [#allocation15]  }
  0x98   :  { %s4960_s27 = scalar_lea.hbm %s5585_s8, 96 }
  0x99   :  { %p4961_p2 = scmp.ne.s32.totalorder %s5585_s8, %s4960_s27  ;;  %p4964_p3 = scmp.lt.u32.totalorder %s4960_s27, %s5585_s8 }
  0x9b   :  { %p4966_p4 = pnand %p4964_p3, %p4961_p2 }
  0x9d   :  { %4969 = shalt.err (!%p4966_p4)
}
  0x9e   :  { %s4970_s29 = scalar_lea.vmem %s121_s17, 96  ;;  %p4975_p6 = scmp.lt.s32.totalorder %s121_s17, %s121_s17 }
  0x9f   :  { %p4971_p5 = scmp.ne.s32.totalorder %s121_s17, %s4970_s29  ;;  %p4976_p7 = scmp.lt.s32.totalorder %s4970_s29, %s4970_s29 }
  0xa1   :  { %p4977_p8 = por %p4976_p7, %p4975_p6 }
  0xa3   :  { %p4978_p9 = pnand %p4977_p8, %p4971_p5 }
  0xa5   :  { %4981 = shalt.err (!%p4978_p9)
}
  0xa6   :  { %123 = dma.hbm_to_vmem [thread:$0]  %s5585_s8, 96, %s121_s17, [#allocation18]  }
  0xa7   :  { %s5028_s2 = smov [#allocation22]   ;;  %s4982_s1 = scalar_lea.hbm %s5588_s11, 16 }
  0xa8   :  { %s142_s20 = sshll.u32 %s5028_s2, 4  ;;  %p4983_p10 = scmp.ne.s32.totalorder %s5588_s11, %s4982_s1  ;;  %s143_s20 = int_to_ptr.vmem [resolvable:$true] %s142_s20 }
  0xa9   :  { %p4986_p11 = scmp.lt.u32.totalorder %s4982_s1, %s5588_s11 }
  0xab   :  { %p4988_p12 = pnand %p4986_p11, %p4983_p10 }
  0xad   :  { %4991 = shalt.err (!%p4988_p12)
}
  0xae   :  { %s4992_s24 = scalar_lea.vmem %s143_s20, 16  ;;  %s4996_s8 = scalar_lea.vmem %s143_s20, 32 }
  0xaf   :  { %p4993_p13 = scmp.ne.s32.totalorder %s143_s20, %s4992_s24  ;;  %p4997_p0 = scmp.lt.s32.totalorder %s143_s20, %s143_s20 }
  0xb0   :  { %p4998_p1 = scmp.lt.s32.totalorder %s4996_s8, %s4992_s24 }
  0xb2   :  { %p4999_p2 = por %p4998_p1, %p4997_p0 }
  0xb4   :  { %p5000_p3 = pnand %p4999_p2, %p4993_p13 }
  0xb6   :  { %5003 = shalt.err (!%p5000_p3)
}
  0xb7   :  { %145 = dma.hbm_to_vmem [thread:$0]  %s5588_s11, 16, %s143_s20, [#allocation21]  }
  0xb8   :  { %5004 = dma.done.wait [#allocation7], 1536  }
  0xb9   :  { %5005 = vsyncadd [#allocation7], 4294965760 }
  0xba   :  { %5006 = dma.done.wait [#allocation9], 3072  }
  0xbb   :  { %5007 = vsyncadd [#allocation9], 4294964224 }
  0xbc   :  { %5008 = dma.done.wait [#allocation12], 73824  }
  0xbd   :  { %5009 = vsyncadd [#allocation12], 4294893472 }
  0xbe   :  { %5010 = dma.done.wait [#allocation15], 192  }
  0xbf   :  { %5011 = vsyncadd [#allocation15], 4294967104 }
  0xc0   :  { %5012 = dma.done.wait [#allocation18], 73824  }
  0xc1   :  { %5013 = vsyncadd [#allocation18], 4294893472 }
  0xc2   :  { %5014 = dma.done.wait [#allocation21], 32  }
  0xc3   :  { %5015 = vsyncadd [#allocation21], 4294967264  ;;  %v198_v0 = vld [vmem:[#allocation11 + $0x8] sm:$0xff]  ;;  %v204_v1 = vld [vmem:[#allocation11 + $0x38] sm:$0xff]  ;;  %vm3066_vm3 = vcmask 7168   ;;  %vm3366_vm5 = vcmask 130048  }
  0xc4   :  { %v197_v2 = vld [vmem:[#allocation11] sm:$0xff]  ;;  %v3449_v3 = vpack.c.bf16 %v204_v1, %v198_v0  ;;  %v203_v4 = vld [vmem:[#allocation11 + $0x30] sm:$0xff]  ;;  %v200_v5 = vld [vmem:[#allocation11 + $0x18] sm:$0xff] }
  0xc5   :  { %v206_v6 = vld [vmem:[#allocation11 + $0x48] sm:$0xff]  ;;  %v3451_v7 = vpack.c.bf16 %v203_v4, %v197_v2  ;;  %v216_v10 = vld [vmem:[#allocation11 + $0x98] sm:$0xff]  ;;  %v199_v11 = vld [vmem:[#allocation11 + $0x10] sm:$0xff] }
  0xc6   :  { %v3641_v8 = vpack.c.bf16 %v206_v6, %v200_v5  ;;  %v210_v9 = vld [vmem:[#allocation11 + $0x68] sm:$0xff]  ;;  %3450 = vmatprep.subr.bf16.mxu0 %v3449_v3  ;;  %v205_v13 = vld [vmem:[#allocation11 + $0x40] sm:$0xff]  ;;  %v215_v15 = vld [vmem:[#allocation11 + $0x90] sm:$0xff] }
  0xc7   :  { %v3453_v12 = vpack.c.bf16 %v216_v10, %v210_v9  ;;  %v209_v14 = vld [vmem:[#allocation11 + $0x60] sm:$0xff]  ;;  %3452 = vmatpush1.bf16.msra.mxu0 %v3451_v7  ;;  %v3643_v16 = vpack.c.bf16 %v205_v13, %v199_v11  ;;  %v212_v18 = vld [vmem:[#allocation11 + $0x78] sm:$0xff]  ;;  %v218_v19 = vld [vmem:[#allocation11 + $0xa8] sm:$0xff] }
  0xc8   :  { %3642 = vmatprep.subr.bf16.mxu1 %v3641_v8  ;;  %v3455_v17 = vpack.c.bf16 %v215_v15, %v209_v14  ;;  %v222_v20 = vld [vmem:[#allocation11 + $0xc8] sm:$0xff]  ;;  %v3645_v21 = vpack.c.bf16 %v218_v19, %v212_v18  ;;  %v228_v22 = vld [vmem:[#allocation11 + $0xf8] sm:$0xff]  ;;  %v211_v23 = vld [vmem:[#allocation11 + $0x70] sm:$0xff] }
  0xc9   :  { %3454 = vmatprep.subr.bf16.mxu0 %v3453_v12  ;;  %v217_v24 = vld [vmem:[#allocation11 + $0xa0] sm:$0xff]  ;;  %3644 = vmatpush1.bf16.msra.mxu1 %v3643_v16  ;;  %v3457_v25 = vpack.c.bf16 %v228_v22, %v222_v20  ;;  %v227_v28 = vld [vmem:[#allocation11 + $0xf0] sm:$0xff]  ;;  %v224_v29 = vld [vmem:[#allocation11 + $0xd8] sm:$0xff] }
  0xca   :  { %v3647_v26 = vpack.c.bf16 %v217_v24, %v211_v23  ;;  %v221_v27 = vld [vmem:[#allocation11 + $0xc0] sm:$0xff]  ;;  %3646 = vmatprep.subr.bf16.mxu1 %v3645_v21  ;;  %v230_v30 = vld [vmem:[#allocation11 + $0x108] sm:$0xff]  ;;  %v240_v32 = vld [vmem:[#allocation11 + $0x158] sm:$0xff] }
  0xcb   :  { %v234_v31 = vld [vmem:[#allocation11 + $0x128] sm:$0xff]  ;;  %3456 = vmatpush1.bf16.msra.mxu0 %v3455_v17  ;;  %v3459_v33 = vpack.c.bf16 %v227_v28, %v221_v27  ;;  %v3649_v34 = vpack.c.bf16 %v230_v30, %v224_v29  ;;  %v223_v35 = vld [vmem:[#allocation11 + $0xd0] sm:$0xff]  ;;  %v229_v36 = vld [vmem:[#allocation11 + $0x100] sm:$0xff] }
  0xcc   :  { %v233_v37 = vld [vmem:[#allocation11 + $0x120] sm:$0xff]  ;;  %3458 = vmatprep.subr.bf16.mxu0 %v3457_v25  ;;  %v3461_v38 = vpack.c.bf16 %v240_v32, %v234_v31  ;;  %v239_v39 = vld [vmem:[#allocation11 + $0x150] sm:$0xff]  ;;  %v236_v40 = vld [vmem:[#allocation11 + $0x138] sm:$0xff]  ;;  %v3651_v42 = vpack.c.bf16 %v229_v36, %v223_v35 }
  0xcd   :  { %v242_v41 = vld [vmem:[#allocation11 + $0x168] sm:$0xff]  ;;  %3648 = vmatpush1.bf16.msra.mxu1 %v3647_v26  ;;  %v252_v44 = vld [vmem:[#allocation11 + $0x1b8] sm:$0xff]  ;;  %v235_v46 = vld [vmem:[#allocation11 + $0x130] sm:$0xff]  ;;  %v3463_v48 = vpack.c.bf16 %v239_v39, %v233_v37 }
  0xce   :  { %v246_v43 = vld [vmem:[#allocation11 + $0x188] sm:$0xff]  ;;  %3650 = vmatprep.subr.bf16.mxu1 %v3649_v34  ;;  %v3653_v45 = vpack.c.bf16 %v242_v41, %v236_v40  ;;  %v241_v47 = vld [vmem:[#allocation11 + $0x160] sm:$0xff]  ;;  %v248_v49 = vld [vmem:[#allocation11 + $0x198] sm:$0xff] }
  0xcf   :  { %3460 = vmatpush1.bf16.msra.mxu0 %v3459_v33  ;;  %v254_v50 = vld [vmem:[#allocation11 + $0x1c8] sm:$0xff]  ;;  %v3465_v51 = vpack.c.bf16 %v252_v44, %v246_v43  ;;  %v245_v52 = vld [vmem:[#allocation11 + $0x180] sm:$0xff]  ;;  %v251_v53 = vld [vmem:[#allocation11 + $0x1b0] sm:$0xff]  ;;  %v3655_v54 = vpack.c.bf16 %v241_v47, %v235_v46 }
  0xd0   :  { %3462 = vmatprep.subr.bf16.mxu0 %v3461_v38  ;;  %v258_v55 = vld [vmem:[#allocation11 + $0x1e8] sm:$0xff]  ;;  %v264_v56 = vld [vmem:[#allocation11 + $0x218] sm:$0xff]  ;;  %v3657_v57 = vpack.c.bf16 %v254_v50, %v248_v49  ;;  %v247_v58 = vld [vmem:[#allocation11 + $0x190] sm:$0xff]  ;;  %v3467_v60 = vpack.c.bf16 %v251_v53, %v245_v52 }
  0xd1   :  { %3652 = vmatpush1.bf16.msra.mxu1 %v3651_v42  ;;  %v253_v59 = vld [vmem:[#allocation11 + $0x1c0] sm:$0xff]  ;;  %v260_v61 = vld [vmem:[#allocation11 + $0x1f8] sm:$0xff]  ;;  %v266_v62 = vld [vmem:[#allocation11 + $0x228] sm:$0xff]  ;;  %v3469_v63 = vpack.c.bf16 %v264_v56, %v258_v55 }
  0xd2   :  { %3654 = vmatprep.subr.bf16.mxu1 %v3653_v45  ;;  %v257_v0 = vld [vmem:[#allocation11 + $0x1e0] sm:$0xff]  ;;  %v263_v1 = vld [vmem:[#allocation11 + $0x210] sm:$0xff]  ;;  %v3659_v2 = vpack.c.bf16 %v253_v59, %v247_v58  ;;  %v270_v3 = vld [vmem:[#allocation11 + $0x248] sm:$0xff]  ;;  %v3661_v5 = vpack.c.bf16 %v266_v62, %v260_v61 }
  0xd3   :  { %3464 = vmatpush1.bf16.msra.mxu0 %v3463_v48  ;;  %v276_v4 = vld [vmem:[#allocation11 + $0x278] sm:$0xff]  ;;  %v259_v6 = vld [vmem:[#allocation11 + $0x1f0] sm:$0xff]  ;;  %v265_v7 = vld [vmem:[#allocation11 + $0x220] sm:$0xff]  ;;  %v3471_v8 = vpack.c.bf16 %v263_v1, %v257_v0 }
  0xd4   :  { %3466 = vmatprep.subr.bf16.mxu0 %v3465_v51  ;;  %v272_v9 = vld [vmem:[#allocation11 + $0x258] sm:$0xff]  ;;  %v278_v10 = vld [vmem:[#allocation11 + $0x288] sm:$0xff]  ;;  %v3473_v11 = vpack.c.bf16 %v276_v4, %v270_v3  ;;  %v269_v12 = vld [vmem:[#allocation11 + $0x240] sm:$0xff]  ;;  %v3663_v14 = vpack.c.bf16 %v265_v7, %v259_v6 }
  0xd5   :  { %3656 = vmatpush1.bf16.msra.mxu1 %v3655_v54  ;;  %v275_v13 = vld [vmem:[#allocation11 + $0x270] sm:$0xff]  ;;  %v282_v15 = vld [vmem:[#allocation11 + $0x2a8] sm:$0xff]  ;;  %v288_v16 = vld [vmem:[#allocation11 + $0x2d8] sm:$0xff]  ;;  %v3665_v17 = vpack.c.bf16 %v278_v10, %v272_v9 }
  0xd6   :  { %3658 = vmatprep.subr.bf16.mxu1 %v3657_v57  ;;  %v271_v18 = vld [vmem:[#allocation11 + $0x250] sm:$0xff]  ;;  %v277_v19 = vld [vmem:[#allocation11 + $0x280] sm:$0xff]  ;;  %v3475_v20 = vpack.c.bf16 %v275_v13, %v269_v12  ;;  %v284_v21 = vld [vmem:[#allocation11 + $0x2b8] sm:$0xff]  ;;  %v3477_v23 = vpack.c.bf16 %v288_v16, %v282_v15 }
  0xd7   :  { %3468 = vmatpush1.bf16.msra.mxu0 %v3467_v60  ;;  %v290_v22 = vld [vmem:[#allocation11 + $0x2e8] sm:$0xff]  ;;  %v281_v24 = vld [vmem:[#allocation11 + $0x2a0] sm:$0xff]  ;;  %v287_v25 = vld [vmem:[#allocation11 + $0x2d0] sm:$0xff]  ;;  %v3667_v26 = vpack.c.bf16 %v277_v19, %v271_v18 }
  0xd8   :  { %3470 = vmatprep.subr.bf16.mxu0 %v3469_v63  ;;  %v294_v27 = vld [vmem:[#allocation11 + $0x308] sm:$0xff]  ;;  %v300_v28 = vld [vmem:[#allocation11 + $0x338] sm:$0xff]  ;;  %v3669_v29 = vpack.c.bf16 %v290_v22, %v284_v21  ;;  %v283_v30 = vld [vmem:[#allocation11 + $0x2b0] sm:$0xff]  ;;  %v3479_v32 = vpack.c.bf16 %v287_v25, %v281_v24 }
  0xd9   :  { %3660 = vmatpush1.bf16.msra.mxu1 %v3659_v2  ;;  %v289_v31 = vld [vmem:[#allocation11 + $0x2e0] sm:$0xff]  ;;  %v296_v33 = vld [vmem:[#allocation11 + $0x318] sm:$0xff]  ;;  %v302_v34 = vld [vmem:[#allocation11 + $0x348] sm:$0xff]  ;;  %v3481_v35 = vpack.c.bf16 %v300_v28, %v294_v27 }
  0xda   :  { %3662 = vmatprep.subr.bf16.mxu1 %v3661_v5  ;;  %v293_v36 = vld [vmem:[#allocation11 + $0x300] sm:$0xff]  ;;  %v299_v37 = vld [vmem:[#allocation11 + $0x330] sm:$0xff]  ;;  %v3671_v38 = vpack.c.bf16 %v289_v31, %v283_v30  ;;  %v306_v39 = vld [vmem:[#allocation11 + $0x368] sm:$0xff]  ;;  %v3673_v41 = vpack.c.bf16 %v302_v34, %v296_v33 }
  0xdb   :  { %3472 = vmatpush1.bf16.msra.mxu0 %v3471_v8  ;;  %v312_v40 = vld [vmem:[#allocation11 + $0x398] sm:$0xff]  ;;  %v295_v42 = vld [vmem:[#allocation11 + $0x310] sm:$0xff]  ;;  %v301_v43 = vld [vmem:[#allocation11 + $0x340] sm:$0xff]  ;;  %v3483_v44 = vpack.c.bf16 %v299_v37, %v293_v36 }
  0xdc   :  { %3474 = vmatprep.subr.bf16.mxu0 %v3473_v11  ;;  %v308_v45 = vld [vmem:[#allocation11 + $0x378] sm:$0xff]  ;;  %v314_v46 = vld [vmem:[#allocation11 + $0x3a8] sm:$0xff]  ;;  %v3485_v47 = vpack.c.bf16 %v312_v40, %v306_v39  ;;  %v305_v48 = vld [vmem:[#allocation11 + $0x360] sm:$0xff]  ;;  %v3675_v50 = vpack.c.bf16 %v301_v43, %v295_v42 }
  0xdd   :  { %3664 = vmatpush1.bf16.msra.mxu1 %v3663_v14  ;;  %v311_v49 = vld [vmem:[#allocation11 + $0x390] sm:$0xff]  ;;  %v318_v51 = vld [vmem:[#allocation11 + $0x3c8] sm:$0xff]  ;;  %v324_v52 = vld [vmem:[#allocation11 + $0x3f8] sm:$0xff]  ;;  %v3677_v53 = vpack.c.bf16 %v314_v46, %v308_v45 }
  0xde   :  { %3666 = vmatprep.subr.bf16.mxu1 %v3665_v17  ;;  %v307_v54 = vld [vmem:[#allocation11 + $0x370] sm:$0xff]  ;;  %v313_v55 = vld [vmem:[#allocation11 + $0x3a0] sm:$0xff]  ;;  %v3487_v56 = vpack.c.bf16 %v311_v49, %v305_v48  ;;  %v320_v57 = vld [vmem:[#allocation11 + $0x3d8] sm:$0xff]  ;;  %v3489_v59 = vpack.c.bf16 %v324_v52, %v318_v51 }
  0xdf   :  { %3476 = vmatpush1.bf16.msra.mxu0 %v3475_v20  ;;  %v326_v58 = vld [vmem:[#allocation11 + $0x408] sm:$0xff]  ;;  %v317_v60 = vld [vmem:[#allocation11 + $0x3c0] sm:$0xff]  ;;  %v323_v61 = vld [vmem:[#allocation11 + $0x3f0] sm:$0xff]  ;;  %v3679_v62 = vpack.c.bf16 %v313_v55, %v307_v54 }
  0xe0   :  { %3478 = vmatprep.subr.bf16.mxu0 %v3477_v23  ;;  %v330_v63 = vld [vmem:[#allocation11 + $0x428] sm:$0xff]  ;;  %v336_v0 = vld [vmem:[#allocation11 + $0x458] sm:$0xff]  ;;  %v3681_v1 = vpack.c.bf16 %v326_v58, %v320_v57  ;;  %v319_v2 = vld [vmem:[#allocation11 + $0x3d0] sm:$0xff]  ;;  %v3491_v4 = vpack.c.bf16 %v323_v61, %v317_v60 }
  0xe1   :  { %3668 = vmatpush1.bf16.msra.mxu1 %v3667_v26  ;;  %v325_v3 = vld [vmem:[#allocation11 + $0x400] sm:$0xff]  ;;  %v332_v5 = vld [vmem:[#allocation11 + $0x438] sm:$0xff]  ;;  %v338_v6 = vld [vmem:[#allocation11 + $0x468] sm:$0xff]  ;;  %v3493_v7 = vpack.c.bf16 %v336_v0, %v330_v63 }
  0xe2   :  { %3670 = vmatprep.subr.bf16.mxu1 %v3669_v29  ;;  %v329_v8 = vld [vmem:[#allocation11 + $0x420] sm:$0xff]  ;;  %v335_v9 = vld [vmem:[#allocation11 + $0x450] sm:$0xff]  ;;  %v3683_v10 = vpack.c.bf16 %v325_v3, %v319_v2  ;;  %v342_v11 = vld [vmem:[#allocation11 + $0x488] sm:$0xff]  ;;  %v3685_v14 = vpack.c.bf16 %v338_v6, %v332_v5 }
  0xe3   :  { %3480 = vmatpush1.bf16.msra.mxu0 %v3479_v32  ;;  %v348_v12 = vld [vmem:[#allocation11 + $0x4b8] sm:$0xff]  ;;  %v186_v13 = vld [vmem:[#allocation6 + $0x8] sm:$0xff]  ;;  %v331_v15 = vld [vmem:[#allocation11 + $0x430] sm:$0xff]  ;;  %v3495_v17 = vpack.c.bf16 %v335_v9, %v329_v8 }
  0xe4   :  { %3482 = vmatprep.subr.bf16.mxu0 %v3481_v35  ;;  %v337_v16 = vld [vmem:[#allocation11 + $0x460] sm:$0xff]  ;;  %869 = vmatprep.mubr.f32.mxu0 %v186_v13  ;;  %v344_v18 = vld [vmem:[#allocation11 + $0x498] sm:$0xff]  ;;  %v350_v19 = vld [vmem:[#allocation11 + $0x4c8] sm:$0xff]  ;;  %v3497_v20 = vpack.c.bf16 %v348_v12, %v342_v11 }
  0xe5   :  { %3672 = vmatpush1.bf16.msra.mxu1 %v3671_v38  ;;  %1100 = vmatprep.mubr.f32.mxu1 %v186_v13  ;;  %v341_v21 = vld [vmem:[#allocation11 + $0x480] sm:$0xff]  ;;  %v347_v22 = vld [vmem:[#allocation11 + $0x4b0] sm:$0xff]  ;;  %v3687_v23 = vpack.c.bf16 %v337_v16, %v331_v15  ;;  %v354_v24 = vld [vmem:[#allocation11 + $0x4e8] sm:$0xff]  ;;  %v3689_v26 = vpack.c.bf16 %v350_v19, %v344_v18 }
  0xe6   :  { %3674 = vmatprep.subr.bf16.mxu1 %v3673_v41  ;;  %v360_v25 = vld [vmem:[#allocation11 + $0x518] sm:$0xff]  ;;  %v343_v27 = vld [vmem:[#allocation11 + $0x490] sm:$0xff]  ;;  %v349_v28 = vld [vmem:[#allocation11 + $0x4c0] sm:$0xff]  ;;  %v3499_v29 = vpack.c.bf16 %v347_v22, %v341_v21 }
  0xe7   :  { %3484 = vmatpush1.bf16.msra.mxu0 %v3483_v44  ;;  %v356_v30 = vld [vmem:[#allocation11 + $0x4f8] sm:$0xff]  ;;  %v362_v31 = vld [vmem:[#allocation11 + $0x528] sm:$0xff]  ;;  %v3501_v32 = vpack.c.bf16 %v360_v25, %v354_v24  ;;  %v353_v33 = vld [vmem:[#allocation11 + $0x4e0] sm:$0xff]  ;;  %v3691_v35 = vpack.c.bf16 %v349_v28, %v343_v27 }
  0xe8   :  { %3486 = vmatprep.subr.bf16.mxu0 %v3485_v47  ;;  %v359_v34 = vld [vmem:[#allocation11 + $0x510] sm:$0xff]  ;;  %v366_v36 = vld [vmem:[#allocation11 + $0x548] sm:$0xff]  ;;  %v372_v37 = vld [vmem:[#allocation11 + $0x578] sm:$0xff]  ;;  %v3693_v38 = vpack.c.bf16 %v362_v31, %v356_v30 }
  0xe9   :  { %3676 = vmatpush1.bf16.msra.mxu1 %v3675_v50  ;;  %v355_v39 = vld [vmem:[#allocation11 + $0x4f0] sm:$0xff]  ;;  %v361_v40 = vld [vmem:[#allocation11 + $0x520] sm:$0xff]  ;;  %v3503_v41 = vpack.c.bf16 %v359_v34, %v353_v33  ;;  %v368_v42 = vld [vmem:[#allocation11 + $0x558] sm:$0xff]  ;;  %v3505_v44 = vpack.c.bf16 %v372_v37, %v366_v36 }
  0xea   :  { %3678 = vmatprep.subr.bf16.mxu1 %v3677_v53  ;;  %v374_v43 = vld [vmem:[#allocation11 + $0x588] sm:$0xff]  ;;  %v365_v45 = vld [vmem:[#allocation11 + $0x540] sm:$0xff]  ;;  %v371_v46 = vld [vmem:[#allocation11 + $0x570] sm:$0xff]  ;;  %v3695_v47 = vpack.c.bf16 %v361_v40, %v355_v39 }
  0xeb   :  { %3488 = vmatpush1.bf16.msra.mxu0 %v3487_v56  ;;  %v378_v48 = vld [vmem:[#allocation11 + $0x5a8] sm:$0xff]  ;;  %v384_v49 = vld [vmem:[#allocation11 + $0x5d8] sm:$0xff]  ;;  %v3697_v50 = vpack.c.bf16 %v374_v43, %v368_v42  ;;  %v367_v51 = vld [vmem:[#allocation11 + $0x550] sm:$0xff]  ;;  %v3507_v53 = vpack.c.bf16 %v371_v46, %v365_v45 }
  0xec   :  { %3490 = vmatprep.subr.bf16.mxu0 %v3489_v59  ;;  %v373_v52 = vld [vmem:[#allocation11 + $0x580] sm:$0xff]  ;;  %v380_v54 = vld [vmem:[#allocation11 + $0x5b8] sm:$0xff]  ;;  %v386_v55 = vld [vmem:[#allocation11 + $0x5e8] sm:$0xff]  ;;  %v3509_v56 = vpack.c.bf16 %v384_v49, %v378_v48 }
  0xed   :  { %3680 = vmatpush1.bf16.msra.mxu1 %v3679_v62  ;;  %v377_v57 = vld [vmem:[#allocation11 + $0x5a0] sm:$0xff]  ;;  %v383_v58 = vld [vmem:[#allocation11 + $0x5d0] sm:$0xff]  ;;  %v3699_v59 = vpack.c.bf16 %v373_v52, %v367_v51  ;;  %v390_v60 = vld [vmem:[#allocation11 + $0x608] sm:$0xff]  ;;  %v3701_v62 = vpack.c.bf16 %v386_v55, %v380_v54 }
  0xee   :  { %3682 = vmatprep.subr.bf16.mxu1 %v3681_v1  ;;  %v396_v61 = vld [vmem:[#allocation11 + $0x638] sm:$0xff]  ;;  %v379_v63 = vld [vmem:[#allocation11 + $0x5b0] sm:$0xff]  ;;  %v385_v0 = vld [vmem:[#allocation11 + $0x5e0] sm:$0xff]  ;;  %v3511_v1 = vpack.c.bf16 %v383_v58, %v377_v57 }
  0xef   :  { %3492 = vmatpush1.bf16.msra.mxu0 %v3491_v4  ;;  %v392_v2 = vld [vmem:[#allocation11 + $0x618] sm:$0xff]  ;;  %v398_v3 = vld [vmem:[#allocation11 + $0x648] sm:$0xff]  ;;  %v3513_v4 = vpack.c.bf16 %v396_v61, %v390_v60  ;;  %v389_v5 = vld [vmem:[#allocation11 + $0x600] sm:$0xff] }
  0xf0   :  { %3494 = vmatprep.subr.bf16.mxu0 %v3493_v7  ;;  %v395_v6 = vld [vmem:[#allocation11 + $0x630] sm:$0xff]  ;;  %v3703_v7 = vpack.c.bf16 %v385_v0, %v379_v63  ;;  %v402_v8 = vld [vmem:[#allocation11 + $0x668] sm:$0xff]  ;;  %v408_v9 = vld [vmem:[#allocation11 + $0x698] sm:$0xff] }
  0xf1   :  { %3684 = vmatpush1.bf16.msra.mxu1 %v3683_v10  ;;  %v3705_v10 = vpack.c.bf16 %v398_v3, %v392_v2  ;;  %v391_v11 = vld [vmem:[#allocation11 + $0x610] sm:$0xff]  ;;  %v397_v12 = vld [vmem:[#allocation11 + $0x640] sm:$0xff]  ;;  %v404_v15 = vld [vmem:[#allocation11 + $0x678] sm:$0xff] }
  0xf2   :  { %3686 = vmatprep.subr.bf16.mxu1 %v3685_v14  ;;  %v185_v13 = vld [vmem:[#allocation6] sm:$0xff]  ;;  %v3515_v14 = vpack.c.bf16 %v395_v6, %v389_v5  ;;  %v410_v16 = vld [vmem:[#allocation11 + $0x6a8] sm:$0xff]  ;;  %v407_v19 = vld [vmem:[#allocation11 + $0x690] sm:$0xff] }
  0xf3   :  { %3496 = vmatpush1.bf16.msra.mxu0 %v3495_v17  ;;  %v3517_v17 = vpack.c.bf16 %v408_v9, %v402_v8  ;;  %v401_v18 = vld [vmem:[#allocation11 + $0x660] sm:$0xff]  ;;  %v414_v21 = vld [vmem:[#allocation11 + $0x6c8] sm:$0xff]  ;;  %v420_v22 = vld [vmem:[#allocation11 + $0x6f8] sm:$0xff] }
  0xf4   :  { %3498 = vmatprep.subr.bf16.mxu0 %v3497_v20  ;;  %v3707_v20 = vpack.c.bf16 %v397_v12, %v391_v11  ;;  %v403_v24 = vld [vmem:[#allocation11 + $0x670] sm:$0xff]  ;;  %v409_v25 = vld [vmem:[#allocation11 + $0x6a0] sm:$0xff]  ;;  %v416_v27 = vld [vmem:[#allocation11 + $0x6d8] sm:$0xff] }
  0xf5   :  { %3688 = vmatpush1.bf16.msra.mxu1 %v3687_v23  ;;  %v3709_v23 = vpack.c.bf16 %v410_v16, %v404_v15  ;;  %v422_v28 = vld [vmem:[#allocation11 + $0x708] sm:$0xff]  ;;  %v413_v30 = vld [vmem:[#allocation11 + $0x6c0] sm:$0xff]  ;;  %v419_v31 = vld [vmem:[#allocation11 + $0x6f0] sm:$0xff] }
  0xf6   :  { %3690 = vmatprep.subr.bf16.mxu1 %v3689_v26  ;;  %v3519_v26 = vpack.c.bf16 %v407_v19, %v401_v18  ;;  %v426_v33 = vld [vmem:[#allocation11 + $0x728] sm:$0xff]  ;;  %v432_v34 = vld [vmem:[#allocation11 + $0x758] sm:$0xff]  ;;  %v415_v36 = vld [vmem:[#allocation11 + $0x6d0] sm:$0xff] }
  0xf7   :  { %3500 = vmatpush1.bf16.msra.mxu0 %v3499_v29  ;;  %v3521_v29 = vpack.c.bf16 %v420_v22, %v414_v21  ;;  %v421_v37 = vld [vmem:[#allocation11 + $0x700] sm:$0xff]  ;;  %v428_v39 = vld [vmem:[#allocation11 + $0x738] sm:$0xff]  ;;  %v434_v40 = vld [vmem:[#allocation11 + $0x768] sm:$0xff] }
  0xf8   :  { %3502 = vmatprep.subr.bf16.mxu0 %v3501_v32  ;;  %v3711_v32 = vpack.c.bf16 %v409_v25, %v403_v24  ;;  %v425_v42 = vld [vmem:[#allocation11 + $0x720] sm:$0xff]  ;;  %v431_v43 = vld [vmem:[#allocation11 + $0x750] sm:$0xff]  ;;  %v438_v45 = vld [vmem:[#allocation11 + $0x788] sm:$0xff] }
  0xf9   :  { %3692 = vmatpush1.bf16.msra.mxu1 %v3691_v35  ;;  %v3713_v35 = vpack.c.bf16 %v422_v28, %v416_v27  ;;  %v444_v46 = vld [vmem:[#allocation11 + $0x7b8] sm:$0xff]  ;;  %v427_v48 = vld [vmem:[#allocation11 + $0x730] sm:$0xff]  ;;  %v433_v49 = vld [vmem:[#allocation11 + $0x760] sm:$0xff] }
  0xfa   :  { %3694 = vmatprep.subr.bf16.mxu1 %v3693_v38  ;;  %v3523_v38 = vpack.c.bf16 %v419_v31, %v413_v30  ;;  %v440_v51 = vld [vmem:[#allocation11 + $0x798] sm:$0xff]  ;;  %v446_v52 = vld [vmem:[#allocation11 + $0x7c8] sm:$0xff]  ;;  %v437_v54 = vld [vmem:[#allocation11 + $0x780] sm:$0xff] }
  0xfb   :  { %3504 = vmatpush1.bf16.msra.mxu0 %v3503_v41  ;;  %v3525_v41 = vpack.c.bf16 %v432_v34, %v426_v33  ;;  %v443_v55 = vld [vmem:[#allocation11 + $0x7b0] sm:$0xff]  ;;  %v450_v57 = vld [vmem:[#allocation11 + $0x7e8] sm:$0xff]  ;;  %v456_v58 = vld [vmem:[#allocation11 + $0x818] sm:$0xff] }
  0xfc   :  { %3506 = vmatprep.subr.bf16.mxu0 %v3505_v44  ;;  %v3715_v44 = vpack.c.bf16 %v421_v37, %v415_v36  ;;  %v439_v60 = vld [vmem:[#allocation11 + $0x790] sm:$0xff]  ;;  %v445_v61 = vld [vmem:[#allocation11 + $0x7c0] sm:$0xff]  ;;  %v452_v63 = vld [vmem:[#allocation11 + $0x7f8] sm:$0xff] }
  0xfd   :  { %3696 = vmatpush1.bf16.msra.mxu1 %v3695_v47  ;;  %v3717_v47 = vpack.c.bf16 %v434_v40, %v428_v39  ;;  %v458_v0 = vld [vmem:[#allocation11 + $0x828] sm:$0xff]  ;;  %v449_v2 = vld [vmem:[#allocation11 + $0x7e0] sm:$0xff]  ;;  %v455_v3 = vld [vmem:[#allocation11 + $0x810] sm:$0xff] }
  0xfe   :  { %3698 = vmatprep.subr.bf16.mxu1 %v3697_v50  ;;  %v3527_v50 = vpack.c.bf16 %v431_v43, %v425_v42  ;;  %v462_v5 = vld [vmem:[#allocation11 + $0x848] sm:$0xff]  ;;  %v468_v6 = vld [vmem:[#allocation11 + $0x878] sm:$0xff]  ;;  %v3725_v8 = vpack.c.bf16 %v458_v0, %v452_v63  ;;  %v451_v9 = vld [vmem:[#allocation11 + $0x7f0] sm:$0xff]  ;;  %v3535_v11 = vpack.c.bf16 %v455_v3, %v449_v2 }
  0xff   :  { %3508 = vmatpush1.bf16.msra.mxu0 %v3507_v53  ;;  %v3529_v53 = vpack.c.bf16 %v444_v46, %v438_v45  ;;  %v464_v12 = vld [vmem:[#allocation11 + $0x858] sm:$0xff]  ;;  %v3537_v15 = vpack.c.bf16 %v468_v6, %v462_v5  ;;  %v461_v16 = vld [vmem:[#allocation11 + $0x840] sm:$0xff]  ;;  %v474_v19 = vld [vmem:[#allocation11 + $0x8a8] sm:$0xff] }
 0x100   :  { %3510 = vmatprep.subr.bf16.mxu0 %v3509_v56  ;;  %v3719_v56 = vpack.c.bf16 %v433_v49, %v427_v48  ;;  %v188_v21 = vld [vmem:[#allocation6 + $0x18] sm:$0xff]  ;;  %v469_v24 = vld [vmem:[#allocation11 + $0x880] sm:$0xff]  ;;  %v482_v27 = vld [vmem:[#allocation11 + $0x8e8] sm:$0xff] }
 0x101   :  { %3700 = vmatpush1.bf16.msra.mxu1 %v3699_v59  ;;  %v3721_v59 = vpack.c.bf16 %v446_v52, %v440_v51  ;;  %v479_v30 = vld [vmem:[#allocation11 + $0x8d0] sm:$0xff]  ;;  %v492_v33 = vld [vmem:[#allocation11 + $0x938] sm:$0xff]  ;;  %v481_v36 = vld [vmem:[#allocation11 + $0x8e0] sm:$0xff] }
 0x102   :  { %3702 = vmatprep.subr.bf16.mxu1 %v3701_v62  ;;  %v3531_v62 = vpack.c.bf16 %v443_v55, %v437_v54  ;;  %v494_v39 = vld [vmem:[#allocation11 + $0x948] sm:$0xff]  ;;  %v491_v42 = vld [vmem:[#allocation11 + $0x930] sm:$0xff]  ;;  %v504_v45 = vld [vmem:[#allocation11 + $0x998] sm:$0xff] }
 0x103   :  { %3512 = vmatpush1.bf16.msra.mxu0 %v3511_v1  ;;  %v3533_v1 = vpack.c.bf16 %v456_v58, %v450_v57  ;;  %v493_v48 = vld [vmem:[#allocation11 + $0x940] sm:$0xff]  ;;  %v506_v51 = vld [vmem:[#allocation11 + $0x9a8] sm:$0xff]  ;;  %v503_v54 = vld [vmem:[#allocation11 + $0x990] sm:$0xff] }
 0x104   :  { %3514 = vmatprep.subr.bf16.mxu0 %v3513_v4  ;;  %v3723_v4 = vpack.c.bf16 %v445_v61, %v439_v60  ;;  %v516_v57 = vld [vmem:[#allocation11 + $0x9f8] sm:$0xff]  ;;  %v505_v60 = vld [vmem:[#allocation11 + $0x9a0] sm:$0xff]  ;;  %v518_v63 = vld [vmem:[#allocation11 + $0xa08] sm:$0xff] }
 0x105   :  { %3704 = vmatpush1.bf16.msra.mxu1 %v3703_v7  ;;  %v192_v7 = vld [vmem:[#allocation6 + $0x38] sm:$0xff]  ;;  %v515_v2 = vld [vmem:[#allocation11 + $0x9f0] sm:$0xff] }
 0x106   :  { %870 = vmatmul.mubr.f32.vlgmr.msra.gmra.mrb[0].mxu0 %v185_v13  ;;  %3706 = vmatprep.subr.bf16.mxu1 %v3705_v10  ;;  %v457_v10 = vld [vmem:[#allocation11 + $0x820] sm:$0xff]  ;;  %v528_v5 = vld [vmem:[#allocation11 + $0xa58] sm:$0xff] }
 0x107   :  { %3516 = vmatpush1.bf16.msra.mxu0 %v3515_v14  ;;  %875 = vmatprep.mubr.f32.mxu0 %v192_v7  ;;  %v191_v14 = vld [vmem:[#allocation6 + $0x30] sm:$0xff]  ;;  %v3727_v18 = vpack.c.bf16 %v457_v10, %v451_v9  ;;  %v524_v10 = vld [vmem:[#allocation11 + $0xa38] sm:$0xff] }
 0x108   :  { %3518 = vmatprep.subr.bf16.mxu0 %v3517_v17  ;;  %1101 = vmatmul.mubr.f32.vlgmr.msra.gmra.mrb[0].mxu1 %v185_v13  ;;  %v470_v13 = vld [vmem:[#allocation11 + $0x888] sm:$0xff]  ;;  %v467_v17 = vld [vmem:[#allocation11 + $0x870] sm:$0xff] }
 0x109   :  { %3708 = vmatpush1.bf16.msra.mxu1 %v3707_v20  ;;  %1106 = vmatprep.mubr.f32.mxu1 %v192_v7  ;;  %v480_v20 = vld [vmem:[#allocation11 + $0x8d8] sm:$0xff]  ;;  %v3729_v22 = vpack.c.bf16 %v470_v13, %v464_v12  ;;  %v3539_v25 = vpack.c.bf16 %v467_v17, %v461_v16  ;;  %v511_v7 = vld [vmem:[#allocation11 + $0x9d0] sm:$0xff]  ;;  %v521_v13 = vld [vmem:[#allocation11 + $0xa20] sm:$0xff] }
 0x10a   :  { %3710 = vmatprep.subr.bf16.mxu1 %v3709_v23  ;;  %876 = vmatmul.mubr.f32.gmra.mrb[2].mxu0 %v191_v14  ;;  %v463_v23 = vld [vmem:[#allocation11 + $0x850] sm:$0xff]  ;;  %v3541_v28 = vpack.c.bf16 %v480_v20, %v474_v19  ;;  %v534_v16 = vld [vmem:[#allocation11 + $0xa88] sm:$0xff]  ;;  %v540_v17 = vld [vmem:[#allocation11 + $0xab8] sm:$0xff] }
 0x10b   :  { %3520 = vmatpush1.bf16.msra.mxu0 %v3519_v26  ;;  %946 = vmatprep.mubr.f32.mxu0 %v188_v21  ;;  %v476_v26 = vld [vmem:[#allocation11 + $0x8b8] sm:$0xff]  ;;  %v3731_v31 = vpack.c.bf16 %v469_v24, %v463_v23  ;;  %v523_v19 = vld [vmem:[#allocation11 + $0xa30] sm:$0xff]  ;;  %v529_v20 = vld [vmem:[#allocation11 + $0xa60] sm:$0xff]  ;;  %v3561_v24 = vpack.c.bf16 %v540_v17, %v534_v16 }
 0x10c   :  { %3522 = vmatprep.subr.bf16.mxu0 %v3521_v29  ;;  %1107 = vmatmul.mubr.f32.gmra.mrb[2].mxu1 %v191_v14  ;;  %v473_v29 = vld [vmem:[#allocation11 + $0x8a0] sm:$0xff]  ;;  %v3733_v34 = vpack.c.bf16 %v482_v27, %v476_v26  ;;  %v527_v14 = vld [vmem:[#allocation11 + $0xa50] sm:$0xff]  ;;  %v542_v23 = vld [vmem:[#allocation11 + $0xac8] sm:$0xff]  ;;  %v3751_v27 = vpack.c.bf16 %v529_v20, %v523_v19 }
 0x10d   :  { %3712 = vmatpush1.bf16.msra.mxu1 %v3711_v32  ;;  %1177 = vmatprep.mubr.f32.mxu1 %v188_v21  ;;  %v486_v32 = vld [vmem:[#allocation11 + $0x908] sm:$0xff]  ;;  %v3543_v37 = vpack.c.bf16 %v479_v30, %v473_v29  ;;  %v3559_v21 = vpack.c.bf16 %v527_v14, %v521_v13  ;;  %v539_v26 = vld [vmem:[#allocation11 + $0xab0] sm:$0xff]  ;;  %v552_v29 = vld [vmem:[#allocation11 + $0xb18] sm:$0xff] }
 0x10e   :  { %3714 = vmatprep.subr.bf16.mxu1 %v3713_v35  ;;  %v475_v35 = vld [vmem:[#allocation11 + $0x8b0] sm:$0xff]  ;;  %v3545_v40 = vpack.c.bf16 %v492_v33, %v486_v32  ;;  %v541_v32 = vld [vmem:[#allocation11 + $0xac0] sm:$0xff]  ;;  %v600_v13 = vld [vmem:[#allocation11 + $0xc98] sm:$0xff] }
 0x10f   :  { %3524 = vmatpush1.bf16.msra.mxu0 %v3523_v38  ;;  %v488_v38 = vld [vmem:[#allocation11 + $0x918] sm:$0xff]  ;;  %v3735_v43 = vpack.c.bf16 %v481_v36, %v475_v35  ;;  %v554_v35 = vld [vmem:[#allocation11 + $0xb28] sm:$0xff]  ;;  %v589_v16 = vld [vmem:[#allocation11 + $0xc40] sm:$0xff] }
 0x110   :  { %3526 = vmatprep.subr.bf16.mxu0 %v3525_v41  ;;  %v485_v41 = vld [vmem:[#allocation11 + $0x900] sm:$0xff]  ;;  %v3737_v46 = vpack.c.bf16 %v494_v39, %v488_v38  ;;  %v551_v38 = vld [vmem:[#allocation11 + $0xb10] sm:$0xff]  ;;  %v596_v19 = vld [vmem:[#allocation11 + $0xc78] sm:$0xff] }
 0x111   :  { %3716 = vmatpush1.bf16.msra.mxu1 %v3715_v44  ;;  %v498_v44 = vld [vmem:[#allocation11 + $0x968] sm:$0xff]  ;;  %v3547_v49 = vpack.c.bf16 %v491_v42, %v485_v41  ;;  %v564_v41 = vld [vmem:[#allocation11 + $0xb78] sm:$0xff]  ;;  %v187_v17 = vld [vmem:[#allocation6 + $0x10] sm:$0xff] }
 0x112   :  { %3718 = vmatprep.subr.bf16.mxu1 %v3717_v47  ;;  %v487_v47 = vld [vmem:[#allocation11 + $0x910] sm:$0xff]  ;;  %v3549_v52 = vpack.c.bf16 %v504_v45, %v498_v44  ;;  %v553_v44 = vld [vmem:[#allocation11 + $0xb20] sm:$0xff]  ;;  %v602_v20 = vld [vmem:[#allocation11 + $0xca8] sm:$0xff] }
 0x113   :  { %3528 = vmatpush1.bf16.msra.mxu0 %v3527_v50  ;;  %v500_v50 = vld [vmem:[#allocation11 + $0x978] sm:$0xff]  ;;  %v3739_v55 = vpack.c.bf16 %v493_v48, %v487_v47  ;;  %v566_v47 = vld [vmem:[#allocation11 + $0xb88] sm:$0xff] }
 0x114   :  { %3530 = vmatprep.subr.bf16.mxu0 %v3529_v53  ;;  %v497_v53 = vld [vmem:[#allocation11 + $0x960] sm:$0xff]  ;;  %v3741_v58 = vpack.c.bf16 %v506_v51, %v500_v50  ;;  %v563_v50 = vld [vmem:[#allocation11 + $0xb70] sm:$0xff] }
 0x115   :  { %3720 = vmatpush1.bf16.msra.mxu1 %v3719_v56  ;;  %v510_v56 = vld [vmem:[#allocation11 + $0x9c8] sm:$0xff]  ;;  %v3551_v61 = vpack.c.bf16 %v503_v54, %v497_v53  ;;  %v576_v53 = vld [vmem:[#allocation11 + $0xbd8] sm:$0xff] }
 0x116   :  { %3722 = vmatprep.subr.bf16.mxu1 %v3721_v59  ;;  %v499_v59 = vld [vmem:[#allocation11 + $0x970] sm:$0xff]  ;;  %v3553_v0 = vpack.c.bf16 %v516_v57, %v510_v56  ;;  %v565_v56 = vld [vmem:[#allocation11 + $0xb80] sm:$0xff] }
 0x117   :  { %3532 = vmatpush1.bf16.msra.mxu0 %v3531_v62  ;;  %v512_v62 = vld [vmem:[#allocation11 + $0x9d8] sm:$0xff]  ;;  %v3743_v3 = vpack.c.bf16 %v505_v60, %v499_v59  ;;  %v578_v59 = vld [vmem:[#allocation11 + $0xbe8] sm:$0xff] }
 0x118   :  { %3534 = vmatprep.subr.bf16.mxu0 %v3533_v1  ;;  %v509_v1 = vld [vmem:[#allocation11 + $0x9c0] sm:$0xff]  ;;  %v3745_v6 = vpack.c.bf16 %v518_v63, %v512_v62  ;;  %v575_v62 = vld [vmem:[#allocation11 + $0xbd0] sm:$0xff] }
 0x119   :  { %3724 = vmatpush1.bf16.msra.mxu1 %v3723_v4  ;;  %v522_v4 = vld [vmem:[#allocation11 + $0xa28] sm:$0xff]  ;;  %v3555_v9 = vpack.c.bf16 %v515_v2, %v509_v1  ;;  %v588_v1 = vld [vmem:[#allocation11 + $0xc38] sm:$0xff] }
 0x11a   :  { %3726 = vmatprep.subr.bf16.mxu1 %v3725_v8  ;;  %v517_v8 = vld [vmem:[#allocation11 + $0xa00] sm:$0xff]  ;;  %v3557_v12 = vpack.c.bf16 %v528_v5, %v522_v4 }
 0x11b   :  { %3536 = vmatpush1.bf16.msra.mxu0 %v3535_v11  ;;  %v530_v11 = vld [vmem:[#allocation11 + $0xa68] sm:$0xff]  ;;  %v577_v4 = vld [vmem:[#allocation11 + $0xbe0] sm:$0xff] }
 0x11c   :  { %3538 = vmatprep.subr.bf16.mxu0 %v3537_v15  ;;  %v3747_v15 = vpack.c.bf16 %v517_v8, %v511_v7  ;;  %v590_v7 = vld [vmem:[#allocation11 + $0xc48] sm:$0xff] }
 0x11d   :  { %3728 = vmatpush1.bf16.msra.mxu1 %v3727_v18  ;;  %v3749_v18 = vpack.c.bf16 %v530_v11, %v524_v10  ;;  %v587_v10 = vld [vmem:[#allocation11 + $0xc30] sm:$0xff] }
 0x11e   :  { %3730 = vmatprep.subr.bf16.mxu1 %v3729_v22  ;;  %v536_v22 = vld [vmem:[#allocation11 + $0xa98] sm:$0xff] }
 0x11f   :  { %3540 = vmatpush1.bf16.msra.mxu0 %v3539_v25  ;;  %v533_v25 = vld [vmem:[#allocation11 + $0xa80] sm:$0xff]  ;;  %v3753_v30 = vpack.c.bf16 %v542_v23, %v536_v22  ;;  %v599_v23 = vld [vmem:[#allocation11 + $0xc90] sm:$0xff] }
 0x120   :  { %3542 = vmatprep.subr.bf16.mxu0 %v3541_v28  ;;  %v546_v28 = vld [vmem:[#allocation11 + $0xae8] sm:$0xff]  ;;  %v3563_v33 = vpack.c.bf16 %v539_v26, %v533_v25  ;;  %v593_v22 = vld [vmem:[#allocation11 + $0xc60] sm:$0xff] }
 0x121   :  { %3732 = vmatpush1.bf16.msra.mxu1 %v3731_v31  ;;  %v535_v31 = vld [vmem:[#allocation11 + $0xa90] sm:$0xff]  ;;  %v3565_v36 = vpack.c.bf16 %v552_v29, %v546_v28  ;;  %v606_v26 = vld [vmem:[#allocation11 + $0xcc8] sm:$0xff]  ;;  %v3773_v28 = vpack.c.bf16 %v602_v20, %v596_v19 }
 0x122   :  { %3734 = vmatprep.subr.bf16.mxu1 %v3733_v34  ;;  %v548_v34 = vld [vmem:[#allocation11 + $0xaf8] sm:$0xff]  ;;  %v3755_v39 = vpack.c.bf16 %v541_v32, %v535_v31  ;;  %v595_v29 = vld [vmem:[#allocation11 + $0xc70] sm:$0xff]  ;;  %v3583_v31 = vpack.c.bf16 %v599_v23, %v593_v22  ;;  %v662_v19 = vld [vmem:[#allocation11 + $0xe88] sm:$0xff] }
 0x123   :  { %3544 = vmatpush1.bf16.msra.mxu0 %v3543_v37  ;;  %v545_v37 = vld [vmem:[#allocation11 + $0xae0] sm:$0xff]  ;;  %v3757_v42 = vpack.c.bf16 %v554_v35, %v548_v34  ;;  %v608_v32 = vld [vmem:[#allocation11 + $0xcd8] sm:$0xff]  ;;  %v659_v22 = vld [vmem:[#allocation11 + $0xe70] sm:$0xff] }
 0x124   :  { %3546 = vmatprep.subr.bf16.mxu0 %v3545_v40  ;;  %v558_v40 = vld [vmem:[#allocation11 + $0xb48] sm:$0xff]  ;;  %v3567_v45 = vpack.c.bf16 %v551_v38, %v545_v37  ;;  %v193_v34 = vld [vmem:[#allocation6 + $0x40] sm:$0xff]  ;;  %v611_v37 = vld [vmem:[#allocation11 + $0xcf0] sm:$0xff] }
 0x125   :  { %3736 = vmatpush1.bf16.msra.mxu1 %v3735_v43  ;;  %v547_v43 = vld [vmem:[#allocation11 + $0xaf0] sm:$0xff]  ;;  %v3569_v48 = vpack.c.bf16 %v564_v41, %v558_v40  ;;  %v190_v38 = vld [vmem:[#allocation6 + $0x28] sm:$0xff]  ;;  %v624_v41 = vld [vmem:[#allocation11 + $0xd58] sm:$0xff] }
 0x126   :  { %3738 = vmatprep.subr.bf16.mxu1 %v3737_v46  ;;  %v560_v46 = vld [vmem:[#allocation11 + $0xb58] sm:$0xff]  ;;  %v3759_v51 = vpack.c.bf16 %v553_v44, %v547_v43  ;;  %v618_v40 = vld [vmem:[#allocation11 + $0xd28] sm:$0xff]  ;;  %v607_v43 = vld [vmem:[#allocation11 + $0xcd0] sm:$0xff] }
 0x127   :  { %3548 = vmatpush1.bf16.msra.mxu0 %v3547_v49  ;;  %v557_v49 = vld [vmem:[#allocation11 + $0xb40] sm:$0xff]  ;;  %v3761_v54 = vpack.c.bf16 %v566_v47, %v560_v46  ;;  %v620_v46 = vld [vmem:[#allocation11 + $0xd38] sm:$0xff]  ;;  %v626_v47 = vld [vmem:[#allocation11 + $0xd68] sm:$0xff] }
 0x128   :  { %3550 = vmatprep.subr.bf16.mxu0 %v3549_v52  ;;  %v570_v52 = vld [vmem:[#allocation11 + $0xba8] sm:$0xff]  ;;  %v3571_v57 = vpack.c.bf16 %v563_v50, %v557_v49  ;;  %v613_v44 = vld [vmem:[#allocation11 + $0xd00] sm:$0xff]  ;;  %v623_v50 = vld [vmem:[#allocation11 + $0xd50] sm:$0xff] }
 0x129   :  { %3740 = vmatpush1.bf16.msra.mxu1 %v3739_v55  ;;  %v559_v55 = vld [vmem:[#allocation11 + $0xb50] sm:$0xff]  ;;  %v3573_v60 = vpack.c.bf16 %v576_v53, %v570_v52  ;;  %v617_v49 = vld [vmem:[#allocation11 + $0xd20] sm:$0xff]  ;;  %v630_v52 = vld [vmem:[#allocation11 + $0xd88] sm:$0xff] }
 0x12a   :  { %3742 = vmatprep.subr.bf16.mxu1 %v3741_v58  ;;  %v572_v58 = vld [vmem:[#allocation11 + $0xbb8] sm:$0xff]  ;;  %v3763_v63 = vpack.c.bf16 %v565_v56, %v559_v55  ;;  %v619_v55 = vld [vmem:[#allocation11 + $0xd30] sm:$0xff]  ;;  %v625_v56 = vld [vmem:[#allocation11 + $0xd60] sm:$0xff] }
 0x12b   :  { %3552 = vmatpush1.bf16.msra.mxu0 %v3551_v61  ;;  %v569_v61 = vld [vmem:[#allocation11 + $0xba0] sm:$0xff]  ;;  %v3765_v2 = vpack.c.bf16 %v578_v59, %v572_v58  ;;  %v636_v53 = vld [vmem:[#allocation11 + $0xdb8] sm:$0xff]  ;;  %v638_v59 = vld [vmem:[#allocation11 + $0xdc8] sm:$0xff] }
 0x12c   :  { %3554 = vmatprep.subr.bf16.mxu0 %v3553_v0  ;;  %v582_v0 = vld [vmem:[#allocation11 + $0xc08] sm:$0xff]  ;;  %v3575_v5 = vpack.c.bf16 %v575_v62, %v569_v61  ;;  %v632_v58 = vld [vmem:[#allocation11 + $0xd98] sm:$0xff]  ;;  %v629_v61 = vld [vmem:[#allocation11 + $0xd80] sm:$0xff] }
 0x12d   :  { %3744 = vmatpush1.bf16.msra.mxu1 %v3743_v3  ;;  %v571_v3 = vld [vmem:[#allocation11 + $0xbb0] sm:$0xff]  ;;  %v3577_v8 = vpack.c.bf16 %v588_v1, %v582_v0  ;;  %v642_v0 = vld [vmem:[#allocation11 + $0xde8] sm:$0xff]  ;;  %v648_v1 = vld [vmem:[#allocation11 + $0xe18] sm:$0xff] }
 0x12e   :  { %3746 = vmatprep.subr.bf16.mxu1 %v3745_v6  ;;  %v584_v6 = vld [vmem:[#allocation11 + $0xc18] sm:$0xff]  ;;  %v3767_v11 = vpack.c.bf16 %v577_v4, %v571_v3  ;;  %v635_v62 = vld [vmem:[#allocation11 + $0xdb0] sm:$0xff]  ;;  %v637_v4 = vld [vmem:[#allocation11 + $0xdc0] sm:$0xff] }
 0x12f   :  { %3556 = vmatpush1.bf16.msra.mxu0 %v3555_v9  ;;  %v581_v9 = vld [vmem:[#allocation11 + $0xc00] sm:$0xff]  ;;  %v3769_v14 = vpack.c.bf16 %v590_v7, %v584_v6  ;;  %v631_v3 = vld [vmem:[#allocation11 + $0xd90] sm:$0xff]  ;;  %v644_v6 = vld [vmem:[#allocation11 + $0xdf8] sm:$0xff] }
 0x130   :  { %3558 = vmatprep.subr.bf16.mxu0 %v3557_v12  ;;  %v594_v12 = vld [vmem:[#allocation11 + $0xc68] sm:$0xff] }
 0x131   :  { %3748 = vmatpush1.bf16.msra.mxu1 %v3747_v15  ;;  %v583_v15 = vld [vmem:[#allocation11 + $0xc10] sm:$0xff]  ;;  %v650_v7 = vld [vmem:[#allocation11 + $0xe28] sm:$0xff] }
 0x132   :  { %3750 = vmatprep.subr.bf16.mxu1 %v3749_v18  ;;  %v3579_v18 = vpack.c.bf16 %v587_v10, %v581_v9  ;;  %v3771_v25 = vpack.c.bf16 %v589_v16, %v583_v15  ;;  %v641_v9 = vld [vmem:[#allocation11 + $0xde0] sm:$0xff]  ;;  %v647_v10 = vld [vmem:[#allocation11 + $0xe10] sm:$0xff] }
 0x133   :  { %3560 = vmatpush1.bf16.msra.mxu0 %v3559_v21  ;;  %v3581_v21 = vpack.c.bf16 %v600_v13, %v594_v12  ;;  %v654_v12 = vld [vmem:[#allocation11 + $0xe48] sm:$0xff]  ;;  %v660_v13 = vld [vmem:[#allocation11 + $0xe78] sm:$0xff]  ;;  %v643_v15 = vld [vmem:[#allocation11 + $0xdf0] sm:$0xff] }
 0x134   :  { %3562 = vmatprep.subr.bf16.mxu0 %v3561_v24  ;;  %v194_v24 = vld [vmem:[#allocation6 + $0x48] sm:$0xff]  ;;  %v649_v16 = vld [vmem:[#allocation11 + $0xe20] sm:$0xff]  ;;  %v3601_v20 = vpack.c.bf16 %v660_v13, %v654_v12 }
 0x135   :  { %3752 = vmatpush1.bf16.msra.mxu1 %v3751_v27  ;;  %v612_v27 = vld [vmem:[#allocation11 + $0xcf8] sm:$0xff]  ;;  %v3791_v23 = vpack.c.bf16 %v649_v16, %v643_v15  ;;  %v709_v12 = vld [vmem:[#allocation11 + $0x1000] sm:$0xff]  ;;  %v722_v15 = vld [vmem:[#allocation11 + $0x1068] sm:$0xff] }
 0x136   :  { %3754 = vmatprep.subr.bf16.mxu1 %v3753_v30  ;;  %v601_v30 = vld [vmem:[#allocation11 + $0xca0] sm:$0xff]  ;;  %v3585_v35 = vpack.c.bf16 %v612_v27, %v606_v26  ;;  %v655_v27 = vld [vmem:[#allocation11 + $0xe50] sm:$0xff] }
 0x137   :  { %3564 = vmatpush1.bf16.msra.mxu0 %v3563_v33  ;;  %v614_v33 = vld [vmem:[#allocation11 + $0xd08] sm:$0xff] }
 0x138   :  { %3566 = vmatprep.subr.bf16.mxu0 %v3565_v36  ;;  %v605_v36 = vld [vmem:[#allocation11 + $0xcc0] sm:$0xff] }
 0x139   :  { %3756 = vmatpush1.bf16.msra.mxu1 %v3755_v39  ;;  %v3775_v39 = vpack.c.bf16 %v601_v30, %v595_v29  ;;  %v668_v30 = vld [vmem:[#allocation11 + $0xeb8] sm:$0xff] }
 0x13a   :  { %3758 = vmatprep.subr.bf16.mxu1 %v3757_v42  ;;  %v3777_v42 = vpack.c.bf16 %v614_v33, %v608_v32  ;;  %v665_v33 = vld [vmem:[#allocation11 + $0xea0] sm:$0xff] }
 0x13b   :  { %3568 = vmatpush1.bf16.msra.mxu0 %v3567_v45  ;;  %v3587_v45 = vpack.c.bf16 %v611_v37, %v605_v36  ;;  %v678_v36 = vld [vmem:[#allocation11 + $0xf08] sm:$0xff]  ;;  %v684_v37 = vld [vmem:[#allocation11 + $0xf38] sm:$0xff] }
 0x13c   :  { %3570 = vmatprep.subr.bf16.mxu0 %v3569_v48  ;;  %v3589_v48 = vpack.c.bf16 %v624_v41, %v618_v40  ;;  %v673_v40 = vld [vmem:[#allocation11 + $0xee0] sm:$0xff] }
 0x13d   :  { %3760 = vmatpush1.bf16.msra.mxu1 %v3759_v51  ;;  %v3779_v51 = vpack.c.bf16 %v613_v44, %v607_v43  ;;  %v686_v43 = vld [vmem:[#allocation11 + $0xf48] sm:$0xff]  ;;  %v3609_v44 = vpack.c.bf16 %v684_v37, %v678_v36  ;;  %v733_v36 = vld [vmem:[#allocation11 + $0x10c0] sm:$0xff] }
 0x13e   :  { %3762 = vmatprep.subr.bf16.mxu1 %v3761_v54  ;;  %v3781_v54 = vpack.c.bf16 %v626_v47, %v620_v46  ;;  %v683_v46 = vld [vmem:[#allocation11 + $0xf30] sm:$0xff] }
 0x13f   :  { %3572 = vmatpush1.bf16.msra.mxu0 %v3571_v57  ;;  %v3591_v57 = vpack.c.bf16 %v623_v50, %v617_v49  ;;  %v696_v49 = vld [vmem:[#allocation11 + $0xf98] sm:$0xff] }
 0x140   :  { %3574 = vmatprep.subr.bf16.mxu0 %v3573_v60  ;;  %v3593_v60 = vpack.c.bf16 %v636_v53, %v630_v52  ;;  %v685_v52 = vld [vmem:[#allocation11 + $0xf40] sm:$0xff] }
 0x141   :  { %3764 = vmatpush1.bf16.msra.mxu1 %v3763_v63  ;;  %v3783_v63 = vpack.c.bf16 %v625_v56, %v619_v55  ;;  %v698_v55 = vld [vmem:[#allocation11 + $0xfa8] sm:$0xff] }
 0x142   :  { %3766 = vmatprep.subr.bf16.mxu1 %v3765_v2  ;;  %v3785_v2 = vpack.c.bf16 %v638_v59, %v632_v58  ;;  %v695_v58 = vld [vmem:[#allocation11 + $0xf90] sm:$0xff] }
 0x143   :  { %3576 = vmatpush1.bf16.msra.mxu0 %v3575_v5  ;;  %v3595_v5 = vpack.c.bf16 %v635_v62, %v629_v61  ;;  %v708_v61 = vld [vmem:[#allocation11 + $0xff8] sm:$0xff] }
 0x144   :  { %3578 = vmatprep.subr.bf16.mxu0 %v3577_v8  ;;  %v3597_v8 = vpack.c.bf16 %v648_v1, %v642_v0  ;;  %v697_v0 = vld [vmem:[#allocation11 + $0xfa0] sm:$0xff] }
 0x145   :  { %3768 = vmatpush1.bf16.msra.mxu1 %v3767_v11  ;;  %v3787_v11 = vpack.c.bf16 %v637_v4, %v631_v3  ;;  %v710_v3 = vld [vmem:[#allocation11 + $0x1008] sm:$0xff] }
 0x146   :  { %947 = vmatmul.mubr.f32.vlgmr.msra.gmra.mrb[0].mxu0 %v187_v17  ;;  %3770 = vmatprep.subr.bf16.mxu1 %v3769_v14  ;;  %v3789_v14 = vpack.c.bf16 %v650_v7, %v644_v6  ;;  %v707_v6 = vld [vmem:[#allocation11 + $0xff0] sm:$0xff] }
 0x147   :  { %3580 = vmatpush1.bf16.msra.mxu0 %v3579_v18  ;;  %952 = vmatprep.mubr.f32.mxu0 %v194_v24  ;;  %v656_v18 = vld [vmem:[#allocation11 + $0xe58] sm:$0xff] }
 0x148   :  { %3582 = vmatprep.subr.bf16.mxu0 %v3581_v21  ;;  %1178 = vmatmul.mubr.f32.vlgmr.msra.gmra.mrb[0].mxu1 %v187_v17  ;;  %v3599_v17 = vpack.c.bf16 %v647_v10, %v641_v9  ;;  %v653_v21 = vld [vmem:[#allocation11 + $0xe40] sm:$0xff]  ;;  %v3793_v26 = vpack.c.bf16 %v662_v19, %v656_v18  ;;  %v720_v9 = vld [vmem:[#allocation11 + $0x1058] sm:$0xff]  ;;  %v719_v18 = vld [vmem:[#allocation11 + $0x1050] sm:$0xff] }
 0x149   :  { %3772 = vmatpush1.bf16.msra.mxu1 %v3771_v25  ;;  %1183 = vmatprep.mubr.f32.mxu1 %v194_v24  ;;  %v666_v24 = vld [vmem:[#allocation11 + $0xea8] sm:$0xff]  ;;  %v672_v25 = vld [vmem:[#allocation11 + $0xed8] sm:$0xff]  ;;  %v3603_v29 = vpack.c.bf16 %v659_v22, %v653_v21 }
 0x14a   :  { %3774 = vmatprep.subr.bf16.mxu1 %v3773_v28  ;;  %953 = vmatmul.mubr.f32.gmra.mrb[2].mxu0 %v193_v34  ;;  %v661_v28 = vld [vmem:[#allocation11 + $0xe80] sm:$0xff]  ;;  %v3605_v32 = vpack.c.bf16 %v672_v25, %v666_v24  ;;  %v732_v21 = vld [vmem:[#allocation11 + $0x10b8] sm:$0xff] }
 0x14b   :  { %3584 = vmatpush1.bf16.msra.mxu0 %v3583_v31  ;;  %1023 = vmatprep.mubr.f32.mxu0 %v190_v38  ;;  %v674_v31 = vld [vmem:[#allocation11 + $0xee8] sm:$0xff]  ;;  %v721_v24 = vld [vmem:[#allocation11 + $0x1060] sm:$0xff] }
 0x14c   :  { %3586 = vmatprep.subr.bf16.mxu0 %v3585_v35  ;;  %1184 = vmatmul.mubr.f32.gmra.mrb[2].mxu1 %v193_v34  ;;  %v671_v34 = vld [vmem:[#allocation11 + $0xed0] sm:$0xff]  ;;  %v3795_v35 = vpack.c.bf16 %v661_v28, %v655_v27  ;;  %v734_v27 = vld [vmem:[#allocation11 + $0x10c8] sm:$0xff] }
 0x14d   :  { %3776 = vmatpush1.bf16.msra.mxu1 %v3775_v39  ;;  %1254 = vmatprep.mubr.f32.mxu1 %v190_v38  ;;  %v3797_v38 = vpack.c.bf16 %v674_v31, %v668_v30  ;;  %v667_v39 = vld [vmem:[#allocation11 + $0xeb0] sm:$0xff]  ;;  %v3607_v41 = vpack.c.bf16 %v671_v34, %v665_v33  ;;  %v744_v33 = vld [vmem:[#allocation11 + $0x1118] sm:$0xff] }
 0x14e   :  { %3778 = vmatprep.subr.bf16.mxu1 %v3777_v42  ;;  %v680_v42 = vld [vmem:[#allocation11 + $0xf18] sm:$0xff]  ;;  %v3799_v47 = vpack.c.bf16 %v673_v40, %v667_v39  ;;  %v731_v30 = vld [vmem:[#allocation11 + $0x10b0] sm:$0xff]  ;;  %v746_v39 = vld [vmem:[#allocation11 + $0x1128] sm:$0xff] }
 0x14f   :  { %3588 = vmatpush1.bf16.msra.mxu0 %v3587_v45  ;;  %v677_v45 = vld [vmem:[#allocation11 + $0xf00] sm:$0xff]  ;;  %v3801_v50 = vpack.c.bf16 %v686_v43, %v680_v42  ;;  %v743_v42 = vld [vmem:[#allocation11 + $0x1110] sm:$0xff] }
 0x150   :  { %3590 = vmatprep.subr.bf16.mxu0 %v3589_v48  ;;  %v690_v48 = vld [vmem:[#allocation11 + $0xf68] sm:$0xff]  ;;  %v3611_v53 = vpack.c.bf16 %v683_v46, %v677_v45  ;;  %v756_v45 = vld [vmem:[#allocation11 + $0x1178] sm:$0xff] }
 0x151   :  { %3780 = vmatpush1.bf16.msra.mxu1 %v3779_v51  ;;  %v679_v51 = vld [vmem:[#allocation11 + $0xf10] sm:$0xff]  ;;  %v3613_v56 = vpack.c.bf16 %v696_v49, %v690_v48  ;;  %v745_v48 = vld [vmem:[#allocation11 + $0x1120] sm:$0xff] }
 0x152   :  { %3782 = vmatprep.subr.bf16.mxu1 %v3781_v54  ;;  %v692_v54 = vld [vmem:[#allocation11 + $0xf78] sm:$0xff]  ;;  %v3803_v59 = vpack.c.bf16 %v685_v52, %v679_v51  ;;  %v758_v51 = vld [vmem:[#allocation11 + $0x1188] sm:$0xff] }
 0x153   :  { %3592 = vmatpush1.bf16.msra.mxu0 %v3591_v57  ;;  %v689_v57 = vld [vmem:[#allocation11 + $0xf60] sm:$0xff]  ;;  %v3805_v62 = vpack.c.bf16 %v698_v55, %v692_v54  ;;  %v755_v54 = vld [vmem:[#allocation11 + $0x1170] sm:$0xff] }
 0x154   :  { %3594 = vmatprep.subr.bf16.mxu0 %v3593_v60  ;;  %v702_v60 = vld [vmem:[#allocation11 + $0xfc8] sm:$0xff]  ;;  %v3615_v1 = vpack.c.bf16 %v695_v58, %v689_v57  ;;  %v768_v57 = vld [vmem:[#allocation11 + $0x11d8] sm:$0xff] }
 0x155   :  { %3784 = vmatpush1.bf16.msra.mxu1 %v3783_v63  ;;  %v691_v63 = vld [vmem:[#allocation11 + $0xf70] sm:$0xff]  ;;  %v3617_v4 = vpack.c.bf16 %v708_v61, %v702_v60  ;;  %v757_v60 = vld [vmem:[#allocation11 + $0x1180] sm:$0xff] }
 0x156   :  { %3786 = vmatprep.subr.bf16.mxu1 %v3785_v2  ;;  %v704_v2 = vld [vmem:[#allocation11 + $0xfd8] sm:$0xff]  ;;  %v3807_v7 = vpack.c.bf16 %v697_v0, %v691_v63  ;;  %v770_v63 = vld [vmem:[#allocation11 + $0x11e8] sm:$0xff] }
 0x157   :  { %3596 = vmatpush1.bf16.msra.mxu0 %v3595_v5  ;;  %v701_v5 = vld [vmem:[#allocation11 + $0xfc0] sm:$0xff]  ;;  %v3809_v10 = vpack.c.bf16 %v710_v3, %v704_v2  ;;  %v767_v2 = vld [vmem:[#allocation11 + $0x11d0] sm:$0xff] }
 0x158   :  { %3598 = vmatprep.subr.bf16.mxu0 %v3597_v8  ;;  %v714_v8 = vld [vmem:[#allocation11 + $0x1028] sm:$0xff]  ;;  %v3619_v13 = vpack.c.bf16 %v707_v6, %v701_v5  ;;  %v208_v5 = vld [vmem:[#allocation11 + $0x58] sm:$0xff] }
 0x159   :  { %3788 = vmatpush1.bf16.msra.mxu1 %v3787_v11  ;;  %v703_v11 = vld [vmem:[#allocation11 + $0xfd0] sm:$0xff]  ;;  %v3621_v16 = vpack.c.bf16 %v720_v9, %v714_v8  ;;  %v769_v8 = vld [vmem:[#allocation11 + $0x11e0] sm:$0xff] }
 0x15a   :  { %3790 = vmatprep.subr.bf16.mxu1 %v3789_v14  ;;  %v716_v14 = vld [vmem:[#allocation11 + $0x1038] sm:$0xff]  ;;  %v3811_v19 = vpack.c.bf16 %v709_v12, %v703_v11  ;;  %v201_v11 = vld [vmem:[#allocation11 + $0x20] sm:$0xff]  ;;  %v207_v12 = vld [vmem:[#allocation11 + $0x50] sm:$0xff] }
 0x15b   :  { %3600 = vmatpush1.bf16.msra.mxu0 %v3599_v17  ;;  %v713_v17 = vld [vmem:[#allocation11 + $0x1020] sm:$0xff]  ;;  %v3813_v22 = vpack.c.bf16 %v722_v15, %v716_v14  ;;  %v214_v14 = vld [vmem:[#allocation11 + $0x88] sm:$0xff]  ;;  %v220_v15 = vld [vmem:[#allocation11 + $0xb8] sm:$0xff] }
 0x15c   :  { %3602 = vmatprep.subr.bf16.mxu0 %v3601_v20  ;;  %v726_v20 = vld [vmem:[#allocation11 + $0x1088] sm:$0xff]  ;;  %v3623_v25 = vpack.c.bf16 %v719_v18, %v713_v17  ;;  %v3835_v17 = vpack.c.bf16 %v207_v12, %v201_v11  ;;  %v5273_v18 = vld [vmem:[#allocation6 + $0x58] sm:$0xff]  ;;  %v321_v12 = vld [vmem:[#allocation11 + $0x3e0] sm:$0xff] }
 0x15d   :  { %3792 = vmatpush1.bf16.msra.mxu1 %v3791_v23  ;;  %v715_v23 = vld [vmem:[#allocation11 + $0x1030] sm:$0xff]  ;;  %v3625_v28 = vpack.c.bf16 %v732_v21, %v726_v20  ;;  %v213_v20 = vld [vmem:[#allocation11 + $0x80] sm:$0xff] }
 0x15e   :  { %3794 = vmatprep.subr.bf16.mxu1 %v3793_v26  ;;  %v728_v26 = vld [vmem:[#allocation11 + $0x1098] sm:$0xff]  ;;  %v3815_v31 = vpack.c.bf16 %v721_v24, %v715_v23  ;;  %v219_v21 = vld [vmem:[#allocation11 + $0xb0] sm:$0xff] }
 0x15f   :  { %3604 = vmatpush1.bf16.msra.mxu0 %v3603_v29  ;;  %v725_v29 = vld [vmem:[#allocation11 + $0x1080] sm:$0xff]  ;;  %v3817_v34 = vpack.c.bf16 %v734_v27, %v728_v26  ;;  %v232_v23 = vld [vmem:[#allocation11 + $0x118] sm:$0xff]  ;;  %v5277_v24 = vld [vmem:[#allocation6 + $0x50] sm:$0xff] }
 0x160   :  { %3606 = vmatprep.subr.bf16.mxu0 %v3605_v32  ;;  %v738_v32 = vld [vmem:[#allocation11 + $0x10e8] sm:$0xff]  ;;  %v3627_v37 = vpack.c.bf16 %v731_v30, %v725_v29  ;;  %v225_v27 = vld [vmem:[#allocation11 + $0xe0] sm:$0xff]  ;;  %v244_v30 = vld [vmem:[#allocation11 + $0x178] sm:$0xff] }
 0x161   :  { %3796 = vmatpush1.bf16.msra.mxu1 %v3795_v35  ;;  %v727_v35 = vld [vmem:[#allocation11 + $0x1090] sm:$0xff]  ;;  %v3629_v40 = vpack.c.bf16 %v744_v33, %v738_v32  ;;  %v238_v29 = vld [vmem:[#allocation11 + $0x148] sm:$0xff] }
 0x162   :  { %3798 = vmatprep.subr.bf16.mxu1 %v3797_v38  ;;  %v740_v38 = vld [vmem:[#allocation11 + $0x10f8] sm:$0xff]  ;;  %v3819_v43 = vpack.c.bf16 %v733_v36, %v727_v35  ;;  %v4753_v32 = vld [vmem:[#allocation6 + $0x8] sm:$0xff]  ;;  %v3845_v33 = vpack.c.bf16 %v244_v30, %v238_v29  ;;  %v243_v35 = vld [vmem:[#allocation11 + $0x170] sm:$0xff] }
 0x163   :  { %3608 = vmatpush1.bf16.msra.mxu0 %v3607_v41  ;;  %v737_v41 = vld [vmem:[#allocation11 + $0x10e0] sm:$0xff]  ;;  %v3821_v46 = vpack.c.bf16 %v746_v39, %v740_v38  ;;  %v250_v36 = vld [vmem:[#allocation11 + $0x1a8] sm:$0xff]  ;;  %v364_v30 = vld [vmem:[#allocation11 + $0x538] sm:$0xff] }
 0x164   :  { %3610 = vmatprep.subr.bf16.mxu0 %v3609_v44  ;;  %v750_v44 = vld [vmem:[#allocation11 + $0x1148] sm:$0xff]  ;;  %v3631_v49 = vpack.c.bf16 %v743_v42, %v737_v41  ;;  %v255_v41 = vld [vmem:[#allocation11 + $0x1d0] sm:$0xff] }
 0x165   :  { %3800 = vmatpush1.bf16.msra.mxu1 %v3799_v47  ;;  %v739_v47 = vld [vmem:[#allocation11 + $0x10f0] sm:$0xff]  ;;  %v3633_v52 = vpack.c.bf16 %v756_v45, %v750_v44  ;;  %v262_v42 = vld [vmem:[#allocation11 + $0x208] sm:$0xff] }
 0x166   :  { %3802 = vmatprep.subr.bf16.mxu1 %v3801_v50  ;;  %v752_v50 = vld [vmem:[#allocation11 + $0x1158] sm:$0xff]  ;;  %v3823_v55 = vpack.c.bf16 %v745_v48, %v739_v47  ;;  %v267_v47 = vld [vmem:[#allocation11 + $0x230] sm:$0xff]  ;;  %v274_v48 = vld [vmem:[#allocation11 + $0x268] sm:$0xff] }
 0x167   :  { %3612 = vmatpush1.bf16.msra.mxu0 %v3611_v53  ;;  %v749_v53 = vld [vmem:[#allocation11 + $0x1140] sm:$0xff]  ;;  %v3825_v58 = vpack.c.bf16 %v758_v51, %v752_v50  ;;  %v358_v29 = vld [vmem:[#allocation11 + $0x508] sm:$0xff] }
 0x168   :  { %3614 = vmatprep.subr.bf16.mxu0 %v3613_v56  ;;  %v762_v56 = vld [vmem:[#allocation11 + $0x11a8] sm:$0xff]  ;;  %v3635_v61 = vpack.c.bf16 %v755_v54, %v749_v53  ;;  %v279_v53 = vld [vmem:[#allocation11 + $0x290] sm:$0xff] }
 0x169   :  { %3804 = vmatpush1.bf16.msra.mxu1 %v3803_v59  ;;  %v751_v59 = vld [vmem:[#allocation11 + $0x1150] sm:$0xff]  ;;  %v3637_v0 = vpack.c.bf16 %v768_v57, %v762_v56  ;;  %v286_v54 = vld [vmem:[#allocation11 + $0x2c8] sm:$0xff] }
 0x16a   :  { %3806 = vmatprep.subr.bf16.mxu1 %v3805_v62  ;;  %v764_v62 = vld [vmem:[#allocation11 + $0x11b8] sm:$0xff]  ;;  %v3827_v3 = vpack.c.bf16 %v757_v60, %v751_v59  ;;  %v291_v59 = vld [vmem:[#allocation11 + $0x2f0] sm:$0xff]  ;;  %v298_v60 = vld [vmem:[#allocation11 + $0x328] sm:$0xff] }
 0x16b   :  { %3616 = vmatpush1.bf16.msra.mxu0 %v3615_v1  ;;  %v761_v1 = vld [vmem:[#allocation11 + $0x11a0] sm:$0xff]  ;;  %v3829_v6 = vpack.c.bf16 %v770_v63, %v764_v62 }
 0x16c   :  { %3618 = vmatprep.subr.bf16.mxu0 %v3617_v4  ;;  %v202_v4 = vld [vmem:[#allocation11 + $0x28] sm:$0xff]  ;;  %v3639_v9 = vpack.c.bf16 %v767_v2, %v761_v1  ;;  %v303_v1 = vld [vmem:[#allocation11 + $0x350] sm:$0xff] }
 0x16d   :  { %3808 = vmatpush1.bf16.msra.mxu1 %v3807_v7  ;;  %v763_v7 = vld [vmem:[#allocation11 + $0x11b0] sm:$0xff]  ;;  %v310_v2 = vld [vmem:[#allocation11 + $0x388] sm:$0xff] }
 0x16e   :  { %3810 = vmatprep.subr.bf16.mxu1 %v3809_v10  ;;  %v3833_v10 = vpack.c.bf16 %v208_v5, %v202_v4 }
 0x16f   :  { %3620 = vmatpush1.bf16.msra.mxu0 %v3619_v13  ;;  %v3831_v13 = vpack.c.bf16 %v769_v8, %v763_v7  ;;  %v315_v7 = vld [vmem:[#allocation11 + $0x3b0] sm:$0xff]  ;;  %v322_v8 = vld [vmem:[#allocation11 + $0x3e8] sm:$0xff] }
 0x170   :  { %3622 = vmatprep.subr.bf16.mxu0 %v3621_v16  ;;  %v5271_v16 = vld [vmem:[#allocation6 + $0x20] sm:$0xff] }
 0x171   :  { %3812 = vmatpush1.bf16.msra.mxu1 %v3811_v19  ;;  %v3837_v19 = vpack.c.bf16 %v220_v15, %v214_v14  ;;  %v334_v14 = vld [vmem:[#allocation11 + $0x448] sm:$0xff]  ;;  %v340_v15 = vld [vmem:[#allocation11 + $0x478] sm:$0xff] }
 0x172   :  { %3814 = vmatprep.subr.bf16.mxu1 %v3813_v22  ;;  %v226_v22 = vld [vmem:[#allocation11 + $0xe8] sm:$0xff] }
 0x173   :  { %3624 = vmatpush1.bf16.msra.mxu0 %v3623_v25  ;;  %v3839_v25 = vpack.c.bf16 %v219_v21, %v213_v20  ;;  %v3841_v26 = vpack.c.bf16 %v232_v23, %v226_v22  ;;  %v333_v20 = vld [vmem:[#allocation11 + $0x440] sm:$0xff]  ;;  %v339_v21 = vld [vmem:[#allocation11 + $0x470] sm:$0xff]  ;;  %v346_v22 = vld [vmem:[#allocation11 + $0x4a8] sm:$0xff] }
 0x174   :  { %3626 = vmatprep.subr.bf16.mxu0 %v3625_v28  ;;  %v231_v28 = vld [vmem:[#allocation11 + $0x110] sm:$0xff]  ;;  %v352_v23 = vld [vmem:[#allocation11 + $0x4d8] sm:$0xff] }
 0x175   :  { %3816 = vmatpush1.bf16.msra.mxu1 %v3815_v31  ;;  %v3843_v31 = vpack.c.bf16 %v231_v28, %v225_v27  ;;  %v345_v27 = vld [vmem:[#allocation11 + $0x4a0] sm:$0xff]  ;;  %v351_v28 = vld [vmem:[#allocation11 + $0x4d0] sm:$0xff] }
 0x176   :  { %3818 = vmatprep.subr.bf16.mxu1 %v3817_v34  ;;  %v237_v34 = vld [vmem:[#allocation11 + $0x140] sm:$0xff] }
 0x177   :  { %3628 = vmatpush1.bf16.msra.mxu0 %v3627_v37  ;;  %v256_v37 = vld [vmem:[#allocation11 + $0x1d8] sm:$0xff]  ;;  %v3847_v38 = vpack.c.bf16 %v243_v35, %v237_v34  ;;  %v363_v34 = vld [vmem:[#allocation11 + $0x530] sm:$0xff]  ;;  %v370_v35 = vld [vmem:[#allocation11 + $0x568] sm:$0xff] }
 0x178   :  { %3630 = vmatprep.subr.bf16.mxu0 %v3629_v40  ;;  %v3849_v39 = vpack.c.bf16 %v256_v37, %v250_v36  ;;  %v249_v40 = vld [vmem:[#allocation11 + $0x1a0] sm:$0xff]  ;;  %v376_v36 = vld [vmem:[#allocation11 + $0x598] sm:$0xff] }
 0x179   :  { %3820 = vmatpush1.bf16.msra.mxu1 %v3819_v43  ;;  %v268_v43 = vld [vmem:[#allocation11 + $0x238] sm:$0xff]  ;;  %v3851_v44 = vpack.c.bf16 %v255_v41, %v249_v40  ;;  %v375_v40 = vld [vmem:[#allocation11 + $0x590] sm:$0xff]  ;;  %v382_v41 = vld [vmem:[#allocation11 + $0x5c8] sm:$0xff] }
 0x17a   :  { %3822 = vmatprep.subr.bf16.mxu1 %v3821_v46  ;;  %v3853_v45 = vpack.c.bf16 %v268_v43, %v262_v42  ;;  %v261_v46 = vld [vmem:[#allocation11 + $0x200] sm:$0xff]  ;;  %v388_v42 = vld [vmem:[#allocation11 + $0x5f8] sm:$0xff] }
 0x17b   :  { %3632 = vmatpush1.bf16.msra.mxu0 %v3631_v49  ;;  %v280_v49 = vld [vmem:[#allocation11 + $0x298] sm:$0xff]  ;;  %v3855_v50 = vpack.c.bf16 %v267_v47, %v261_v46  ;;  %v387_v46 = vld [vmem:[#allocation11 + $0x5f0] sm:$0xff]  ;;  %v394_v47 = vld [vmem:[#allocation11 + $0x628] sm:$0xff] }
 0x17c   :  { %3634 = vmatprep.subr.bf16.mxu0 %v3633_v52  ;;  %v3857_v51 = vpack.c.bf16 %v280_v49, %v274_v48  ;;  %v273_v52 = vld [vmem:[#allocation11 + $0x260] sm:$0xff]  ;;  %v400_v48 = vld [vmem:[#allocation11 + $0x658] sm:$0xff] }
 0x17d   :  { %3824 = vmatpush1.bf16.msra.mxu1 %v3823_v55  ;;  %v292_v55 = vld [vmem:[#allocation11 + $0x2f8] sm:$0xff]  ;;  %v3859_v56 = vpack.c.bf16 %v279_v53, %v273_v52  ;;  %v399_v52 = vld [vmem:[#allocation11 + $0x650] sm:$0xff]  ;;  %v406_v53 = vld [vmem:[#allocation11 + $0x688] sm:$0xff] }
 0x17e   :  { %3826 = vmatprep.subr.bf16.mxu1 %v3825_v58  ;;  %v3861_v57 = vpack.c.bf16 %v292_v55, %v286_v54  ;;  %v285_v58 = vld [vmem:[#allocation11 + $0x2c0] sm:$0xff]  ;;  %v412_v54 = vld [vmem:[#allocation11 + $0x6b8] sm:$0xff] }
 0x17f   :  { %3636 = vmatpush1.bf16.msra.mxu0 %v3635_v61  ;;  %v304_v61 = vld [vmem:[#allocation11 + $0x358] sm:$0xff]  ;;  %v3863_v62 = vpack.c.bf16 %v291_v59, %v285_v58  ;;  %v411_v58 = vld [vmem:[#allocation11 + $0x6b0] sm:$0xff]  ;;  %v418_v59 = vld [vmem:[#allocation11 + $0x6e8] sm:$0xff] }
 0x180   :  { %3638 = vmatprep.subr.bf16.mxu0 %v3637_v0  ;;  %v3865_v63 = vpack.c.bf16 %v304_v61, %v298_v60  ;;  %v297_v0 = vld [vmem:[#allocation11 + $0x320] sm:$0xff]  ;;  %v424_v60 = vld [vmem:[#allocation11 + $0x718] sm:$0xff] }
 0x181   :  { %3828 = vmatpush1.bf16.msra.mxu1 %v3827_v3  ;;  %v316_v3 = vld [vmem:[#allocation11 + $0x3b8] sm:$0xff]  ;;  %v3867_v4 = vpack.c.bf16 %v303_v1, %v297_v0  ;;  %v4754_v61 = vld [vmem:[#allocation6] sm:$0xff]  ;;  %v3905_v0 = vpack.c.bf16 %v424_v60, %v418_v59 }
 0x182   :  { %3830 = vmatprep.subr.bf16.mxu1 %v3829_v6  ;;  %v3869_v5 = vpack.c.bf16 %v316_v3, %v310_v2  ;;  %v309_v6 = vld [vmem:[#allocation11 + $0x380] sm:$0xff]  ;;  %v423_v2 = vld [vmem:[#allocation11 + $0x710] sm:$0xff]  ;;  %v430_v3 = vld [vmem:[#allocation11 + $0x748] sm:$0xff] }
 0x183   :  { %3640 = vmatpush1.bf16.msra.mxu0 %v3639_v9  ;;  %v328_v9 = vld [vmem:[#allocation11 + $0x418] sm:$0xff]  ;;  %v417_v1 = vld [vmem:[#allocation11 + $0x6e0] sm:$0xff] }
 0x184   :  { %3834 = vmatprep.subr.bf16.mxu0 %v3833_v10  ;;  %v3871_v10 = vpack.c.bf16 %v315_v7, %v309_v6  ;;  %v3873_v11 = vpack.c.bf16 %v328_v9, %v322_v8  ;;  %v3907_v6 = vpack.c.bf16 %v423_v2, %v417_v1  ;;  %v4757_v7 = vld [vmem:[#allocation6 + $0x18] sm:$0xff]  ;;  %v429_v9 = vld [vmem:[#allocation11 + $0x740] sm:$0xff] }
 0x185   :  { %3832 = vmatpush1.bf16.msra.mxu1 %v3831_v13  ;;  %v327_v13 = vld [vmem:[#allocation11 + $0x410] sm:$0xff]  ;;  %v525_v60 = vld [vmem:[#allocation11 + $0xa40] sm:$0xff] }
 0x186   :  { %1024 = vmatmul.mubr.f32.vlgmr.msra.gmra.mrb[0].mxu0 %v5271_v16  ;;  %v537_v2 = vld [vmem:[#allocation11 + $0xaa0] sm:$0xff] }
 0x187   :  { %3836 = vmatpush1.bf16.msra.mxu0 %v3835_v17  ;;  %1029 = vmatprep.mubr.f32.mxu0 %v5273_v18  ;;  %v3875_v17 = vpack.c.bf16 %v327_v13, %v321_v12  ;;  %v448_v12 = vld [vmem:[#allocation11 + $0x7d8] sm:$0xff] }
 0x188   :  { %1255 = vmatmul.mubr.f32.vlgmr.msra.gmra.mrb[0].mxu1 %v5271_v16  ;;  %3838 = vmatprep.subr.bf16.mxu0 %v3837_v19  ;;  %v3877_v19 = vpack.c.bf16 %v340_v15, %v334_v14  ;;  %v441_v15 = vld [vmem:[#allocation11 + $0x7a0] sm:$0xff] }
 0x189   :  { %1260 = vmatprep.mubr.f32.mxu1 %v5273_v18 }
 0x18a   :  { %1030 = vmatmul.mubr.f32.gmra.mrb[2].mxu0 %v5277_v24 }
 0x18b   :  { %3840 = vmatpush1.bf16.msra.mxu0 %v3839_v25  ;;  %1331 = vmatprep.mubr.f32.mxu0 %v4753_v32  ;;  %v3879_v25 = vpack.c.bf16 %v339_v21, %v333_v20  ;;  %v3885_v32 = vpack.c.bf16 %v364_v30, %v358_v29  ;;  %v460_v20 = vld [vmem:[#allocation11 + $0x838] sm:$0xff]  ;;  %v465_v30 = vld [vmem:[#allocation11 + $0x860] sm:$0xff] }
 0x18c   :  { %1261 = vmatmul.mubr.f32.gmra.mrb[2].mxu1 %v5277_v24  ;;  %3842 = vmatprep.subr.bf16.mxu0 %v3841_v26  ;;  %v3881_v26 = vpack.c.bf16 %v352_v23, %v346_v22  ;;  %v453_v23 = vld [vmem:[#allocation11 + $0x800] sm:$0xff] }
 0x18f   :  { %3844 = vmatpush1.bf16.msra.mxu0 %v3843_v31  ;;  %v3883_v31 = vpack.c.bf16 %v351_v28, %v345_v27  ;;  %v472_v27 = vld [vmem:[#allocation11 + $0x898] sm:$0xff] }
 0x190   :  { %3846 = vmatprep.subr.bf16.mxu0 %v3845_v33  ;;  %v357_v33 = vld [vmem:[#allocation11 + $0x500] sm:$0xff] }
 0x191   :  { %v3887_v37 = vpack.c.bf16 %v363_v34, %v357_v33  ;;  %v484_v33 = vld [vmem:[#allocation11 + $0x8f8] sm:$0xff] }
 0x193   :  { %3848 = vmatpush1.bf16.msra.mxu0 %v3847_v38  ;;  %v3889_v38 = vpack.c.bf16 %v376_v36, %v370_v35  ;;  %v477_v36 = vld [vmem:[#allocation11 + $0x8c0] sm:$0xff] }
 0x194   :  { %3850 = vmatprep.subr.bf16.mxu0 %v3849_v39  ;;  %v369_v39 = vld [vmem:[#allocation11 + $0x560] sm:$0xff] }
 0x195   :  { %v3891_v43 = vpack.c.bf16 %v375_v40, %v369_v39  ;;  %v496_v39 = vld [vmem:[#allocation11 + $0x958] sm:$0xff] }
 0x197   :  { %3852 = vmatpush1.bf16.msra.mxu0 %v3851_v44  ;;  %v3893_v44 = vpack.c.bf16 %v388_v42, %v382_v41  ;;  %v489_v42 = vld [vmem:[#allocation11 + $0x920] sm:$0xff] }
 0x198   :  { %3854 = vmatprep.subr.bf16.mxu0 %v3853_v45  ;;  %v381_v45 = vld [vmem:[#allocation11 + $0x5c0] sm:$0xff] }
 0x199   :  { %v3895_v49 = vpack.c.bf16 %v387_v46, %v381_v45  ;;  %v508_v45 = vld [vmem:[#allocation11 + $0x9b8] sm:$0xff] }
 0x19b   :  { %3856 = vmatpush1.bf16.msra.mxu0 %v3855_v50  ;;  %v3897_v50 = vpack.c.bf16 %v400_v48, %v394_v47  ;;  %v501_v48 = vld [vmem:[#allocation11 + $0x980] sm:$0xff] }
 0x19c   :  { %3858 = vmatprep.subr.bf16.mxu0 %v3857_v51  ;;  %v393_v51 = vld [vmem:[#allocation11 + $0x620] sm:$0xff] }
 0x19d   :  { %v3899_v55 = vpack.c.bf16 %v399_v52, %v393_v51  ;;  %v520_v51 = vld [vmem:[#allocation11 + $0xa18] sm:$0xff] }
 0x19f   :  { %3860 = vmatpush1.bf16.msra.mxu0 %v3859_v56  ;;  %v3901_v56 = vpack.c.bf16 %v412_v54, %v406_v53  ;;  %v513_v54 = vld [vmem:[#allocation11 + $0x9e0] sm:$0xff] }
 0x1a0   :  { %3862 = vmatprep.subr.bf16.mxu0 %v3861_v57  ;;  %v405_v57 = vld [vmem:[#allocation11 + $0x680] sm:$0xff] }
 0x1a3   :  { %3864 = vmatpush1.bf16.msra.mxu0 %v3863_v62  ;;  %v3903_v62 = vpack.c.bf16 %v411_v58, %v405_v57  ;;  %v532_v57 = vld [vmem:[#allocation11 + $0xa78] sm:$0xff] }
 0x1a4   :  { %3866 = vmatprep.subr.bf16.mxu0 %v3865_v63  ;;  %v4755_v63 = vld [vmem:[#allocation6 + $0x38] sm:$0xff] }
 0x1a7   :  { %3868 = vmatpush1.bf16.msra.mxu0 %v3867_v4  ;;  %v436_v4 = vld [vmem:[#allocation11 + $0x778] sm:$0xff] }
 0x1a8   :  { %3870 = vmatprep.subr.bf16.mxu0 %v3869_v5  ;;  %v4756_v5 = vld [vmem:[#allocation6 + $0x30] sm:$0xff]  ;;  %v3909_v8 = vpack.c.bf16 %v436_v4, %v430_v3  ;;  %v550_v4 = vld [vmem:[#allocation11 + $0xb08] sm:$0xff] }
 0x1a9   :  { %v543_v3 = vld [vmem:[#allocation11 + $0xad0] sm:$0xff] }
 0x1ab   :  { %3872 = vmatpush1.bf16.msra.mxu0 %v3871_v10  ;;  %v435_v10 = vld [vmem:[#allocation11 + $0x770] sm:$0xff] }
 0x1ac   :  { %3874 = vmatprep.subr.bf16.mxu0 %v3873_v11  ;;  %v442_v11 = vld [vmem:[#allocation11 + $0x7a8] sm:$0xff]  ;;  %v3911_v13 = vpack.c.bf16 %v435_v10, %v429_v9  ;;  %v555_v9 = vld [vmem:[#allocation11 + $0xb30] sm:$0xff] }
 0x1ad   :  { %v3913_v14 = vpack.c.bf16 %v448_v12, %v442_v11  ;;  %v562_v10 = vld [vmem:[#allocation11 + $0xb68] sm:$0xff]  ;;  %v568_v11 = vld [vmem:[#allocation11 + $0xb98] sm:$0xff] }
 0x1af   :  { %3876 = vmatpush1.bf16.msra.mxu0 %v3875_v17  ;;  %v447_v17 = vld [vmem:[#allocation11 + $0x7d0] sm:$0xff] }
 0x1b0   :  { %3878 = vmatprep.subr.bf16.mxu0 %v3877_v19  ;;  %v454_v19 = vld [vmem:[#allocation11 + $0x808] sm:$0xff]  ;;  %v3915_v21 = vpack.c.bf16 %v447_v17, %v441_v15  ;;  %v567_v15 = vld [vmem:[#allocation11 + $0xb90] sm:$0xff] }
 0x1b1   :  { %v3917_v22 = vpack.c.bf16 %v460_v20, %v454_v19  ;;  %v574_v17 = vld [vmem:[#allocation11 + $0xbc8] sm:$0xff]  ;;  %v580_v19 = vld [vmem:[#allocation11 + $0xbf8] sm:$0xff] }
 0x1b3   :  { %3880 = vmatpush1.bf16.msra.mxu0 %v3879_v25  ;;  %v459_v25 = vld [vmem:[#allocation11 + $0x830] sm:$0xff] }
 0x1b4   :  { %3882 = vmatprep.subr.bf16.mxu0 %v3881_v26  ;;  %v466_v26 = vld [vmem:[#allocation11 + $0x868] sm:$0xff]  ;;  %v3919_v28 = vpack.c.bf16 %v459_v25, %v453_v23  ;;  %v579_v23 = vld [vmem:[#allocation11 + $0xbf0] sm:$0xff] }
 0x1b5   :  { %v3921_v29 = vpack.c.bf16 %v472_v27, %v466_v26  ;;  %v586_v25 = vld [vmem:[#allocation11 + $0xc28] sm:$0xff]  ;;  %v592_v26 = vld [vmem:[#allocation11 + $0xc58] sm:$0xff] }
 0x1b7   :  { %3884 = vmatpush1.bf16.msra.mxu0 %v3883_v31  ;;  %v471_v31 = vld [vmem:[#allocation11 + $0x890] sm:$0xff] }
 0x1b8   :  { %3886 = vmatprep.subr.bf16.mxu0 %v3885_v32  ;;  %v478_v32 = vld [vmem:[#allocation11 + $0x8c8] sm:$0xff]  ;;  %v3923_v34 = vpack.c.bf16 %v471_v31, %v465_v30  ;;  %v591_v30 = vld [vmem:[#allocation11 + $0xc50] sm:$0xff] }
 0x1b9   :  { %v3925_v35 = vpack.c.bf16 %v484_v33, %v478_v32  ;;  %v598_v31 = vld [vmem:[#allocation11 + $0xc88] sm:$0xff]  ;;  %v604_v32 = vld [vmem:[#allocation11 + $0xcb8] sm:$0xff] }
 0x1bb   :  { %3888 = vmatpush1.bf16.msra.mxu0 %v3887_v37  ;;  %v483_v37 = vld [vmem:[#allocation11 + $0x8f0] sm:$0xff] }
 0x1bc   :  { %3890 = vmatprep.subr.bf16.mxu0 %v3889_v38  ;;  %v490_v38 = vld [vmem:[#allocation11 + $0x928] sm:$0xff]  ;;  %v3927_v40 = vpack.c.bf16 %v483_v37, %v477_v36  ;;  %v603_v36 = vld [vmem:[#allocation11 + $0xcb0] sm:$0xff] }
 0x1bd   :  { %v3929_v41 = vpack.c.bf16 %v496_v39, %v490_v38  ;;  %v610_v37 = vld [vmem:[#allocation11 + $0xce8] sm:$0xff]  ;;  %v616_v38 = vld [vmem:[#allocation11 + $0xd18] sm:$0xff]  ;;  %v4758_v39 = vld [vmem:[#allocation6 + $0x10] sm:$0xff] }
 0x1bf   :  { %3892 = vmatpush1.bf16.msra.mxu0 %v3891_v43  ;;  %v495_v43 = vld [vmem:[#allocation11 + $0x950] sm:$0xff] }
 0x1c0   :  { %3894 = vmatprep.subr.bf16.mxu0 %v3893_v44  ;;  %v502_v44 = vld [vmem:[#allocation11 + $0x988] sm:$0xff]  ;;  %v3931_v46 = vpack.c.bf16 %v495_v43, %v489_v42  ;;  %v3969_v42 = vpack.c.bf16 %v616_v38, %v610_v37  ;;  %v609_v43 = vld [vmem:[#allocation11 + $0xce0] sm:$0xff] }
 0x1c1   :  { %v3933_v47 = vpack.c.bf16 %v508_v45, %v502_v44  ;;  %v615_v44 = vld [vmem:[#allocation11 + $0xd10] sm:$0xff]  ;;  %v622_v45 = vld [vmem:[#allocation11 + $0xd48] sm:$0xff]  ;;  %v717_v38 = vld [vmem:[#allocation11 + $0x1040] sm:$0xff] }
 0x1c3   :  { %3896 = vmatpush1.bf16.msra.mxu0 %v3895_v49  ;;  %v507_v49 = vld [vmem:[#allocation11 + $0x9b0] sm:$0xff] }
 0x1c4   :  { %3898 = vmatprep.subr.bf16.mxu0 %v3897_v50  ;;  %v514_v50 = vld [vmem:[#allocation11 + $0x9e8] sm:$0xff]  ;;  %v3935_v52 = vpack.c.bf16 %v507_v49, %v501_v48  ;;  %v3971_v48 = vpack.c.bf16 %v615_v44, %v609_v43  ;;  %v729_v44 = vld [vmem:[#allocation11 + $0x10a0] sm:$0xff] }
 0x1c5   :  { %v3937_v53 = vpack.c.bf16 %v520_v51, %v514_v50  ;;  %v4761_v49 = vld [vmem:[#allocation6 + $0x28] sm:$0xff]  ;;  %v621_v51 = vld [vmem:[#allocation11 + $0xd40] sm:$0xff] }
 0x1c6   :  { %1332 = vmatmul.mubr.f32.vlgmr.msra.gmra.mrb[4].mxu0 %v4754_v61  ;;  %v531_v61 = vld [vmem:[#allocation11 + $0xa70] sm:$0xff] }
 0x1c7   :  { %3900 = vmatpush1.bf16.msra.mxu0 %v3899_v55  ;;  %1337 = vmatprep.mubr.f32.mxu0 %v4755_v63  ;;  %v519_v55 = vld [vmem:[#allocation11 + $0xa10] sm:$0xff]  ;;  %v544_v63 = vld [vmem:[#allocation11 + $0xad8] sm:$0xff] }
 0x1c8   :  { %3902 = vmatprep.subr.bf16.mxu0 %v3901_v56  ;;  %v526_v56 = vld [vmem:[#allocation11 + $0xa48] sm:$0xff]  ;;  %v3939_v58 = vpack.c.bf16 %v519_v55, %v513_v54  ;;  %v640_v54 = vld [vmem:[#allocation11 + $0xdd8] sm:$0xff] }
 0x1c9   :  { %v3941_v59 = vpack.c.bf16 %v532_v57, %v526_v56  ;;  %v633_v57 = vld [vmem:[#allocation11 + $0xda0] sm:$0xff] }
 0x1ca   :  { %1338 = vmatmul.mubr.f32.gmra.mrb[6].mxu0 %v4756_v5  ;;  %v556_v5 = vld [vmem:[#allocation11 + $0xb38] sm:$0xff] }
 0x1cb   :  { %3904 = vmatpush1.bf16.msra.mxu0 %v3903_v62  ;;  %1408 = vmatprep.mubr.f32.mxu0 %v4757_v7  ;;  %v538_v62 = vld [vmem:[#allocation11 + $0xaa8] sm:$0xff]  ;;  %v3949_v7 = vpack.c.bf16 %v556_v5, %v550_v4  ;;  %v657_v5 = vld [vmem:[#allocation11 + $0xe60] sm:$0xff] }
 0x1cc   :  { %3906 = vmatprep.subr.bf16.mxu0 %v3905_v0  ;;  %v3943_v0 = vpack.c.bf16 %v531_v61, %v525_v60  ;;  %v3945_v1 = vpack.c.bf16 %v544_v63, %v538_v62  ;;  %v652_v60 = vld [vmem:[#allocation11 + $0xe38] sm:$0xff]  ;;  %v645_v63 = vld [vmem:[#allocation11 + $0xe00] sm:$0xff] }
 0x1cf   :  { %3908 = vmatpush1.bf16.msra.mxu0 %v3907_v6  ;;  %v3947_v6 = vpack.c.bf16 %v543_v3, %v537_v2  ;;  %v664_v2 = vld [vmem:[#allocation11 + $0xe98] sm:$0xff] }
 0x1d0   :  { %3910 = vmatprep.subr.bf16.mxu0 %v3909_v8  ;;  %v549_v8 = vld [vmem:[#allocation11 + $0xb00] sm:$0xff] }
 0x1d1   :  { %v3951_v12 = vpack.c.bf16 %v555_v9, %v549_v8  ;;  %v676_v8 = vld [vmem:[#allocation11 + $0xef8] sm:$0xff] }
 0x1d3   :  { %3912 = vmatpush1.bf16.msra.mxu0 %v3911_v13  ;;  %v3953_v13 = vpack.c.bf16 %v568_v11, %v562_v10  ;;  %v669_v11 = vld [vmem:[#allocation11 + $0xec0] sm:$0xff] }
 0x1d4   :  { %3914 = vmatprep.subr.bf16.mxu0 %v3913_v14  ;;  %v561_v14 = vld [vmem:[#allocation11 + $0xb60] sm:$0xff] }
 0x1d5   :  { %v3955_v20 = vpack.c.bf16 %v567_v15, %v561_v14  ;;  %v688_v14 = vld [vmem:[#allocation11 + $0xf58] sm:$0xff] }
 0x1d7   :  { %3916 = vmatpush1.bf16.msra.mxu0 %v3915_v21  ;;  %v3957_v21 = vpack.c.bf16 %v580_v19, %v574_v17  ;;  %v681_v19 = vld [vmem:[#allocation11 + $0xf20] sm:$0xff] }
 0x1d8   :  { %3918 = vmatprep.subr.bf16.mxu0 %v3917_v22  ;;  %v573_v22 = vld [vmem:[#allocation11 + $0xbc0] sm:$0xff] }
 0x1d9   :  { %v3959_v27 = vpack.c.bf16 %v579_v23, %v573_v22  ;;  %v700_v22 = vld [vmem:[#allocation11 + $0xfb8] sm:$0xff] }
 0x1db   :  { %3920 = vmatpush1.bf16.msra.mxu0 %v3919_v28  ;;  %v3961_v28 = vpack.c.bf16 %v592_v26, %v586_v25  ;;  %v693_v26 = vld [vmem:[#allocation11 + $0xf80] sm:$0xff] }
 0x1dc   :  { %3922 = vmatprep.subr.bf16.mxu0 %v3921_v29  ;;  %v585_v29 = vld [vmem:[#allocation11 + $0xc20] sm:$0xff] }
 0x1dd   :  { %v3963_v33 = vpack.c.bf16 %v591_v30, %v585_v29  ;;  %v712_v29 = vld [vmem:[#allocation11 + $0x1018] sm:$0xff] }
 0x1df   :  { %3924 = vmatpush1.bf16.msra.mxu0 %v3923_v34  ;;  %v3965_v34 = vpack.c.bf16 %v604_v32, %v598_v31  ;;  %v705_v32 = vld [vmem:[#allocation11 + $0xfe0] sm:$0xff] }
 0x1e0   :  { %3926 = vmatprep.subr.bf16.mxu0 %v3925_v35  ;;  %v597_v35 = vld [vmem:[#allocation11 + $0xc80] sm:$0xff] }
 0x1e3   :  { %3928 = vmatpush1.bf16.msra.mxu0 %v3927_v40  ;;  %v3967_v40 = vpack.c.bf16 %v603_v36, %v597_v35  ;;  %v724_v35 = vld [vmem:[#allocation11 + $0x1078] sm:$0xff] }
 0x1e4   :  { %3930 = vmatprep.subr.bf16.mxu0 %v3929_v41  ;;  %v4759_v41 = vld [vmem:[#allocation6 + $0x48] sm:$0xff] }
 0x1e7   :  { %3932 = vmatpush1.bf16.msra.mxu0 %v3931_v46  ;;  %v628_v46 = vld [vmem:[#allocation11 + $0xd78] sm:$0xff] }
 0x1e8   :  { %3934 = vmatprep.subr.bf16.mxu0 %v3933_v47  ;;  %v4760_v47 = vld [vmem:[#allocation6 + $0x40] sm:$0xff]  ;;  %v3973_v50 = vpack.c.bf16 %v628_v46, %v622_v45  ;;  %v735_v45 = vld [vmem:[#allocation11 + $0x10d0] sm:$0xff]  ;;  %v742_v46 = vld [vmem:[#allocation11 + $0x1108] sm:$0xff] }
 0x1eb   :  { %3936 = vmatpush1.bf16.msra.mxu0 %v3935_v52  ;;  %v627_v52 = vld [vmem:[#allocation11 + $0xd70] sm:$0xff] }
 0x1ec   :  { %3938 = vmatprep.subr.bf16.mxu0 %v3937_v53  ;;  %v634_v53 = vld [vmem:[#allocation11 + $0xda8] sm:$0xff]  ;;  %v3975_v55 = vpack.c.bf16 %v627_v52, %v621_v51  ;;  %v747_v51 = vld [vmem:[#allocation11 + $0x1130] sm:$0xff] }
 0x1ed   :  { %v3977_v56 = vpack.c.bf16 %v640_v54, %v634_v53  ;;  %v754_v52 = vld [vmem:[#allocation11 + $0x1168] sm:$0xff]  ;;  %v760_v53 = vld [vmem:[#allocation11 + $0x1198] sm:$0xff] }
 0x1ef   :  { %3940 = vmatpush1.bf16.msra.mxu0 %v3939_v58  ;;  %v639_v58 = vld [vmem:[#allocation11 + $0xdd0] sm:$0xff] }
 0x1f0   :  { %3942 = vmatprep.subr.bf16.mxu0 %v3941_v59  ;;  %v646_v59 = vld [vmem:[#allocation11 + $0xe08] sm:$0xff]  ;;  %v3979_v61 = vpack.c.bf16 %v639_v58, %v633_v57  ;;  %v759_v57 = vld [vmem:[#allocation11 + $0x1190] sm:$0xff] }
 0x1f1   :  { %v3981_v62 = vpack.c.bf16 %v652_v60, %v646_v59  ;;  %v766_v58 = vld [vmem:[#allocation11 + $0x11c8] sm:$0xff]  ;;  %v772_v59 = vld [vmem:[#allocation11 + $0x11f8] sm:$0xff] }
 0x1f3   :  { %3944 = vmatpush1.bf16.msra.mxu0 %v3943_v0  ;;  %v651_v0 = vld [vmem:[#allocation11 + $0xe30] sm:$0xff] }
 0x1f4   :  { %3946 = vmatprep.subr.bf16.mxu0 %v3945_v1  ;;  %v658_v1 = vld [vmem:[#allocation11 + $0xe68] sm:$0xff]  ;;  %v3983_v3 = vpack.c.bf16 %v651_v0, %v645_v63  ;;  %v771_v63 = vld [vmem:[#allocation11 + $0x11f0] sm:$0xff] }
 0x1f5   :  { %v3985_v4 = vpack.c.bf16 %v664_v2, %v658_v1 }
 0x1f7   :  { %3948 = vmatpush1.bf16.msra.mxu0 %v3947_v6  ;;  %v663_v6 = vld [vmem:[#allocation11 + $0xe90] sm:$0xff] }
 0x1f8   :  { %3950 = vmatprep.subr.bf16.mxu0 %v3949_v7  ;;  %v670_v7 = vld [vmem:[#allocation11 + $0xec8] sm:$0xff]  ;;  %v3987_v9 = vpack.c.bf16 %v663_v6, %v657_v5 }
 0x1f9   :  { %v3989_v10 = vpack.c.bf16 %v676_v8, %v670_v7 }
 0x1fb   :  { %3952 = vmatpush1.bf16.msra.mxu0 %v3951_v12  ;;  %v675_v12 = vld [vmem:[#allocation11 + $0xef0] sm:$0xff] }
 0x1fc   :  { %3954 = vmatprep.subr.bf16.mxu0 %v3953_v13  ;;  %v682_v13 = vld [vmem:[#allocation11 + $0xf28] sm:$0xff]  ;;  %v3991_v15 = vpack.c.bf16 %v675_v12, %v669_v11  ;;  %v773_v12 = vld [vmem:[#allocation13] sm:$0x3f] }
 0x1fd   :  { %v3993_v17 = vpack.c.bf16 %v688_v14, %v682_v13 }
 0x1ff   :  { %3956 = vmatpush1.bf16.msra.mxu0 %v3955_v20  ;;  %v687_v20 = vld [vmem:[#allocation11 + $0xf50] sm:$0xff] }
 0x200   :  { %3958 = vmatprep.subr.bf16.mxu0 %v3957_v21  ;;  %v694_v21 = vld [vmem:[#allocation11 + $0xf88] sm:$0xff]  ;;  %v3995_v23 = vpack.c.bf16 %v687_v20, %v681_v19 }
 0x201   :  { %v3997_v25 = vpack.c.bf16 %v700_v22, %v694_v21 }
 0x203   :  { %3960 = vmatpush1.bf16.msra.mxu0 %v3959_v27  ;;  %v699_v27 = vld [vmem:[#allocation11 + $0xfb0] sm:$0xff] }
 0x204   :  { %3962 = vmatprep.subr.bf16.mxu0 %v3961_v28  ;;  %v706_v28 = vld [vmem:[#allocation11 + $0xfe8] sm:$0xff]  ;;  %v3999_v30 = vpack.c.bf16 %v699_v27, %v693_v26 }
 0x205   :  { %v4001_v31 = vpack.c.bf16 %v712_v29, %v706_v28 }
 0x206   :  { %1409 = vmatmul.mubr.f32.vlgmr.msra.gmra.mrb[4].mxu0 %v4758_v39  ;;  %v723_v39 = vld [vmem:[#allocation11 + $0x1070] sm:$0xff] }
 0x207   :  { %3964 = vmatpush1.bf16.msra.mxu0 %v3963_v33  ;;  %1414 = vmatprep.mubr.f32.mxu0 %v4759_v41  ;;  %v711_v33 = vld [vmem:[#allocation11 + $0x1010] sm:$0xff]  ;;  %v736_v41 = vld [vmem:[#allocation11 + $0x10d8] sm:$0xff] }
 0x208   :  { %3966 = vmatprep.subr.bf16.mxu0 %v3965_v34  ;;  %v718_v34 = vld [vmem:[#allocation11 + $0x1048] sm:$0xff]  ;;  %v4003_v36 = vpack.c.bf16 %v711_v33, %v705_v32 }
 0x209   :  { %v4005_v37 = vpack.c.bf16 %v724_v35, %v718_v34 }
 0x20a   :  { %1415 = vmatmul.mubr.f32.gmra.mrb[6].mxu0 %v4760_v47  ;;  %v748_v47 = vld [vmem:[#allocation11 + $0x1138] sm:$0xff] }
 0x20b   :  { %3968 = vmatpush1.bf16.msra.mxu0 %v3967_v40  ;;  %1485 = vmatprep.mubr.f32.mxu0 %v4761_v49  ;;  %v730_v40 = vld [vmem:[#allocation11 + $0x10a8] sm:$0xff]  ;;  %v4013_v49 = vpack.c.bf16 %v748_v47, %v742_v46 }
 0x20c   :  { %3970 = vmatprep.subr.bf16.mxu0 %v3969_v42  ;;  %v4007_v42 = vpack.c.bf16 %v723_v39, %v717_v38  ;;  %v4009_v43 = vpack.c.bf16 %v736_v41, %v730_v40 }
 0x20f   :  { %3972 = vmatpush1.bf16.msra.mxu0 %v3971_v48  ;;  %v4011_v48 = vpack.c.bf16 %v735_v45, %v729_v44 }
 0x210   :  { %3974 = vmatprep.subr.bf16.mxu0 %v3973_v50  ;;  %v741_v50 = vld [vmem:[#allocation11 + $0x1100] sm:$0xff] }
 0x211   :  { %v4015_v54 = vpack.c.bf16 %v747_v51, %v741_v50 }
 0x213   :  { %3976 = vmatpush1.bf16.msra.mxu0 %v3975_v55  ;;  %v4017_v55 = vpack.c.bf16 %v760_v53, %v754_v52 }
 0x214   :  { %3978 = vmatprep.subr.bf16.mxu0 %v3977_v56  ;;  %v753_v56 = vld [vmem:[#allocation11 + $0x1160] sm:$0xff] }
 0x215   :  { %v4019_v60 = vpack.c.bf16 %v759_v57, %v753_v56 }
 0x217   :  { %3980 = vmatpush1.bf16.msra.mxu0 %v3979_v61  ;;  %v4021_v61 = vpack.c.bf16 %v772_v59, %v766_v58 }
 0x218   :  { %3982 = vmatprep.subr.bf16.mxu0 %v3981_v62  ;;  %v765_v62 = vld [vmem:[#allocation11 + $0x11c0] sm:$0xff] }
 0x219   :  { %v4023_v0 = vpack.c.bf16 %v771_v63, %v765_v62 }
 0x21b   :  { %3984 = vmatpush1.bf16.msra.mxu0 %v3983_v3 }
 0x21c   :  { %3986 = vmatprep.subr.bf16.mxu0 %v3985_v4 }
 0x21f   :  { %3988 = vmatpush1.bf16.msra.mxu0 %v3987_v9  ;;  %v775_v9 = vlaneseq }
 0x220   :  { %3990 = vmatprep.subr.bf16.mxu0 %v3989_v10 }
 0x221   :  { %v776_v10 = vshrl.u32 %v775_v9, 7 }
 0x223   :  { %3992 = vmatpush1.bf16.msra.mxu0 %v3991_v15  ;;  %v5286_v11 = vsub.s32 0, %v776_v10  ;;  %v5288_v13 = vsub.s32 1, %v776_v10  ;;  %v5295_v19 = vsub.s32 3, %v776_v10  ;;  %v5298_v35 = vsub.s32 4, %v776_v10 }
 0x224   :  { %3994 = vmatprep.subr.bf16.mxu0 %v3993_v17 }
 0x225   :  { %v794_v39 = vrot.slane %v773_v12, %v5298_v35 }
 0x227   :  { %3996 = vmatpush1.bf16.msra.mxu0 %v3995_v23 }
 0x228   :  { %3998 = vmatprep.subr.bf16.mxu0 %v3997_v25  ;;  %v790_v25 = vrot.slane %v773_v12, %v5295_v19 }
 0x22b   :  { %4000 = vmatpush1.bf16.msra.mxu0 %v3999_v30 }
 0x22c   :  { %4002 = vmatprep.subr.bf16.mxu0 %v4001_v31 }
 0x22f   :  { %4004 = vmatpush1.bf16.msra.mxu0 %v4003_v36  ;;  %v5300_v36 = vsub.s32 5, %v776_v10 }
 0x230   :  { %4006 = vmatprep.subr.bf16.mxu0 %v4005_v37 }
 0x231   :  { %v798_v41 = vrot.slane %v773_v12, %v5300_v36 }
 0x233   :  { %4008 = vmatpush1.bf16.msra.mxu0 %v4007_v42 }
 0x234   :  { %4010 = vmatprep.subr.bf16.mxu0 %v4009_v43 }
 0x237   :  { %4012 = vmatpush1.bf16.msra.mxu0 %v4011_v48 }
 0x238   :  { %4014 = vmatprep.subr.bf16.mxu0 %v4013_v49 }
 0x23b   :  { %4016 = vmatpush1.bf16.msra.mxu0 %v4015_v54 }
 0x23c   :  { %4018 = vmatprep.subr.bf16.mxu0 %v4017_v55 }
 0x23f   :  { %4020 = vmatpush1.bf16.msra.mxu0 %v4019_v60 }
 0x240   :  { %4022 = vmatprep.subr.bf16.mxu0 %v4021_v61 }
 0x243   :  { %4024 = vmatpush1.bf16.msra.mxu0 %v4023_v0 }
 0x246   :  { %1486 = vmatmul.mubr.f32.vlgmr.msra.gmra.mrb[4].mxu0 %v5271_v16  ;;  %v778_v16 = vrot.slane %v773_v12, %v5286_v11 }
 0x247   :  { %1491 = vmatprep.mubr.f32.mxu0 %v5273_v18  ;;  %v5291_v18 = vsub.s32 2, %v776_v10 }
 0x249   :  { %v786_v15 = vrot.slane %v773_v12, %v5291_v18 }
 0x24a   :  { %1492 = vmatmul.mubr.f32.gmra.mrb[6].mxu0 %v5277_v24  ;;  %v782_v24 = vrot.slane %v773_v12, %v5288_v13 }
 0x259   :  { %v1025_v1 = vpop.f32.mrb[0].mxu0 }
 0x25a   :  { %v1027_v2 = vpop.f32.mrb[1].mxu0  ;;  %v4615_v14 = vadd.f32 %v1025_v1, %v778_v16 }
 0x25b   :  { %v1256_v3 = vpop.f32.mrb[0].mxu1  ;;  %v4616_v17 = vadd.f32 %v1027_v2, %v782_v24 }
 0x25c   :  { %v1258_v4 = vpop.f32.mrb[1].mxu1  ;;  %v1510_v20 = vmul.f32 0.70710677, %v4615_v14  ;;  %v4619_v21 = vadd.f32 %v1256_v3, %v786_v15  ;;  %v1498_v49 = vmul.f32 0.5, %v4615_v14 }
 0x25d   :  { %v1031_v5 = vpop.f32.mrb[2].mxu0  ;;  %v1511_v22 = vmul.f32 0.70710677, %v4616_v17  ;;  %v4620_v29 = vadd.f32 %v1258_v4, %v790_v25  ;;  %v1499_v52 = vmul.f32 0.5, %v4616_v17 }
 0x25e   :  { %v1033_v6 = vpop.f32.mrb[3].mxu0  ;;  %v4617_v23 = vadd.f32 %v1031_v5, %v778_v16  ;;  %4713 = verf.f32 %v1510_v20  ;;  %v1512_v27 = vmul.f32 0.70710677, %v4619_v21  ;;  %v1500_v55 = vmul.f32 0.5, %v4619_v21 }
 0x25f   :  { %v1262_v7 = vpop.f32.mrb[2].mxu1  ;;  %v4618_v26 = vadd.f32 %v1033_v6, %v782_v24  ;;  %4715 = verf.f32 %v1511_v22  ;;  %v1513_v32 = vmul.f32 0.70710677, %v4620_v29  ;;  %v1501_v3 = vmul.f32 0.5, %v4620_v29 }
 0x260   :  { %v1264_v8 = vpop.f32.mrb[3].mxu1  ;;  %v1516_v28 = vmul.f32 0.70710677, %v4617_v23  ;;  %v4621_v31 = vadd.f32 %v1262_v7, %v786_v15  ;;  %4717 = verf.f32 %v1512_v27  ;;  %v1504_v5 = vmul.f32 0.5, %v4617_v23 }
 0x261   :  { %v1517_v30 = vmul.f32 0.70710677, %v4618_v26  ;;  %v4622_v34 = vadd.f32 %v1264_v8, %v790_v25  ;;  %v1505_v6 = vmul.f32 0.5, %v4618_v26 }
 0x262   :  { %4719 = verf.f32 %v1516_v28  ;;  %v1518_v33 = vmul.f32 0.70710677, %v4621_v31  ;;  %v1506_v7 = vmul.f32 0.5, %v4621_v31 }
 0x263   :  { %4721 = verf.f32 %v1517_v30  ;;  %v1519_v38 = vmul.f32 0.70710677, %v4622_v34  ;;  %v1507_v20 = vmul.f32 0.5, %v4622_v34 }
 0x264   :  { %4723 = verf.f32 %v1513_v32 }
 0x265   :  { %4725 = verf.f32 %v1518_v33 }
 0x266   :  { %4727 = verf.f32 %v1519_v38 }
 0x268   :  { %v4714_v37 = vpop.eup %4713 }
 0x269   :  { %v4716_v40 = vpop.eup %4715  ;;  %v1534_v42 = vadd.f32 1.0, %v4714_v37 }
 0x26a   :  { %v4718_v44 = vpop.eup %4717  ;;  %v1535_v45 = vadd.f32 1.0, %v4716_v40 }
 0x26b   :  { %v5304_v54 = vmul.f32 %v1534_v42, %v1498_v49  ;;  %v1536_v59 = vadd.f32 1.0, %v4718_v44 }
 0x26c   :  { %v4720_v48 = vpop.eup %4719  ;;  %v5306_v58 = vmul.f32 %v1535_v45, %v1499_v52  ;;  %v1720_v52 = vld [vmem:[#allocation17 + $0x8] sm:$0xff] }
 0x26d   :  { %v4722_v51 = vpop.eup %4721  ;;  %v1540_v63 = vadd.f32 1.0, %v4720_v48  ;;  %v5310_v10 = vmul.f32 %v1536_v59, %v1500_v55  ;;  %v1722_v55 = vld [vmem:[#allocation17 + $0x18] sm:$0xff]  ;;  %v1719_v59 = vld [vmem:[#allocation17] sm:$0xff] }
 0x26e   :  { %v4724_v62 = vpop.eup %4723  ;;  %v1541_v0 = vadd.f32 1.0, %v4722_v51  ;;  %v1558_v9 = vadd.f32 %v5306_v58, %v5304_v54 }
 0x26f   :  { %v4726_v2 = vpop.eup %4725  ;;  %v1537_v12 = vadd.f32 1.0, %v4724_v62  ;;  %v5312_v16 = vmul.f32 %v1540_v63, %v1504_v5  ;;  %v1721_v63 = vld [vmem:[#allocation17 + $0x10] sm:$0xff]  ;;  %v1740_v5 = vld [vmem:[#allocation17 + $0xa8] sm:$0xff] }
 0x270   :  { %v5314_v24 = vmul.f32 %v1541_v0, %v1505_v6  ;;  %v1542_v14 = vadd.f32 1.0, %v4726_v2  ;;  %v4728_v15 = vpop.eup %4727  ;;  %v1559_v25 = vadd.f32 %v1558_v9, %v5310_v10  ;;  %v1727_v0 = vld [vmem:[#allocation17 + $0x40] sm:$0xff]  ;;  %v1737_v9 = vld [vmem:[#allocation17 + $0x90] sm:$0xff] }
 0x271   :  { %v5316_v17 = vmul.f32 %v1537_v12, %v1501_v3  ;;  %v1543_v23 = vadd.f32 1.0, %v4728_v15  ;;  %v4219_v2 = vpack.c.bf16 %v1727_v0, %v1721_v63  ;;  %v1738_v3 = vld [vmem:[#allocation17 + $0x98] sm:$0xff]  ;;  %v1733_v12 = vld [vmem:[#allocation17 + $0x70] sm:$0xff]  ;;  %v1739_v15 = vld [vmem:[#allocation17 + $0xa0] sm:$0xff] }
 0x272   :  { %v1565_v21 = vadd.f32 %v5314_v24, %v5312_v16  ;;  %v5320_v22 = vmul.f32 %v1542_v14, %v1506_v7  ;;  %v1769_v63 = vld [vmem:[#allocation17 + $0x190] sm:$0xff] }
 0x273   :  { %v5324_v33 = vmul.f32 %v1543_v23, %v1507_v20  ;;  %v1560_v34 = vadd.f32 %v1559_v25, %v5316_v17  ;;  %v1744_v20 = vld [vmem:[#allocation17 + $0xc8] sm:$0xff]  ;;  %v4223_v23 = vpack.c.bf16 %v1739_v15, %v1733_v12  ;;  %v1785_v12 = vld [vmem:[#allocation17 + $0x210] sm:$0xff] }
 0x274   :  { %v1566_v32 = vadd.f32 %v1565_v21, %v5320_v22  ;;  %v1750_v21 = vld [vmem:[#allocation17 + $0xf8] sm:$0xff] }
 0x275   :  { %v4033_v25 = vpack.c.bf16 %v1750_v21, %v1744_v20  ;;  %v1787_v20 = vld [vmem:[#allocation17 + $0x220] sm:$0xff]  ;;  %v1792_v21 = vld [vmem:[#allocation17 + $0x248] sm:$0xff] }
 0x276   :  { %v1567_v48 = vadd.f32 %v1566_v32, %v5324_v33  ;;  %v1751_v32 = vld [vmem:[#allocation17 + $0x100] sm:$0xff] }
 0x319   :  { %v1487_v43 = vpop.f32.mrb[4].mxu0 }
 0x31a   :  { %v4623_v46 = vadd.f32 %v1487_v43, %v794_v39  ;;  %v1489_v47 = vpop.f32.mrb[5].mxu0 }
 0x31b   :  { %v4624_v50 = vadd.f32 %v1489_v47, %v798_v41 }
 0x31c   :  { %v1514_v53 = vmul.f32 0.70710677, %v4623_v46  ;;  %v1502_v28 = vmul.f32 0.5, %v4623_v46 }
 0x31d   :  { %v1515_v56 = vmul.f32 0.70710677, %v4624_v50  ;;  %v1493_v57 = vpop.f32.mrb[6].mxu0  ;;  %v1503_v30 = vmul.f32 0.5, %v4624_v50 }
 0x31e   :  { %4729 = verf.f32 %v1514_v53  ;;  %v4625_v60 = vadd.f32 %v1493_v57, %v794_v39  ;;  %v1495_v61 = vpop.f32.mrb[7].mxu0  ;;  %v1726_v53 = vld [vmem:[#allocation17 + $0x38] sm:$0xff]  ;;  %v1728_v57 = vld [vmem:[#allocation17 + $0x48] sm:$0xff] }
 0x31f   :  { %4731 = verf.f32 %v1515_v56  ;;  %v4626_v1 = vadd.f32 %v1495_v61, %v798_v41  ;;  %v4025_v56 = vpack.c.bf16 %v1726_v53, %v1720_v52  ;;  %v4217_v61 = vpack.c.bf16 %v1728_v57, %v1722_v55  ;;  %v1768_v52 = vld [vmem:[#allocation17 + $0x188] sm:$0xff]  ;;  %v1774_v53 = vld [vmem:[#allocation17 + $0x1b8] sm:$0xff] }
 0x320   :  { %v1520_v4 = vmul.f32 0.70710677, %v4625_v60  ;;  %v1508_v41 = vmul.f32 0.5, %v4625_v60  ;;  %v1725_v60 = vld [vmem:[#allocation17 + $0x30] sm:$0xff]  ;;  %v1770_v55 = vld [vmem:[#allocation17 + $0x198] sm:$0xff] }
 0x321   :  { %v1521_v8 = vmul.f32 0.70710677, %v4626_v1  ;;  %v1509_v44 = vmul.f32 0.5, %v4626_v1  ;;  %v4027_v62 = vpack.c.bf16 %v1725_v60, %v1719_v59  ;;  %v1732_v1 = vld [vmem:[#allocation17 + $0x68] sm:$0xff]  ;;  %4026 = vmatprep.subr.bf16.mxu1 %v4025_v56  ;;  %4218 = vmatprep.subr.bf16.mxu0 %v4217_v61  ;;  %v4041_v60 = vpack.c.bf16 %v1774_v53, %v1768_v52  ;;  %v1767_v61 = vld [vmem:[#allocation17 + $0x180] sm:$0xff] }
 0x322   :  { %4733 = verf.f32 %v1520_v4  ;;  %v1734_v4 = vld [vmem:[#allocation17 + $0x78] sm:$0xff]  ;;  %v4029_v6 = vpack.c.bf16 %v1738_v3, %v1732_v1  ;;  %4220 = vmatpush1.bf16.msra.mxu0 %v4219_v2  ;;  %v1776_v56 = vld [vmem:[#allocation17 + $0x1c8] sm:$0xff]  ;;  %v1775_v1 = vld [vmem:[#allocation17 + $0x1c0] sm:$0xff] }
 0x323   :  { %4735 = verf.f32 %v1521_v8  ;;  %4028 = vmatpush1.bf16.msra.mxu1 %v4027_v62  ;;  %v4221_v7 = vpack.c.bf16 %v1740_v5, %v1734_v4  ;;  %v1731_v8 = vld [vmem:[#allocation17 + $0x60] sm:$0xff]  ;;  %v1773_v62 = vld [vmem:[#allocation17 + $0x1b0] sm:$0xff]  ;;  %v4233_v0 = vpack.c.bf16 %v1776_v56, %v1770_v55  ;;  %v1780_v2 = vld [vmem:[#allocation17 + $0x1e8] sm:$0xff] }
 0x324   :  { %v4031_v14 = vpack.c.bf16 %v1737_v9, %v1731_v8  ;;  %4030 = vmatprep.subr.bf16.mxu1 %v4029_v6  ;;  %v1786_v3 = vld [vmem:[#allocation17 + $0x218] sm:$0xff]  ;;  %v1788_v5 = vld [vmem:[#allocation17 + $0x228] sm:$0xff]  ;;  %v4043_v6 = vpack.c.bf16 %v1773_v62, %v1767_v61  ;;  %v1779_v9 = vld [vmem:[#allocation17 + $0x1e0] sm:$0xff] }
 0x325   :  { %4222 = vmatprep.subr.bf16.mxu0 %v4221_v7  ;;  %v1782_v4 = vld [vmem:[#allocation17 + $0x1f8] sm:$0xff]  ;;  %v4235_v7 = vpack.c.bf16 %v1775_v1, %v1769_v63  ;;  %v4045_v8 = vpack.c.bf16 %v1786_v3, %v1780_v2  ;;  %v1811_v53 = vld [vmem:[#allocation17 + $0x2e0] sm:$0xff]  ;;  %v1816_v55 = vld [vmem:[#allocation17 + $0x308] sm:$0xff] }
 0x326   :  { %4224 = vmatpush1.bf16.msra.mxu0 %v4223_v23  ;;  %v4237_v15 = vpack.c.bf16 %v1788_v5, %v1782_v4  ;;  %v1798_v23 = vld [vmem:[#allocation17 + $0x278] sm:$0xff]  ;;  %v1815_v63 = vld [vmem:[#allocation17 + $0x300] sm:$0xff]  ;;  %v1817_v1 = vld [vmem:[#allocation17 + $0x310] sm:$0xff] }
 0x327   :  { %4032 = vmatpush1.bf16.msra.mxu1 %v4031_v14  ;;  %v1781_v14 = vld [vmem:[#allocation17 + $0x1f0] sm:$0xff]  ;;  %v1822_v56 = vld [vmem:[#allocation17 + $0x338] sm:$0xff]  ;;  %v1823_v3 = vld [vmem:[#allocation17 + $0x340] sm:$0xff] }
 0x328   :  { %v4730_v26 = vpop.eup %4729  ;;  %4034 = vmatprep.subr.bf16.mxu1 %v4033_v25  ;;  %v1794_v25 = vld [vmem:[#allocation17 + $0x258] sm:$0xff]  ;;  %v4057_v62 = vpack.c.bf16 %v1822_v56, %v1816_v55  ;;  %v1828_v4 = vld [vmem:[#allocation17 + $0x368] sm:$0xff] }
 0x329   :  { %v4732_v27 = vpop.eup %4731  ;;  %v1538_v29 = vadd.f32 1.0, %v4730_v26  ;;  %v1746_v26 = vld [vmem:[#allocation17 + $0xd8] sm:$0xff] }
 0x32a   :  { %v1539_v31 = vadd.f32 1.0, %v4732_v27  ;;  %v1752_v27 = vld [vmem:[#allocation17 + $0x108] sm:$0xff]  ;;  %v1834_v5 = vld [vmem:[#allocation17 + $0x398] sm:$0xff] }
 0x32b   :  { %v5326_v37 = vmul.f32 %v1538_v29, %v1502_v28  ;;  %v1743_v28 = vld [vmem:[#allocation17 + $0xc0] sm:$0xff]  ;;  %v4225_v29 = vpack.c.bf16 %v1752_v27, %v1746_v26  ;;  %v1800_v26 = vld [vmem:[#allocation17 + $0x288] sm:$0xff]  ;;  %v4047_v27 = vpack.c.bf16 %v1785_v12, %v1779_v9  ;;  %v4251_v9 = vpack.c.bf16 %v1823_v3, %v1817_v1 }
 0x32c   :  { %v4734_v38 = vpop.eup %4733  ;;  %v5329_v39 = vmul.f32 %v1539_v31, %v1503_v30  ;;  %v1749_v30 = vld [vmem:[#allocation17 + $0xf0] sm:$0xff]  ;;  %v4061_v12 = vpack.c.bf16 %v1834_v5, %v1828_v4 }
 0x32d   :  { %v4736_v40 = vpop.eup %4735  ;;  %v1544_v42 = vadd.f32 1.0, %v4734_v38  ;;  %v1561_v43 = vadd.f32 %v1560_v34, %v5326_v37  ;;  %v1745_v31 = vld [vmem:[#allocation17 + $0xd0] sm:$0xff]  ;;  %v4035_v34 = vpack.c.bf16 %v1749_v30, %v1743_v28  ;;  %v1756_v38 = vld [vmem:[#allocation17 + $0x128] sm:$0xff]  ;;  %4226 = vmatprep.subr.bf16.mxu0 %v4225_v29  ;;  %v4239_v28 = vpack.c.bf16 %v1787_v20, %v1781_v14  ;;  %v1791_v30 = vld [vmem:[#allocation17 + $0x240] sm:$0xff] }
 0x32e   :  { %v1545_v45 = vadd.f32 1.0, %v4736_v40  ;;  %v1762_v40 = vld [vmem:[#allocation17 + $0x158] sm:$0xff]  ;;  %v4049_v29 = vpack.c.bf16 %v1798_v23, %v1792_v21  ;;  %v1827_v14 = vld [vmem:[#allocation17 + $0x360] sm:$0xff]  ;;  %v1829_v20 = vld [vmem:[#allocation17 + $0x370] sm:$0xff] }
 0x32f   :  { %v5332_v46 = vmul.f32 %v1544_v42, %v1508_v41  ;;  %v1562_v47 = vadd.f32 %v1561_v43, %v5329_v39  ;;  %v1758_v41 = vld [vmem:[#allocation17 + $0x138] sm:$0xff]  ;;  %v4227_v42 = vpack.c.bf16 %v1751_v32, %v1745_v31  ;;  %v4037_v43 = vpack.c.bf16 %v1762_v40, %v1756_v38  ;;  %4036 = vmatpush1.bf16.msra.mxu1 %v4035_v34  ;;  %v1797_v31 = vld [vmem:[#allocation17 + $0x270] sm:$0xff]  ;;  %v1799_v38 = vld [vmem:[#allocation17 + $0x280] sm:$0xff] }
 0x330   :  { %v5336_v49 = vmul.f32 %v1545_v45, %v1509_v44  ;;  %v1764_v44 = vld [vmem:[#allocation17 + $0x168] sm:$0xff]  ;;  %v1755_v45 = vld [vmem:[#allocation17 + $0x120] sm:$0xff]  ;;  %v1793_v32 = vld [vmem:[#allocation17 + $0x250] sm:$0xff]  ;;  %v4241_v34 = vpack.c.bf16 %v1800_v26, %v1794_v25 }
 0x331   :  { %1563 = vadd.xlane.f32.xlu0 %v1562_v47  ;;  %v1568_v50 = vadd.f32 %v1567_v48, %v5332_v46  ;;  %v1761_v47 = vld [vmem:[#allocation17 + $0x150] sm:$0xff]  ;;  %v4229_v48 = vpack.c.bf16 %v1764_v44, %v1758_v41  ;;  %4228 = vmatpush1.bf16.msra.mxu0 %v4227_v42  ;;  %v1804_v40 = vld [vmem:[#allocation17 + $0x2a8] sm:$0xff]  ;;  %v1810_v41 = vld [vmem:[#allocation17 + $0x2d8] sm:$0xff]  ;;  %v4051_v44 = vpack.c.bf16 %v1797_v31, %v1791_v30 }
 0x332   :  { %v4039_v57 = vpack.c.bf16 %v1761_v47, %v1755_v45  ;;  %4038 = vmatprep.subr.bf16.mxu1 %v4037_v43  ;;  %v1806_v42 = vld [vmem:[#allocation17 + $0x2b8] sm:$0xff]  ;;  %v1812_v43 = vld [vmem:[#allocation17 + $0x2e8] sm:$0xff]  ;;  %v4243_v45 = vpack.c.bf16 %v1799_v38, %v1793_v32  ;;  %v4053_v47 = vpack.c.bf16 %v1810_v41, %v1804_v40  ;;  %v1835_v23 = vld [vmem:[#allocation17 + $0x3a0] sm:$0xff] }
 0x333   :  { %v1569_v51 = vadd.f32 %v1568_v50, %v5336_v49  ;;  %v1757_v50 = vld [vmem:[#allocation17 + $0x130] sm:$0xff]  ;;  %4230 = vmatprep.subr.bf16.mxu0 %v4229_v48  ;;  %v1803_v48 = vld [vmem:[#allocation17 + $0x2a0] sm:$0xff]  ;;  %v4245_v52 = vpack.c.bf16 %v1812_v43, %v1806_v42  ;;  %v1840_v25 = vld [vmem:[#allocation17 + $0x3c8] sm:$0xff]  ;;  %v4255_v30 = vpack.c.bf16 %v1835_v23, %v1829_v20 }
 0x334   :  { %4040 = vmatpush1.bf16.msra.mxu1 %v4039_v57  ;;  %v1818_v57 = vld [vmem:[#allocation17 + $0x318] sm:$0xff]  ;;  %v1839_v32 = vld [vmem:[#allocation17 + $0x3c0] sm:$0xff]  ;;  %v1841_v40 = vld [vmem:[#allocation17 + $0x3d0] sm:$0xff] }
 0x335   :  { %1570 = vadd.xlane.f32.xlu0 %v1569_v51  ;;  %v1763_v51 = vld [vmem:[#allocation17 + $0x160] sm:$0xff]  ;;  %4042 = vmatprep.subr.bf16.mxu1 %v4041_v60  ;;  %v1846_v26 = vld [vmem:[#allocation17 + $0x3f8] sm:$0xff] }
 0x336   :  { %v4231_v59 = vpack.c.bf16 %v1763_v51, %v1757_v50  ;;  %v1809_v50 = vld [vmem:[#allocation17 + $0x2d0] sm:$0xff]  ;;  %v4065_v31 = vpack.c.bf16 %v1846_v26, %v1840_v25  ;;  %v1847_v41 = vld [vmem:[#allocation17 + $0x400] sm:$0xff] }
 0x337   :  { %v1805_v51 = vld [vmem:[#allocation17 + $0x2b0] sm:$0xff]  ;;  %v4055_v60 = vpack.c.bf16 %v1809_v50, %v1803_v48  ;;  %v4259_v43 = vpack.c.bf16 %v1847_v41, %v1841_v40  ;;  %v1851_v23 = vld [vmem:[#allocation17 + $0x420] sm:$0xff]  ;;  %v1872_v40 = vld [vmem:[#allocation17 + $0x4c8] sm:$0xff] }
 0x338   :  { %4232 = vmatpush1.bf16.msra.mxu0 %v4231_v59  ;;  %4044 = vmatpush1.bf16.msra.mxu1 %v4043_v6  ;;  %v1824_v59 = vld [vmem:[#allocation17 + $0x348] sm:$0xff]  ;;  %v4247_v61 = vpack.c.bf16 %v1811_v53, %v1805_v51  ;;  %v1830_v6 = vld [vmem:[#allocation17 + $0x378] sm:$0xff]  ;;  %v1857_v25 = vld [vmem:[#allocation17 + $0x450] sm:$0xff] }
 0x339   :  { %4234 = vmatprep.subr.bf16.mxu0 %v4233_v0  ;;  %4046 = vmatprep.subr.bf16.mxu1 %v4045_v8  ;;  %v1821_v0 = vld [vmem:[#allocation17 + $0x330] sm:$0xff]  ;;  %v4249_v2 = vpack.c.bf16 %v1824_v59, %v1818_v57  ;;  %v1863_v41 = vld [vmem:[#allocation17 + $0x480] sm:$0xff] }
 0x33a   :  { %v4059_v8 = vpack.c.bf16 %v1821_v0, %v1815_v63 }
 0x33c   :  { %4236 = vmatpush1.bf16.msra.mxu0 %v4235_v7  ;;  %4048 = vmatpush1.bf16.msra.mxu1 %v4047_v27  ;;  %v1836_v7 = vld [vmem:[#allocation17 + $0x3a8] sm:$0xff]  ;;  %v1842_v27 = vld [vmem:[#allocation17 + $0x3d8] sm:$0xff] }
 0x33d   :  { %4238 = vmatprep.subr.bf16.mxu0 %v4237_v15  ;;  %4050 = vmatprep.subr.bf16.mxu1 %v4049_v29  ;;  %v1833_v15 = vld [vmem:[#allocation17 + $0x390] sm:$0xff]  ;;  %v4253_v21 = vpack.c.bf16 %v1836_v7, %v1830_v6 }
 0x33e   :  { %v4063_v29 = vpack.c.bf16 %v1833_v15, %v1827_v14  ;;  %v1852_v14 = vld [vmem:[#allocation17 + $0x428] sm:$0xff]  ;;  %v1858_v15 = vld [vmem:[#allocation17 + $0x458] sm:$0xff] }
 0x33f   :  { %v4069_v20 = vpack.c.bf16 %v1858_v15, %v1852_v14  ;;  %v1895_v14 = vld [vmem:[#allocation17 + $0x580] sm:$0xff]  ;;  %v1900_v15 = vld [vmem:[#allocation17 + $0x5a8] sm:$0xff] }
 0x340   :  { %4240 = vmatpush1.bf16.msra.mxu0 %v4239_v28  ;;  %4052 = vmatpush1.bf16.msra.mxu1 %v4051_v44  ;;  %v1848_v28 = vld [vmem:[#allocation17 + $0x408] sm:$0xff] }
 0x341   :  { %4242 = vmatprep.subr.bf16.mxu0 %v4241_v34  ;;  %4054 = vmatprep.subr.bf16.mxu1 %v4053_v47  ;;  %v1845_v34 = vld [vmem:[#allocation17 + $0x3f0] sm:$0xff]  ;;  %v4257_v38 = vpack.c.bf16 %v1848_v28, %v1842_v27  ;;  %v4071_v27 = vpack.c.bf16 %v1857_v25, %v1851_v23  ;;  %v1902_v23 = vld [vmem:[#allocation17 + $0x5b8] sm:$0xff]  ;;  %v1908_v25 = vld [vmem:[#allocation17 + $0x5e8] sm:$0xff] }
 0x342   :  { %v4067_v42 = vpack.c.bf16 %v1845_v34, %v1839_v32  ;;  %v1853_v28 = vld [vmem:[#allocation17 + $0x430] sm:$0xff]  ;;  %v1870_v32 = vld [vmem:[#allocation17 + $0x4b8] sm:$0xff] }
 0x343   :  { %v1866_v34 = vld [vmem:[#allocation17 + $0x498] sm:$0xff] }
 0x344   :  { %4244 = vmatpush1.bf16.msra.mxu0 %v4243_v45  ;;  %4056 = vmatpush1.bf16.msra.mxu1 %v4055_v60 }
 0x345   :  { %4246 = vmatprep.subr.bf16.mxu0 %v4245_v52  ;;  %4058 = vmatprep.subr.bf16.mxu1 %v4057_v62 }
 0x348   :  { %4248 = vmatpush1.bf16.msra.mxu0 %v4247_v61  ;;  %4060 = vmatpush1.bf16.msra.mxu1 %v4059_v8 }
 0x349   :  { %4250 = vmatprep.subr.bf16.mxu0 %v4249_v2  ;;  %4062 = vmatprep.subr.bf16.mxu1 %v4061_v12 }
 0x34c   :  { %4252 = vmatpush1.bf16.msra.mxu0 %v4251_v9  ;;  %4064 = vmatpush1.bf16.msra.mxu1 %v4063_v29  ;;  %v1859_v29 = vld [vmem:[#allocation17 + $0x460] sm:$0xff] }
 0x34d   :  { %4254 = vmatprep.subr.bf16.mxu0 %v4253_v21  ;;  %4066 = vmatprep.subr.bf16.mxu1 %v4065_v31  ;;  %v1860_v21 = vld [vmem:[#allocation17 + $0x468] sm:$0xff] }
 0x34e   :  { %v1864_v31 = vld [vmem:[#allocation17 + $0x488] sm:$0xff] }
 0x350   :  { %4256 = vmatpush1.bf16.msra.mxu0 %v4255_v30  ;;  %4068 = vmatpush1.bf16.msra.mxu1 %v4067_v42  ;;  %v4263_v30 = vpack.c.bf16 %v1859_v29, %v1853_v28  ;;  %v1869_v42 = vld [vmem:[#allocation17 + $0x4b0] sm:$0xff] }
 0x351   :  { %4258 = vmatprep.subr.bf16.mxu0 %v4257_v38  ;;  %4070 = vmatprep.subr.bf16.mxu1 %v4069_v20  ;;  %v4073_v38 = vpack.c.bf16 %v1870_v32, %v1864_v31  ;;  %v1905_v28 = vld [vmem:[#allocation17 + $0x5d0] sm:$0xff] }
 0x352   :  { %v1901_v29 = vld [vmem:[#allocation17 + $0x5b0] sm:$0xff] }
 0x354   :  { %4260 = vmatpush1.bf16.msra.mxu0 %v4259_v43  ;;  %4072 = vmatpush1.bf16.msra.mxu1 %v4071_v27  ;;  %v4265_v43 = vpack.c.bf16 %v1872_v40, %v1866_v34  ;;  %v4277_v27 = vpack.c.bf16 %v1908_v25, %v1902_v23  ;;  %v1912_v34 = vld [vmem:[#allocation17 + $0x608] sm:$0xff]  ;;  %v1914_v40 = vld [vmem:[#allocation17 + $0x618] sm:$0xff] }
 0x355   :  { %4074 = vmatprep.subr.bf16.mxu1 %v4073_v38  ;;  %v1918_v38 = vld [vmem:[#allocation17 + $0x638] sm:$0xff] }
 0x3be   :  { %v1564_v44 = vpop.xlane.xlu0 %1563 }
 0x3bf   :  { %v1573_v45 = vmul.f32 0.0013020834, %v1564_v44  ;;  %v4075_v44 = vpack.c.bf16 %v1869_v42, %v1863_v41  ;;  %v4089_v41 = vpack.c.bf16 %v1918_v38, %v1912_v34  ;;  %v1920_v42 = vld [vmem:[#allocation17 + $0x648] sm:$0xff] }
 0x3c1   :  { %v5341_v47 = vsub.f32 %v5304_v54, %v1573_v45  ;;  %v5344_v48 = vsub.f32 %v5306_v58, %v1573_v45  ;;  %v5347_v50 = vsub.f32 %v5310_v10, %v1573_v45  ;;  %v5350_v52 = vsub.f32 %v5316_v17, %v1573_v45  ;;  %4076 = vmatpush1.bf16.msra.mxu1 %v4075_v44 }
 0x3c2   :  { %v1571_v51 = vpop.xlane.xlu0 %1570  ;;  %v5357_v54 = vsub.f32 %v5326_v37, %v1573_v45  ;;  %v5371_v60 = vsub.f32 %v5329_v39, %v1573_v45  ;;  %v1865_v45 = vld [vmem:[#allocation17 + $0x490] sm:$0xff] }
 0x3c3   :  { %v1574_v53 = vmul.f32 0.0013020834, %v1571_v51  ;;  %v1587_v55 = vmul.f32 %v5341_v47, %v5341_v47  ;;  %v1588_v56 = vmul.f32 %v5344_v48, %v5344_v48  ;;  %v1589_v58 = vmul.f32 %v5347_v50, %v5347_v50  ;;  %v1871_v51 = vld [vmem:[#allocation17 + $0x4c0] sm:$0xff] }
 0x3c4   :  { %v1590_v37 = vmul.f32 %v5350_v52, %v5350_v52 }
 0x3c5   :  { %v1599_v57 = vadd.f32 %v1588_v56, %v1587_v55  ;;  %v5362_v10 = vsub.f32 %v5312_v16, %v1574_v53  ;;  %v5365_v17 = vsub.f32 %v5314_v24, %v1574_v53  ;;  %v5368_v59 = vsub.f32 %v5320_v22, %v1574_v53  ;;  %v1876_v55 = vld [vmem:[#allocation17 + $0x4e8] sm:$0xff]  ;;  %v1882_v56 = vld [vmem:[#allocation17 + $0x518] sm:$0xff] }
 0x3c6   :  { %v5376_v62 = vsub.f32 %v5324_v33, %v1574_v53  ;;  %v1591_v22 = vmul.f32 %v5357_v54, %v5357_v54  ;;  %v5385_v39 = vsub.f32 %v5332_v46, %v1574_v53  ;;  %v1592_v33 = vmul.f32 %v5371_v60, %v5371_v60 }
 0x3c7   :  { %v1600_v61 = vadd.f32 %v1599_v57, %v1589_v58  ;;  %v1593_v16 = vmul.f32 %v5362_v10, %v5362_v10  ;;  %v1594_v24 = vmul.f32 %v5365_v17, %v5365_v17  ;;  %v1595_v0 = vmul.f32 %v5368_v59, %v5368_v59  ;;  %v1878_v58 = vld [vmem:[#allocation17 + $0x4f8] sm:$0xff] }
 0x3c8   :  { %v5392_v3 = vsub.f32 %v5336_v49, %v1574_v53  ;;  %v1596_v4 = vmul.f32 %v5376_v62, %v5376_v62  ;;  %v1597_v46 = vmul.f32 %v5385_v39, %v5385_v39  ;;  %v1854_v49 = vld [vmem:[#allocation17 + $0x438] sm:$0xff]  ;;  %v4267_v53 = vpack.c.bf16 %v1871_v51, %v1865_v45 }
 0x3c9   :  { %v1601_v63 = vadd.f32 %v1600_v61, %v1590_v37  ;;  %v1606_v1 = vadd.f32 %v1594_v24, %v1593_v16  ;;  %v4261_v26 = vpack.c.bf16 %v1860_v21, %v1854_v49  ;;  %v4077_v57 = vpack.c.bf16 %v1882_v56, %v1876_v55  ;;  %v1884_v37 = vld [vmem:[#allocation17 + $0x528] sm:$0xff]  ;;  %v1875_v61 = vld [vmem:[#allocation17 + $0x4e0] sm:$0xff]  ;;  %v1881_v16 = vld [vmem:[#allocation17 + $0x510] sm:$0xff] }
 0x3ca   :  { %v1598_v8 = vmul.f32 %v5392_v3, %v5392_v3  ;;  %v4269_v24 = vpack.c.bf16 %v1884_v37, %v1878_v58  ;;  %v1906_v49 = vld [vmem:[#allocation17 + $0x5d8] sm:$0xff] }
 0x3cb   :  { %v1602_v2 = vadd.f32 %v1601_v63, %v1591_v22  ;;  %v1607_v5 = vadd.f32 %v1606_v1, %v1595_v0  ;;  %4262 = vmatprep.subr.bf16.mxu0 %v4261_v26  ;;  %v4079_v22 = vpack.c.bf16 %v1881_v16, %v1875_v61  ;;  %v1877_v63 = vld [vmem:[#allocation17 + $0x4f0] sm:$0xff]  ;;  %v1883_v0 = vld [vmem:[#allocation17 + $0x520] sm:$0xff]  ;;  %v1888_v1 = vld [vmem:[#allocation17 + $0x548] sm:$0xff]  ;;  %4078 = vmatprep.subr.bf16.mxu1 %v4077_v57 }
 0x3cc   :  { %4264 = vmatpush1.bf16.msra.mxu0 %v4263_v30  ;;  %v4085_v21 = vpack.c.bf16 %v1906_v49, %v1900_v15  ;;  %v1899_v26 = vld [vmem:[#allocation17 + $0x5a0] sm:$0xff]  ;;  %v1631_v58 = vld [vmem:[#allocation14] sm:$0x3f]  ;;  %v1675_v57 = vld [vmem:[#allocation16] sm:$0x3f] }
 0x3cd   :  { %v1603_v6 = vadd.f32 %v1602_v2, %v1592_v33  ;;  %v1608_v7 = vadd.f32 %v1607_v5, %v1596_v4  ;;  %4266 = vmatprep.subr.bf16.mxu0 %v4265_v43  ;;  %v4271_v33 = vpack.c.bf16 %v1883_v0, %v1877_v63  ;;  %v1894_v2 = vld [vmem:[#allocation17 + $0x578] sm:$0xff]  ;;  %v1896_v5 = vld [vmem:[#allocation17 + $0x588] sm:$0xff]  ;;  %4080 = vmatpush1.bf16.msra.mxu1 %v4079_v22  ;;  %v1907_v30 = vld [vmem:[#allocation17 + $0x5e0] sm:$0xff] }
 0x3ce   :  { %v1890_v4 = vld [vmem:[#allocation17 + $0x558] sm:$0xff]  ;;  %v4087_v31 = vpack.c.bf16 %v1905_v28, %v1899_v26  ;;  %v4279_v32 = vpack.c.bf16 %v1907_v30, %v1901_v29  ;;  %v4281_v43 = vpack.c.bf16 %v1920_v42, %v1914_v40  ;;  %v1640_v37 = vrot.slane %v1631_v58, %v5288_v13  ;;  %v1911_v61 = vld [vmem:[#allocation17 + $0x600] sm:$0xff]  ;;  %v1913_v22 = vld [vmem:[#allocation17 + $0x610] sm:$0xff] }
 0x3cf   :  { %1604 = vadd.xlane.f32.xlu1 %v1603_v6  ;;  %v1609_v9 = vadd.f32 %v1608_v7, %v1597_v46  ;;  %v4081_v6 = vpack.c.bf16 %v1894_v2, %v1888_v1  ;;  %v4273_v46 = vpack.c.bf16 %v1896_v5, %v1890_v4  ;;  %v1887_v7 = vld [vmem:[#allocation17 + $0x540] sm:$0xff]  ;;  %v1636_v16 = vrot.slane %v1631_v58, %v5286_v11  ;;  %v1932_v28 = vld [vmem:[#allocation17 + $0x6a8] sm:$0xff]  ;;  %v1929_v29 = vld [vmem:[#allocation17 + $0x690] sm:$0xff] }
 0x3d0   :  { %4268 = vmatpush1.bf16.msra.mxu0 %v4267_v53  ;;  %v1919_v63 = vld [vmem:[#allocation17 + $0x640] sm:$0xff]  ;;  %v5403_v0 = vrot.slane %v1631_v58, %v5295_v19  ;;  %v1644_v1 = vrot.slane %v1631_v58, %v5291_v18  ;;  %v1684_v4 = vrot.slane %v1675_v57, %v5288_v13  ;;  %v1680_v5 = vrot.slane %v1675_v57, %v5286_v11 }
 0x3d1   :  { %v1610_v12 = vadd.f32 %v1609_v9, %v1598_v8  ;;  %4270 = vmatprep.subr.bf16.mxu0 %v4269_v24  ;;  %v1893_v8 = vld [vmem:[#allocation17 + $0x570] sm:$0xff]  ;;  %4082 = vmatprep.subr.bf16.mxu1 %v4081_v6  ;;  %v5412_v6 = vrot.slane %v1675_v57, %v5295_v19  ;;  %v1688_v15 = vrot.slane %v1675_v57, %v5291_v18 }
 0x3d2   :  { %v1889_v9 = vld [vmem:[#allocation17 + $0x550] sm:$0xff]  ;;  %v5423_v25 = vrot.slane %v1675_v57, %v5300_v36  ;;  %v5426_v30 = vrot.slane %v1675_v57, %v5298_v35 }
 0x3d3   :  { %1611 = vadd.xlane.f32.xlu1 %v1610_v12  ;;  %v4083_v12 = vpack.c.bf16 %v1893_v8, %v1887_v7  ;;  %v4275_v20 = vpack.c.bf16 %v1895_v14, %v1889_v9  ;;  %v1917_v24 = vld [vmem:[#allocation17 + $0x630] sm:$0xff]  ;;  %v1924_v9 = vld [vmem:[#allocation17 + $0x668] sm:$0xff] }
 0x3d4   :  { %4272 = vmatpush1.bf16.msra.mxu0 %v4271_v33  ;;  %v5407_v33 = vrot.slane %v1631_v58, %v5300_v36  ;;  %v4091_v49 = vpack.c.bf16 %v1917_v24, %v1911_v61  ;;  %v1938_v61 = vld [vmem:[#allocation17 + $0x6d8] sm:$0xff] }
 0x3d5   :  { %4274 = vmatprep.subr.bf16.mxu0 %v4273_v46  ;;  %4084 = vmatpush1.bf16.msra.mxu1 %v4083_v12  ;;  %v5415_v46 = vrot.slane %v1631_v58, %v5298_v35  ;;  %v1930_v12 = vld [vmem:[#allocation17 + $0x698] sm:$0xff] }
 0x3d6   :  { %4086 = vmatprep.subr.bf16.mxu1 %v4085_v21  ;;  %v1926_v21 = vld [vmem:[#allocation17 + $0x678] sm:$0xff] }
 0x3d8   :  { %4276 = vmatpush1.bf16.msra.mxu0 %v4275_v20  ;;  %v4283_v20 = vpack.c.bf16 %v1919_v63, %v1913_v22  ;;  %v1941_v63 = vld [vmem:[#allocation17 + $0x6f0] sm:$0xff] }
 0x3d9   :  { %4278 = vmatprep.subr.bf16.mxu0 %v4277_v27  ;;  %4088 = vmatpush1.bf16.msra.mxu1 %v4087_v31  ;;  %v4093_v31 = vpack.c.bf16 %v1930_v12, %v1924_v9  ;;  %v1943_v9 = vld [vmem:[#allocation17 + $0x700] sm:$0xff]  ;;  %v1948_v12 = vld [vmem:[#allocation17 + $0x728] sm:$0xff] }
 0x3da   :  { %4090 = vmatprep.subr.bf16.mxu1 %v4089_v41 }
 0x3dc   :  { %4280 = vmatpush1.bf16.msra.mxu0 %v4279_v32 }
 0x3dd   :  { %4282 = vmatprep.subr.bf16.mxu0 %v4281_v43  ;;  %v1925_v43 = vld [vmem:[#allocation17 + $0x670] sm:$0xff] }
 0x45c   :  { %v1605_v44 = vpop.xlane.xlu1 %1604 }
 0x45d   :  { %v1613_v45 = vmul.f32 0.0013020834, %v1605_v44  ;;  %v1931_v44 = vld [vmem:[#allocation17 + $0x6a0] sm:$0xff] }
 0x45f   :  { %v1615_v51 = vadd.f32 1e-12, %v1613_v45  ;;  %v4285_v45 = vpack.c.bf16 %v1932_v28, %v1926_v21  ;;  %v1947_v28 = vld [vmem:[#allocation17 + $0x720] sm:$0xff] }
 0x460   :  { %v1612_v53 = vpop.xlane.xlu1 %1611 }
 0x461   :  { %4737 = vrsqrt.f32 %v1615_v51  ;;  %v1614_v55 = vmul.f32 0.0013020834, %v1612_v53 }
 0x463   :  { %v1616_v56 = vadd.f32 1e-12, %v1614_v55 }
 0x465   :  { %4739 = vrsqrt.f32 %v1616_v56  ;;  %v1936_v56 = vld [vmem:[#allocation17 + $0x6c8] sm:$0xff] }
 0x46b   :  { %v4738_v2 = vpop.eup %4737 }
 0x46c   :  { %v1620_v7 = vmul.f32 %v4738_v2, %v5344_v48  ;;  %v1619_v8 = vmul.f32 %v4738_v2, %v5341_v47  ;;  %v1621_v14 = vmul.f32 %v4738_v2, %v5347_v50  ;;  %v1624_v23 = vmul.f32 %v4738_v2, %v5371_v60  ;;  %v1923_v48 = vld [vmem:[#allocation17 + $0x660] sm:$0xff] }
 0x46d   :  { %v1622_v32 = vmul.f32 %v4738_v2, %v5350_v52  ;;  %v1623_v60 = vmul.f32 %v4738_v2, %v5357_v54  ;;  %v4095_v51 = vpack.c.bf16 %v1929_v29, %v1923_v48  ;;  %v1953_v48 = vld [vmem:[#allocation17 + $0x750] sm:$0xff] }
 0x46e   :  { %v1664_v26 = vmul.f32 %v1640_v37, %v1620_v7  ;;  %v1663_v27 = vmul.f32 %v1636_v16, %v1619_v8  ;;  %v1665_v47 = vmul.f32 %v1644_v1, %v1621_v14  ;;  %v1668_v34 = vmul.f32 %v5407_v33, %v1624_v23  ;;  %v1937_v8 = vld [vmem:[#allocation17 + $0x6d0] sm:$0xff] }
 0x46f   :  { %v5428_v50 = vpop.eup %4739  ;;  %v1666_v57 = vmul.f32 %v5403_v0, %v1622_v32  ;;  %v1667_v2 = vmul.f32 %v5415_v46, %v1623_v60  ;;  %v1955_v32 = vld [vmem:[#allocation17 + $0x760] sm:$0xff] }
 0x470   :  { %v5433_v38 = vadd.f32 %v1684_v4, %v1664_v26  ;;  %v5435_v40 = vadd.f32 %v1680_v5, %v1663_v27  ;;  %v1626_v41 = vmul.f32 %v5428_v50, %v5365_v17  ;;  %v1625_v42 = vmul.f32 %v5428_v50, %v5362_v10  ;;  %v1942_v17 = vld [vmem:[#allocation17 + $0x6f8] sm:$0xff] }
 0x471   :  { %v5441_v53 = vadd.f32 %v1688_v15, %v1665_v47  ;;  %v1627_v52 = vmul.f32 %v5428_v50, %v5368_v59  ;;  %v5448_v58 = vadd.f32 %v5423_v25, %v1668_v34  ;;  %v4287_v10 = vpack.c.bf16 %v1931_v44, %v1925_v43  ;;  %v1944_v59 = vld [vmem:[#allocation17 + $0x708] sm:$0xff] }
 0x472   :  { %2391 = vmatprep.mubr.f32.mxu1 %v5433_v38  ;;  %2622 = vmatprep.mubr.f32.mxu0 %v5433_v38  ;;  %v1670_v54 = vmul.f32 %v1640_v37, %v1626_v41  ;;  %v1669_v55 = vmul.f32 %v1636_v16, %v1625_v42  ;;  %v1935_v16 = vld [vmem:[#allocation17 + $0x6c0] sm:$0xff]  ;;  %v4097_v7 = vpack.c.bf16 %v1942_v17, %v1936_v56  ;;  %v1960_v34 = vld [vmem:[#allocation17 + $0x788] sm:$0xff]  ;;  %v1962_v41 = vld [vmem:[#allocation17 + $0x798] sm:$0xff] }
 0x473   :  { %2392 = vmatmul.mubr.f32.vlgmr.msra.gmra.mrb[4].mxu1 %v5435_v40  ;;  %2623 = vmatmul.mubr.f32.vlgmr.msra.gmra.mrb[8].mxu0 %v5435_v40  ;;  %v1671_v24 = vmul.f32 %v1644_v1, %v1627_v52  ;;  %v4289_v1 = vpack.c.bf16 %v1944_v59, %v1938_v61  ;;  %v1630_v21 = vmul.f32 %v5428_v50, %v5392_v3  ;;  %v1968_v42 = vld [vmem:[#allocation17 + $0x7c8] sm:$0xff]  ;;  %v1965_v52 = vld [vmem:[#allocation17 + $0x7b0] sm:$0xff]  ;;  %v1967_v56 = vld [vmem:[#allocation17 + $0x7c0] sm:$0xff] }
 0x474   :  { %4092 = vmatpush1.bf16.msra.mxu1 %v4091_v49  ;;  %4284 = vmatpush1.bf16.msra.mxu0 %v4283_v20  ;;  %v5453_v22 = vadd.f32 %v1684_v4, %v1670_v54  ;;  %v5455_v37 = vadd.f32 %v1680_v5, %v1669_v55  ;;  %v1954_v4 = vld [vmem:[#allocation17 + $0x758] sm:$0xff]  ;;  %v1956_v49 = vld [vmem:[#allocation17 + $0x768] sm:$0xff]  ;;  %v5463_v20 = vadd.f32 %v5426_v30, %v1667_v2  ;;  %v1961_v55 = vld [vmem:[#allocation17 + $0x790] sm:$0xff] }
 0x475   :  { %4094 = vmatprep.subr.bf16.mxu1 %v4093_v31  ;;  %4286 = vmatprep.subr.bf16.mxu0 %v4285_v45  ;;  %v5458_v14 = vadd.f32 %v1688_v15, %v1671_v24  ;;  %v1950_v5 = vld [vmem:[#allocation17 + $0x738] sm:$0xff]  ;;  %v5470_v15 = vadd.f32 %v5412_v6, %v1666_v57  ;;  %v1629_v23 = vmul.f32 %v5428_v50, %v5385_v39  ;;  %v1949_v31 = vld [vmem:[#allocation17 + $0x730] sm:$0xff]  ;;  %v1972_v17 = vld [vmem:[#allocation17 + $0x7e8] sm:$0xff] }
 0x476   :  { %2397 = vmatprep.mubr.f32.mxu1 %v5453_v22  ;;  %2628 = vmatprep.mubr.f32.mxu0 %v5453_v22  ;;  %v4099_v26 = vpack.c.bf16 %v1941_v63, %v1935_v16  ;;  %v4291_v27 = vpack.c.bf16 %v1943_v9, %v1937_v8  ;;  %v1674_v29 = vmul.f32 %v5407_v33, %v1630_v21  ;;  %v1966_v39 = vld [vmem:[#allocation17 + $0x7b8] sm:$0xff]  ;;  %v1971_v59 = vld [vmem:[#allocation17 + $0x7e0] sm:$0xff]  ;;  %v1977_v24 = vld [vmem:[#allocation17 + $0x810] sm:$0xff] }
 0x477   :  { %2398 = vmatmul.mubr.f32.gmra.mrb[6].mxu1 %v5455_v37  ;;  %2629 = vmatmul.mubr.f32.gmra.mrb[10].mxu0 %v5455_v37  ;;  %v4101_v3 = vpack.c.bf16 %v1954_v4, %v1948_v12  ;;  %v4293_v47 = vpack.c.bf16 %v1956_v49, %v1950_v5  ;;  %v1673_v60 = vmul.f32 %v5415_v46, %v1629_v23  ;;  %v1974_v57 = vld [vmem:[#allocation17 + $0x7f8] sm:$0xff]  ;;  %v1973_v2 = vld [vmem:[#allocation17 + $0x7f0] sm:$0xff]  ;;  %v1984_v8 = vld [vmem:[#allocation17 + $0x848] sm:$0xff] }
 0x478   :  { %4096 = vmatpush1.bf16.msra.mxu1 %v4095_v51  ;;  %4288 = vmatpush1.bf16.msra.mxu0 %v4287_v10  ;;  %v5479_v43 = vadd.f32 %v5423_v25, %v1674_v29  ;;  %v4103_v44 = vpack.c.bf16 %v1953_v48, %v1947_v28  ;;  %v4295_v45 = vpack.c.bf16 %v1955_v32, %v1949_v31  ;;  %v1959_v51 = vld [vmem:[#allocation17 + $0x780] sm:$0xff]  ;;  %v1978_v10 = vld [vmem:[#allocation17 + $0x818] sm:$0xff]  ;;  %v1980_v25 = vld [vmem:[#allocation17 + $0x828] sm:$0xff] }
 0x479   :  { %2468 = vmatprep.mubr.f32.mxu1 %v5470_v15  ;;  %2699 = vmatprep.mubr.f32.mxu0 %v5470_v15  ;;  %v5482_v33 = vadd.f32 %v5426_v30, %v1673_v60  ;;  %v4105_v46 = vpack.c.bf16 %v1966_v39, %v1960_v34  ;;  %v4297_v54 = vpack.c.bf16 %v1968_v42, %v1962_v41  ;;  %v1990_v9 = vld [vmem:[#allocation17 + $0x878] sm:$0xff]  ;;  %v1983_v49 = vld [vmem:[#allocation17 + $0x840] sm:$0xff]  ;;  %v1989_v21 = vld [vmem:[#allocation17 + $0x870] sm:$0xff] }
 0x47a   :  { %4098 = vmatprep.subr.bf16.mxu1 %v4097_v7  ;;  %4290 = vmatprep.subr.bf16.mxu0 %v4289_v1  ;;  %v4107_v30 = vpack.c.bf16 %v1965_v52, %v1959_v51  ;;  %v4299_v61 = vpack.c.bf16 %v1967_v56, %v1961_v55  ;;  %v4109_v16 = vpack.c.bf16 %v1978_v10, %v1972_v17  ;;  %v1979_v7 = vld [vmem:[#allocation17 + $0x820] sm:$0xff]  ;;  %v1986_v12 = vld [vmem:[#allocation17 + $0x858] sm:$0xff]  ;;  %v1992_v1 = vld [vmem:[#allocation17 + $0x888] sm:$0xff] }
 0x47b   :  { %v4301_v63 = vpack.c.bf16 %v1980_v25, %v1974_v57  ;;  %v4111_v4 = vpack.c.bf16 %v1977_v24, %v1971_v59  ;;  %v4303_v5 = vpack.c.bf16 %v1979_v7, %v1973_v2  ;;  %v4113_v23 = vpack.c.bf16 %v1990_v9, %v1984_v8  ;;  %v1991_v28 = vld [vmem:[#allocation17 + $0x880] sm:$0xff]  ;;  %v1996_v48 = vld [vmem:[#allocation17 + $0x8a8] sm:$0xff]  ;;  %v2002_v29 = vld [vmem:[#allocation17 + $0x8d8] sm:$0xff] }
 0x47c   :  { %4100 = vmatpush1.bf16.msra.mxu1 %v4099_v26  ;;  %4292 = vmatpush1.bf16.msra.mxu0 %v4291_v27  ;;  %v4305_v26 = vpack.c.bf16 %v1992_v1, %v1986_v12  ;;  %v1985_v27 = vld [vmem:[#allocation17 + $0x850] sm:$0xff]  ;;  %v4115_v31 = vpack.c.bf16 %v1989_v21, %v1983_v49  ;;  %v1995_v34 = vld [vmem:[#allocation17 + $0x8a0] sm:$0xff]  ;;  %v4117_v39 = vpack.c.bf16 %v2002_v29, %v1996_v48  ;;  %v2014_v51 = vld [vmem:[#allocation17 + $0x938] sm:$0xff] }
 0x47d   :  { %4102 = vmatprep.subr.bf16.mxu1 %v4101_v3  ;;  %4294 = vmatprep.subr.bf16.mxu0 %v4293_v47  ;;  %v1998_v3 = vld [vmem:[#allocation17 + $0x8b8] sm:$0xff]  ;;  %v2004_v47 = vld [vmem:[#allocation17 + $0x8e8] sm:$0xff]  ;;  %v4307_v32 = vpack.c.bf16 %v1991_v28, %v1985_v27  ;;  %v2001_v60 = vld [vmem:[#allocation17 + $0x8d0] sm:$0xff] }
 0x47e   :  { %v4309_v41 = vpack.c.bf16 %v2004_v47, %v1998_v3  ;;  %v1997_v42 = vld [vmem:[#allocation17 + $0x8b0] sm:$0xff]  ;;  %v2010_v52 = vld [vmem:[#allocation17 + $0x918] sm:$0xff]  ;;  %v2007_v56 = vld [vmem:[#allocation17 + $0x900] sm:$0xff] }
 0x47f   :  { %v2013_v17 = vld [vmem:[#allocation17 + $0x930] sm:$0xff]  ;;  %v2026_v59 = vld [vmem:[#allocation17 + $0x998] sm:$0xff]  ;;  %v2019_v7 = vld [vmem:[#allocation17 + $0x960] sm:$0xff] }
 0x480   :  { %4104 = vmatpush1.bf16.msra.mxu1 %v4103_v44  ;;  %4296 = vmatpush1.bf16.msra.mxu0 %v4295_v45  ;;  %v2003_v44 = vld [vmem:[#allocation17 + $0x8e0] sm:$0xff]  ;;  %v2008_v45 = vld [vmem:[#allocation17 + $0x908] sm:$0xff]  ;;  %v2009_v25 = vld [vmem:[#allocation17 + $0x910] sm:$0xff] }
 0x481   :  { %4106 = vmatprep.subr.bf16.mxu1 %v4105_v46  ;;  %4298 = vmatprep.subr.bf16.mxu0 %v4297_v54  ;;  %v2016_v46 = vld [vmem:[#allocation17 + $0x948] sm:$0xff]  ;;  %v4119_v54 = vpack.c.bf16 %v2001_v60, %v1995_v34  ;;  %v4311_v55 = vpack.c.bf16 %v2003_v44, %v1997_v42  ;;  %v4121_v10 = vpack.c.bf16 %v2014_v51, %v2008_v45  ;;  %v2022_v24 = vld [vmem:[#allocation17 + $0x978] sm:$0xff]  ;;  %v2025_v8 = vld [vmem:[#allocation17 + $0x990] sm:$0xff] }
 0x482   :  { %v4313_v57 = vpack.c.bf16 %v2016_v46, %v2010_v52  ;;  %v2021_v1 = vld [vmem:[#allocation17 + $0x970] sm:$0xff]  ;;  %v2038_v49 = vld [vmem:[#allocation17 + $0x9f8] sm:$0xff]  ;;  %v2031_v28 = vld [vmem:[#allocation17 + $0x9c0] sm:$0xff] }
 0x483   :  { %v2034_v21 = vld [vmem:[#allocation17 + $0x9d8] sm:$0xff]  ;;  %v2037_v48 = vld [vmem:[#allocation17 + $0x9f0] sm:$0xff]  ;;  %v2043_v44 = vld [vmem:[#allocation17 + $0xa20] sm:$0xff] }
 0x484   :  { %4108 = vmatpush1.bf16.msra.mxu1 %v4107_v30  ;;  %4300 = vmatpush1.bf16.msra.mxu0 %v4299_v61  ;;  %v2015_v30 = vld [vmem:[#allocation17 + $0x940] sm:$0xff]  ;;  %v2020_v61 = vld [vmem:[#allocation17 + $0x968] sm:$0xff]  ;;  %v2033_v47 = vld [vmem:[#allocation17 + $0x9d0] sm:$0xff] }
 0x485   :  { %4110 = vmatprep.subr.bf16.mxu1 %v4109_v16  ;;  %4302 = vmatprep.subr.bf16.mxu0 %v4301_v63  ;;  %v2028_v16 = vld [vmem:[#allocation17 + $0x9a8] sm:$0xff]  ;;  %v4123_v63 = vpack.c.bf16 %v2013_v17, %v2007_v56  ;;  %v4315_v2 = vpack.c.bf16 %v2015_v30, %v2009_v25  ;;  %v4125_v9 = vpack.c.bf16 %v2026_v59, %v2020_v61  ;;  %v2050_v34 = vld [vmem:[#allocation17 + $0xa58] sm:$0xff]  ;;  %v2049_v45 = vld [vmem:[#allocation17 + $0xa50] sm:$0xff] }
 0x486   :  { %v4317_v12 = vpack.c.bf16 %v2028_v16, %v2022_v24  ;;  %v2046_v60 = vld [vmem:[#allocation17 + $0xa38] sm:$0xff]  ;;  %v2045_v46 = vld [vmem:[#allocation17 + $0xa30] sm:$0xff]  ;;  %v2055_v30 = vld [vmem:[#allocation17 + $0xa80] sm:$0xff] }
 0x487   :  { %v2062_v56 = vld [vmem:[#allocation17 + $0xab8] sm:$0xff]  ;;  %v2061_v61 = vld [vmem:[#allocation17 + $0xab0] sm:$0xff] }
 0x488   :  { %4112 = vmatpush1.bf16.msra.mxu1 %v4111_v4  ;;  %4304 = vmatpush1.bf16.msra.mxu0 %v4303_v5  ;;  %v2027_v4 = vld [vmem:[#allocation17 + $0x9a0] sm:$0xff]  ;;  %v2032_v5 = vld [vmem:[#allocation17 + $0x9c8] sm:$0xff]  ;;  %v2058_v17 = vld [vmem:[#allocation17 + $0xa98] sm:$0xff] }
 0x489   :  { %4114 = vmatprep.subr.bf16.mxu1 %v4113_v23  ;;  %4306 = vmatprep.subr.bf16.mxu0 %v4305_v26  ;;  %v2040_v23 = vld [vmem:[#allocation17 + $0xa08] sm:$0xff]  ;;  %v4127_v26 = vpack.c.bf16 %v2025_v8, %v2019_v7  ;;  %v4319_v27 = vpack.c.bf16 %v2027_v4, %v2021_v1  ;;  %v4129_v29 = vpack.c.bf16 %v2038_v49, %v2032_v5  ;;  %v2057_v16 = vld [vmem:[#allocation17 + $0xa90] sm:$0xff]  ;;  %v2074_v7 = vld [vmem:[#allocation17 + $0xb18] sm:$0xff] }
 0x48a   :  { %v4321_v3 = vpack.c.bf16 %v2040_v23, %v2034_v21  ;;  %v2070_v8 = vld [vmem:[#allocation17 + $0xaf8] sm:$0xff]  ;;  %v2067_v4 = vld [vmem:[#allocation17 + $0xae0] sm:$0xff]  ;;  %v2073_v5 = vld [vmem:[#allocation17 + $0xb10] sm:$0xff] }
 0x48b   :  { %v2069_v23 = vld [vmem:[#allocation17 + $0xaf0] sm:$0xff] }
 0x48c   :  { %4116 = vmatpush1.bf16.msra.mxu1 %v4115_v31  ;;  %4308 = vmatpush1.bf16.msra.mxu0 %v4307_v32  ;;  %v2039_v31 = vld [vmem:[#allocation17 + $0xa00] sm:$0xff]  ;;  %v2044_v32 = vld [vmem:[#allocation17 + $0xa28] sm:$0xff] }
 0x48d   :  { %4118 = vmatprep.subr.bf16.mxu1 %v4117_v39  ;;  %4310 = vmatprep.subr.bf16.mxu0 %v4309_v41  ;;  %v2052_v39 = vld [vmem:[#allocation17 + $0xa68] sm:$0xff]  ;;  %v4131_v41 = vpack.c.bf16 %v2037_v48, %v2031_v28  ;;  %v4323_v42 = vpack.c.bf16 %v2039_v31, %v2033_v47  ;;  %v4133_v51 = vpack.c.bf16 %v2050_v34, %v2044_v32  ;;  %v2086_v28 = vld [vmem:[#allocation17 + $0xb78] sm:$0xff]  ;;  %v2079_v31 = vld [vmem:[#allocation17 + $0xb40] sm:$0xff] }
 0x48e   :  { %v4325_v52 = vpack.c.bf16 %v2052_v39, %v2046_v60  ;;  %v2082_v48 = vld [vmem:[#allocation17 + $0xb58] sm:$0xff]  ;;  %v2085_v32 = vld [vmem:[#allocation17 + $0xb70] sm:$0xff] }
 0x48f   :  { %v2081_v39 = vld [vmem:[#allocation17 + $0xb50] sm:$0xff] }
 0x490   :  { %4120 = vmatpush1.bf16.msra.mxu1 %v4119_v54  ;;  %4312 = vmatpush1.bf16.msra.mxu0 %v4311_v55  ;;  %v2051_v54 = vld [vmem:[#allocation17 + $0xa60] sm:$0xff]  ;;  %v2056_v55 = vld [vmem:[#allocation17 + $0xa88] sm:$0xff] }
 0x491   :  { %4122 = vmatprep.subr.bf16.mxu1 %v4121_v10  ;;  %4314 = vmatprep.subr.bf16.mxu0 %v4313_v57  ;;  %v2064_v10 = vld [vmem:[#allocation17 + $0xac8] sm:$0xff]  ;;  %v4135_v57 = vpack.c.bf16 %v2049_v45, %v2043_v44  ;;  %v4327_v25 = vpack.c.bf16 %v2051_v54, %v2045_v46  ;;  %v4137_v59 = vpack.c.bf16 %v2062_v56, %v2056_v55  ;;  %v2098_v44 = vld [vmem:[#allocation17 + $0xbd8] sm:$0xff]  ;;  %v2091_v54 = vld [vmem:[#allocation17 + $0xba0] sm:$0xff] }
 0x492   :  { %v4329_v24 = vpack.c.bf16 %v2064_v10, %v2058_v17  ;;  %v2094_v45 = vld [vmem:[#allocation17 + $0xbb8] sm:$0xff]  ;;  %v2097_v55 = vld [vmem:[#allocation17 + $0xbd0] sm:$0xff] }
 0x493   :  { %v2093_v10 = vld [vmem:[#allocation17 + $0xbb0] sm:$0xff] }
 0x494   :  { %4124 = vmatpush1.bf16.msra.mxu1 %v4123_v63  ;;  %4316 = vmatpush1.bf16.msra.mxu0 %v4315_v2  ;;  %v2063_v63 = vld [vmem:[#allocation17 + $0xac0] sm:$0xff]  ;;  %v2068_v2 = vld [vmem:[#allocation17 + $0xae8] sm:$0xff] }
 0x495   :  { %4126 = vmatprep.subr.bf16.mxu1 %v4125_v9  ;;  %4318 = vmatprep.subr.bf16.mxu0 %v4317_v12  ;;  %v2076_v9 = vld [vmem:[#allocation17 + $0xb28] sm:$0xff]  ;;  %v4139_v12 = vpack.c.bf16 %v2061_v61, %v2055_v30  ;;  %v4331_v1 = vpack.c.bf16 %v2063_v63, %v2057_v16  ;;  %v4141_v49 = vpack.c.bf16 %v2074_v7, %v2068_v2  ;;  %v2110_v30 = vld [vmem:[#allocation17 + $0xc38] sm:$0xff] }
 0x496   :  { %v4333_v21 = vpack.c.bf16 %v2076_v9, %v2070_v8  ;;  %v2106_v61 = vld [vmem:[#allocation17 + $0xc18] sm:$0xff]  ;;  %v4151_v16 = vpack.c.bf16 %v2097_v55, %v2091_v54  ;;  %v2103_v8 = vld [vmem:[#allocation17 + $0xc00] sm:$0xff]  ;;  %v2109_v9 = vld [vmem:[#allocation17 + $0xc30] sm:$0xff] }
 0x497   :  { %v2142_v54 = vld [vmem:[#allocation17 + $0xd38] sm:$0xff]  ;;  %v2148_v55 = vld [vmem:[#allocation17 + $0xd68] sm:$0xff] }
 0x498   :  { %4128 = vmatpush1.bf16.msra.mxu1 %v4127_v26  ;;  %4320 = vmatpush1.bf16.msra.mxu0 %v4319_v27  ;;  %v2075_v26 = vld [vmem:[#allocation17 + $0xb20] sm:$0xff]  ;;  %v2080_v27 = vld [vmem:[#allocation17 + $0xb48] sm:$0xff] }
 0x499   :  { %4130 = vmatprep.subr.bf16.mxu1 %v4129_v29  ;;  %4322 = vmatprep.subr.bf16.mxu0 %v4321_v3  ;;  %v2088_v29 = vld [vmem:[#allocation17 + $0xb88] sm:$0xff]  ;;  %v4143_v3 = vpack.c.bf16 %v2073_v5, %v2067_v4  ;;  %v4335_v47 = vpack.c.bf16 %v2075_v26, %v2069_v23  ;;  %v4145_v34 = vpack.c.bf16 %v2086_v28, %v2080_v27  ;;  %v2111_v4 = vld [vmem:[#allocation17 + $0xc40] sm:$0xff]  ;;  %v2121_v27 = vld [vmem:[#allocation17 + $0xc90] sm:$0xff] }
 0x49a   :  { %v4337_v60 = vpack.c.bf16 %v2088_v29, %v2082_v48  ;;  %v2116_v5 = vld [vmem:[#allocation17 + $0xc68] sm:$0xff]  ;;  %v2115_v26 = vld [vmem:[#allocation17 + $0xc60] sm:$0xff] }
 0x49b   :  { %v2124_v23 = vld [vmem:[#allocation17 + $0xca8] sm:$0xff] }
 0x49c   :  { %4132 = vmatpush1.bf16.msra.mxu1 %v4131_v41  ;;  %4324 = vmatpush1.bf16.msra.mxu0 %v4323_v42  ;;  %v2087_v41 = vld [vmem:[#allocation17 + $0xb80] sm:$0xff]  ;;  %v2092_v42 = vld [vmem:[#allocation17 + $0xba8] sm:$0xff] }
 0x49d   :  { %4134 = vmatprep.subr.bf16.mxu1 %v4133_v51  ;;  %4326 = vmatprep.subr.bf16.mxu0 %v4325_v52  ;;  %v2100_v51 = vld [vmem:[#allocation17 + $0xbe8] sm:$0xff]  ;;  %v4147_v52 = vpack.c.bf16 %v2085_v32, %v2079_v31  ;;  %v4339_v46 = vpack.c.bf16 %v2087_v41, %v2081_v39  ;;  %v4149_v56 = vpack.c.bf16 %v2098_v44, %v2092_v42  ;;  %v2134_v31 = vld [vmem:[#allocation17 + $0xcf8] sm:$0xff]  ;;  %v2127_v39 = vld [vmem:[#allocation17 + $0xcc0] sm:$0xff] }
 0x49e   :  { %v4341_v17 = vpack.c.bf16 %v2100_v51, %v2094_v45  ;;  %v2130_v32 = vld [vmem:[#allocation17 + $0xcd8] sm:$0xff]  ;;  %v2133_v41 = vld [vmem:[#allocation17 + $0xcf0] sm:$0xff]  ;;  %v2135_v51 = vld [vmem:[#allocation17 + $0xd00] sm:$0xff] }
 0x49f   :  { %v2129_v42 = vld [vmem:[#allocation17 + $0xcd0] sm:$0xff] }
 0x4a0   :  { %4136 = vmatpush1.bf16.msra.mxu1 %v4135_v57  ;;  %4328 = vmatpush1.bf16.msra.mxu0 %v4327_v25  ;;  %v2099_v57 = vld [vmem:[#allocation17 + $0xbe0] sm:$0xff]  ;;  %v2104_v25 = vld [vmem:[#allocation17 + $0xc08] sm:$0xff] }
 0x4a1   :  { %4138 = vmatprep.subr.bf16.mxu1 %v4137_v59  ;;  %4330 = vmatprep.subr.bf16.mxu0 %v4329_v24  ;;  %v2112_v59 = vld [vmem:[#allocation17 + $0xc48] sm:$0xff]  ;;  %v1628_v24 = vmul.f32 %v5428_v50, %v5376_v62  ;;  %v4343_v63 = vpack.c.bf16 %v2099_v57, %v2093_v10  ;;  %v4153_v2 = vpack.c.bf16 %v2110_v30, %v2104_v25  ;;  %v2139_v57 = vld [vmem:[#allocation17 + $0xd20] sm:$0xff]  ;;  %v2145_v25 = vld [vmem:[#allocation17 + $0xd50] sm:$0xff] }
 0x4a2   :  { %v4345_v7 = vpack.c.bf16 %v2112_v59, %v2106_v61  ;;  %v4155_v62 = vpack.c.bf16 %v2109_v9, %v2103_v8  ;;  %v2141_v30 = vld [vmem:[#allocation17 + $0xd30] sm:$0xff]  ;;  %v4357_v61 = vpack.c.bf16 %v2148_v55, %v2142_v54  ;;  %v2147_v59 = vld [vmem:[#allocation17 + $0xd60] sm:$0xff]  ;;  %v2188_v54 = vld [vmem:[#allocation17 + $0xea8] sm:$0xff] }
 0x4a3   :  { %v4359_v8 = vpack.c.bf16 %v2147_v59, %v2141_v30  ;;  %v2194_v55 = vld [vmem:[#allocation17 + $0xed8] sm:$0xff]  ;;  %v2187_v30 = vld [vmem:[#allocation17 + $0xea0] sm:$0xff]  ;;  %v2189_v59 = vld [vmem:[#allocation17 + $0xeb0] sm:$0xff] }
 0x4a4   :  { %4140 = vmatpush1.bf16.msra.mxu1 %v4139_v12  ;;  %4332 = vmatpush1.bf16.msra.mxu0 %v4331_v1  ;;  %v1672_v12 = vmul.f32 %v5403_v0, %v1628_v24  ;;  %v2105_v1 = vld [vmem:[#allocation17 + $0xc10] sm:$0xff]  ;;  %v2152_v24 = vld [vmem:[#allocation17 + $0xd88] sm:$0xff] }
 0x4a5   :  { %4142 = vmatprep.subr.bf16.mxu1 %v4141_v49  ;;  %4334 = vmatprep.subr.bf16.mxu0 %v4333_v21  ;;  %v2122_v49 = vld [vmem:[#allocation17 + $0xc98] sm:$0xff]  ;;  %v4347_v50 = vpack.c.bf16 %v2111_v4, %v2105_v1  ;;  %v2117_v0 = vld [vmem:[#allocation17 + $0xc70] sm:$0xff] }
 0x4a6   :  { %v2118_v21 = vld [vmem:[#allocation17 + $0xc78] sm:$0xff]  ;;  %v5488_v28 = vadd.f32 %v5412_v6, %v1672_v12  ;;  %v4157_v48 = vpack.c.bf16 %v2122_v49, %v2116_v5  ;;  %v2151_v12 = vld [vmem:[#allocation17 + $0xd80] sm:$0xff]  ;;  %v2157_v1 = vld [vmem:[#allocation17 + $0xdb0] sm:$0xff] }
 0x4a7   :  { %v4349_v29 = vpack.c.bf16 %v2124_v23, %v2118_v21  ;;  %v2153_v4 = vld [vmem:[#allocation17 + $0xd90] sm:$0xff]  ;;  %v2159_v49 = vld [vmem:[#allocation17 + $0xdc0] sm:$0xff]  ;;  %v2164_v21 = vld [vmem:[#allocation17 + $0xde8] sm:$0xff] }
 0x4a8   :  { %4144 = vmatpush1.bf16.msra.mxu1 %v4143_v3  ;;  %4336 = vmatpush1.bf16.msra.mxu0 %v4335_v47  ;;  %v2123_v3 = vld [vmem:[#allocation17 + $0xca0] sm:$0xff]  ;;  %v2128_v47 = vld [vmem:[#allocation17 + $0xcc8] sm:$0xff]  ;;  %v2170_v23 = vld [vmem:[#allocation17 + $0xe18] sm:$0xff] }
 0x4a9   :  { %4146 = vmatprep.subr.bf16.mxu1 %v4145_v34  ;;  %4338 = vmatprep.subr.bf16.mxu0 %v4337_v60  ;;  %v2136_v34 = vld [vmem:[#allocation17 + $0xd08] sm:$0xff]  ;;  %v4159_v60 = vpack.c.bf16 %v2121_v27, %v2115_v26  ;;  %v4351_v6 = vpack.c.bf16 %v2123_v3, %v2117_v0  ;;  %v4161_v44 = vpack.c.bf16 %v2134_v31, %v2128_v47  ;;  %v2169_v0 = vld [vmem:[#allocation17 + $0xe10] sm:$0xff]  ;;  %v2171_v31 = vld [vmem:[#allocation17 + $0xe20] sm:$0xff] }
 0x4aa   :  { %v4353_v45 = vpack.c.bf16 %v2136_v34, %v2130_v32  ;;  %v4171_v26 = vpack.c.bf16 %v2157_v1, %v2151_v12  ;;  %v4363_v27 = vpack.c.bf16 %v2159_v49, %v2153_v4  ;;  %v2165_v3 = vld [vmem:[#allocation17 + $0xdf0] sm:$0xff]  ;;  %v2176_v32 = vld [vmem:[#allocation17 + $0xe48] sm:$0xff]  ;;  %v2182_v34 = vld [vmem:[#allocation17 + $0xe78] sm:$0xff] }
 0x4ab   :  { %v2199_v4 = vld [vmem:[#allocation17 + $0xf00] sm:$0xff]  ;;  %v2201_v49 = vld [vmem:[#allocation17 + $0xf10] sm:$0xff] }
 0x4ac   :  { %4148 = vmatpush1.bf16.msra.mxu1 %v4147_v52  ;;  %4340 = vmatpush1.bf16.msra.mxu0 %v4339_v46  ;;  %v2140_v52 = vld [vmem:[#allocation17 + $0xd28] sm:$0xff]  ;;  %v2146_v46 = vld [vmem:[#allocation17 + $0xd58] sm:$0xff] }
 0x4ad   :  { %4150 = vmatprep.subr.bf16.mxu1 %v4149_v56  ;;  %4342 = vmatprep.subr.bf16.mxu0 %v4341_v17  ;;  %v4163_v56 = vpack.c.bf16 %v2133_v41, %v2127_v39  ;;  %v4355_v17 = vpack.c.bf16 %v2135_v51, %v2129_v42  ;;  %v4165_v10 = vpack.c.bf16 %v2146_v46, %v2140_v52  ;;  %v2177_v51 = vld [vmem:[#allocation17 + $0xe50] sm:$0xff]  ;;  %v2183_v46 = vld [vmem:[#allocation17 + $0xe80] sm:$0xff] }
 0x4ae   :  { %v4367_v41 = vpack.c.bf16 %v2171_v31, %v2165_v3  ;;  %v4177_v42 = vpack.c.bf16 %v2182_v34, %v2176_v32  ;;  %v2211_v3 = vld [vmem:[#allocation17 + $0xf60] sm:$0xff]  ;;  %v2213_v31 = vld [vmem:[#allocation17 + $0xf70] sm:$0xff] }
 0x4af   :  { %v2219_v34 = vld [vmem:[#allocation17 + $0xfa0] sm:$0xff] }
 0x4b0   :  { %4152 = vmatpush1.bf16.msra.mxu1 %v4151_v16  ;;  %4344 = vmatpush1.bf16.msra.mxu0 %v4343_v63  ;;  %v2158_v16 = vld [vmem:[#allocation17 + $0xdb8] sm:$0xff] }
 0x4b1   :  { %4154 = vmatprep.subr.bf16.mxu1 %v4153_v2  ;;  %4346 = vmatprep.subr.bf16.mxu0 %v4345_v7  ;;  %v2154_v63 = vld [vmem:[#allocation17 + $0xd98] sm:$0xff]  ;;  %v2160_v2 = vld [vmem:[#allocation17 + $0xdc8] sm:$0xff]  ;;  %v4167_v7 = vpack.c.bf16 %v2145_v25, %v2139_v57  ;;  %v4169_v9 = vpack.c.bf16 %v2158_v16, %v2152_v24  ;;  %v4371_v57 = vpack.c.bf16 %v2183_v46, %v2177_v51  ;;  %v2195_v16 = vld [vmem:[#allocation17 + $0xee0] sm:$0xff] }
 0x4b2   :  { %v4361_v5 = vpack.c.bf16 %v2160_v2, %v2154_v63  ;;  %v4181_v25 = vpack.c.bf16 %v2194_v55, %v2188_v54  ;;  %v2200_v63 = vld [vmem:[#allocation17 + $0xf08] sm:$0xff]  ;;  %v2206_v2 = vld [vmem:[#allocation17 + $0xf38] sm:$0xff]  ;;  %v4375_v12 = vpack.c.bf16 %v2195_v16, %v2189_v59  ;;  %v2223_v51 = vld [vmem:[#allocation17 + $0xfc0] sm:$0xff] }
 0x4b3   :  { %2469 = vmatmul.mubr.f32.vlgmr.msra.gmra.mrb[4].mxu1 %v5441_v53  ;;  %2700 = vmatmul.mubr.f32.vlgmr.msra.gmra.mrb[8].mxu0 %v5441_v53  ;;  %v4185_v1 = vpack.c.bf16 %v2206_v2, %v2200_v63  ;;  %v2225_v46 = vld [vmem:[#allocation17 + $0xfd0] sm:$0xff]  ;;  %v2231_v55 = vld [vmem:[#allocation17 + $0x1000] sm:$0xff] }
 0x4b4   :  { %2474 = vmatprep.mubr.f32.mxu1 %v5488_v28  ;;  %4156 = vmatpush1.bf16.msra.mxu1 %v4155_v62  ;;  %v2166_v62 = vld [vmem:[#allocation17 + $0xdf8] sm:$0xff]  ;;  %v2235_v59 = vld [vmem:[#allocation17 + $0x1020] sm:$0xff]  ;;  %v2237_v16 = vld [vmem:[#allocation17 + $0x1030] sm:$0xff] }
 0x4b5   :  { %2705 = vmatprep.mubr.f32.mxu0 %v5488_v28  ;;  %4348 = vmatpush1.bf16.msra.mxu0 %v4347_v50  ;;  %v2172_v50 = vld [vmem:[#allocation17 + $0xe28] sm:$0xff]  ;;  %v2243_v2 = vld [vmem:[#allocation17 + $0x1060] sm:$0xff] }
 0x4b6   :  { %4158 = vmatprep.subr.bf16.mxu1 %v4157_v48  ;;  %4350 = vmatprep.subr.bf16.mxu0 %v4349_v29  ;;  %v4173_v48 = vpack.c.bf16 %v2170_v23, %v2164_v21  ;;  %v2163_v29 = vld [vmem:[#allocation17 + $0xde0] sm:$0xff]  ;;  %v4365_v47 = vpack.c.bf16 %v2172_v50, %v2166_v62  ;;  %v2212_v62 = vld [vmem:[#allocation17 + $0xf68] sm:$0xff]  ;;  %v2218_v50 = vld [vmem:[#allocation17 + $0xf98] sm:$0xff] }
 0x4b7   :  { %2475 = vmatmul.mubr.f32.gmra.mrb[6].mxu1 %v5458_v14  ;;  %2706 = vmatmul.mubr.f32.gmra.mrb[10].mxu0 %v5458_v14  ;;  %v4175_v39 = vpack.c.bf16 %v2169_v0, %v2163_v29  ;;  %v2207_v23 = vld [vmem:[#allocation17 + $0xf40] sm:$0xff]  ;;  %v4189_v0 = vpack.c.bf16 %v2218_v50, %v2212_v62 }
 0x4b8   :  { %4160 = vmatpush1.bf16.msra.mxu1 %v4159_v60  ;;  %2545 = vmatprep.mubr.f32.mxu1 %v5448_v58  ;;  %v2178_v60 = vld [vmem:[#allocation17 + $0xe58] sm:$0xff]  ;;  %v4379_v29 = vpack.c.bf16 %v2207_v23, %v2201_v49  ;;  %v2247_v49 = vld [vmem:[#allocation17 + $0x1080] sm:$0xff]  ;;  %v2249_v23 = vld [vmem:[#allocation17 + $0x1090] sm:$0xff] }
 0x4b9   :  { %4352 = vmatpush1.bf16.msra.mxu0 %v4351_v6  ;;  %2776 = vmatprep.mubr.f32.mxu0 %v5448_v58  ;;  %v2184_v6 = vld [vmem:[#allocation17 + $0xe88] sm:$0xff]  ;;  %v2255_v50 = vld [vmem:[#allocation17 + $0x10c0] sm:$0xff] }
 0x4ba   :  { %4162 = vmatprep.subr.bf16.mxu1 %v4161_v44  ;;  %4354 = vmatprep.subr.bf16.mxu0 %v4353_v45  ;;  %v2175_v44 = vld [vmem:[#allocation17 + $0xe40] sm:$0xff]  ;;  %v2181_v45 = vld [vmem:[#allocation17 + $0xe70] sm:$0xff]  ;;  %v4369_v52 = vpack.c.bf16 %v2184_v6, %v2178_v60  ;;  %v2224_v60 = vld [vmem:[#allocation17 + $0xfc8] sm:$0xff] }
 0x4bb   :  { %v2230_v6 = vld [vmem:[#allocation17 + $0xff8] sm:$0xff] }
 0x4bc   :  { %4164 = vmatpush1.bf16.msra.mxu1 %v4163_v56  ;;  %v2190_v56 = vld [vmem:[#allocation17 + $0xeb8] sm:$0xff] }
 0x4bd   :  { %4356 = vmatpush1.bf16.msra.mxu0 %v4355_v17  ;;  %4166 = vmatprep.subr.bf16.mxu1 %v4165_v10  ;;  %v2196_v17 = vld [vmem:[#allocation17 + $0xee8] sm:$0xff]  ;;  %v4179_v10 = vpack.c.bf16 %v2181_v45, %v2175_v44  ;;  %v4383_v44 = vpack.c.bf16 %v2219_v34, %v2213_v31  ;;  %v4193_v45 = vpack.c.bf16 %v2230_v6, %v2224_v60  ;;  %v2259_v31 = vld [vmem:[#allocation17 + $0x10e0] sm:$0xff]  ;;  %v2261_v34 = vld [vmem:[#allocation17 + $0x10f0] sm:$0xff] }
 0x4be   :  { %4358 = vmatprep.subr.bf16.mxu0 %v4357_v61  ;;  %v2193_v61 = vld [vmem:[#allocation17 + $0xed0] sm:$0xff]  ;;  %v4373_v24 = vpack.c.bf16 %v2196_v17, %v2190_v56  ;;  %v2236_v56 = vld [vmem:[#allocation17 + $0x1028] sm:$0xff]  ;;  %v2242_v17 = vld [vmem:[#allocation17 + $0x1058] sm:$0xff] }
 0x4bf   :  { %v2267_v6 = vld [vmem:[#allocation17 + $0x1120] sm:$0xff] }
 0x4c0   :  { %4168 = vmatpush1.bf16.msra.mxu1 %v4167_v7  ;;  %v2202_v7 = vld [vmem:[#allocation17 + $0xf18] sm:$0xff] }
 0x4c1   :  { %4360 = vmatpush1.bf16.msra.mxu0 %v4359_v8  ;;  %4170 = vmatprep.subr.bf16.mxu1 %v4169_v9  ;;  %v2208_v8 = vld [vmem:[#allocation17 + $0xf48] sm:$0xff]  ;;  %v4183_v9 = vpack.c.bf16 %v2193_v61, %v2187_v30  ;;  %v4387_v30 = vpack.c.bf16 %v2231_v55, %v2225_v46  ;;  %v4197_v61 = vpack.c.bf16 %v2242_v17, %v2236_v56  ;;  %v2271_v46 = vld [vmem:[#allocation17 + $0x1140] sm:$0xff]  ;;  %v2273_v55 = vld [vmem:[#allocation17 + $0x1150] sm:$0xff] }
 0x4c2   :  { %4362 = vmatprep.subr.bf16.mxu0 %v4361_v5  ;;  %v2205_v5 = vld [vmem:[#allocation17 + $0xf30] sm:$0xff]  ;;  %v4377_v21 = vpack.c.bf16 %v2208_v8, %v2202_v7  ;;  %v2248_v7 = vld [vmem:[#allocation17 + $0x1088] sm:$0xff]  ;;  %v2254_v8 = vld [vmem:[#allocation17 + $0x10b8] sm:$0xff] }
 0x4c3   :  { %v2279_v17 = vld [vmem:[#allocation17 + $0x1180] sm:$0xff] }
 0x4c4   :  { %4172 = vmatpush1.bf16.msra.mxu1 %v4171_v26  ;;  %v2214_v26 = vld [vmem:[#allocation17 + $0xf78] sm:$0xff] }
 0x4c5   :  { %4364 = vmatpush1.bf16.msra.mxu0 %v4363_v27  ;;  %4174 = vmatprep.subr.bf16.mxu1 %v4173_v48  ;;  %v2220_v27 = vld [vmem:[#allocation17 + $0xfa8] sm:$0xff]  ;;  %v4187_v48 = vpack.c.bf16 %v2205_v5, %v2199_v4  ;;  %v4391_v4 = vpack.c.bf16 %v2243_v2, %v2237_v16  ;;  %v4201_v5 = vpack.c.bf16 %v2254_v8, %v2248_v7  ;;  %v2283_v16 = vld [vmem:[#allocation17 + $0x11a0] sm:$0xff]  ;;  %v2285_v2 = vld [vmem:[#allocation17 + $0x11b0] sm:$0xff] }
 0x4c6   :  { %4366 = vmatprep.subr.bf16.mxu0 %v4365_v47  ;;  %v2217_v47 = vld [vmem:[#allocation17 + $0xf90] sm:$0xff]  ;;  %v4381_v32 = vpack.c.bf16 %v2220_v27, %v2214_v26  ;;  %v2260_v26 = vld [vmem:[#allocation17 + $0x10e8] sm:$0xff]  ;;  %v2266_v27 = vld [vmem:[#allocation17 + $0x1118] sm:$0xff] }
 0x4c7   :  { %v2291_v8 = vld [vmem:[#allocation17 + $0x11e0] sm:$0xff] }
 0x4c8   :  { %4176 = vmatpush1.bf16.msra.mxu1 %v4175_v39  ;;  %v2226_v39 = vld [vmem:[#allocation17 + $0xfd8] sm:$0xff] }
 0x4c9   :  { %4368 = vmatpush1.bf16.msra.mxu0 %v4367_v41  ;;  %4178 = vmatprep.subr.bf16.mxu1 %v4177_v42  ;;  %v2232_v41 = vld [vmem:[#allocation17 + $0x1008] sm:$0xff]  ;;  %v4191_v42 = vpack.c.bf16 %v2217_v47, %v2211_v3  ;;  %v4395_v3 = vpack.c.bf16 %v2255_v50, %v2249_v23  ;;  %v4205_v47 = vpack.c.bf16 %v2266_v27, %v2260_v26  ;;  %v1735_v27 = vld [vmem:[#allocation17 + $0x80] sm:$0xff] }
 0x4ca   :  { %4370 = vmatprep.subr.bf16.mxu0 %v4369_v52  ;;  %v2229_v52 = vld [vmem:[#allocation17 + $0xff0] sm:$0xff]  ;;  %v4385_v54 = vpack.c.bf16 %v2232_v41, %v2226_v39  ;;  %v2272_v39 = vld [vmem:[#allocation17 + $0x1148] sm:$0xff]  ;;  %v2278_v41 = vld [vmem:[#allocation17 + $0x1178] sm:$0xff] }
 0x4cb   :  { %v1736_v23 = vld [vmem:[#allocation17 + $0x88] sm:$0xff] }
 0x4cc   :  { %4180 = vmatpush1.bf16.msra.mxu1 %v4179_v10  ;;  %v2238_v10 = vld [vmem:[#allocation17 + $0x1038] sm:$0xff] }
 0x4cd   :  { %4372 = vmatpush1.bf16.msra.mxu0 %v4371_v57  ;;  %4182 = vmatprep.subr.bf16.mxu1 %v4181_v25  ;;  %v2244_v57 = vld [vmem:[#allocation17 + $0x1068] sm:$0xff]  ;;  %v4195_v25 = vpack.c.bf16 %v2229_v52, %v2223_v51  ;;  %v4399_v51 = vpack.c.bf16 %v2267_v6, %v2261_v34  ;;  %v4209_v52 = vpack.c.bf16 %v2278_v41, %v2272_v39  ;;  %v1759_v41 = vld [vmem:[#allocation17 + $0x140] sm:$0xff] }
 0x4ce   :  { %4374 = vmatprep.subr.bf16.mxu0 %v4373_v24  ;;  %v2241_v24 = vld [vmem:[#allocation17 + $0x1050] sm:$0xff]  ;;  %v4389_v63 = vpack.c.bf16 %v2244_v57, %v2238_v10  ;;  %v2284_v10 = vld [vmem:[#allocation17 + $0x11a8] sm:$0xff]  ;;  %v2290_v57 = vld [vmem:[#allocation17 + $0x11d8] sm:$0xff] }
 0x4cf   :  { %v1760_v34 = vld [vmem:[#allocation17 + $0x148] sm:$0xff] }
 0x4d0   :  { %4184 = vmatpush1.bf16.msra.mxu1 %v4183_v9  ;;  %v2250_v9 = vld [vmem:[#allocation17 + $0x1098] sm:$0xff] }
 0x4d1   :  { %4376 = vmatpush1.bf16.msra.mxu0 %v4375_v12  ;;  %4186 = vmatprep.subr.bf16.mxu1 %v4185_v1  ;;  %v2256_v12 = vld [vmem:[#allocation17 + $0x10c8] sm:$0xff]  ;;  %v4199_v1 = vpack.c.bf16 %v2241_v24, %v2235_v59  ;;  %v4403_v59 = vpack.c.bf16 %v2279_v17, %v2273_v55  ;;  %v4213_v24 = vpack.c.bf16 %v2290_v57, %v2284_v10  ;;  %v1783_v10 = vld [vmem:[#allocation17 + $0x200] sm:$0xff]  ;;  %v1789_v57 = vld [vmem:[#allocation17 + $0x230] sm:$0xff] }
 0x4d2   :  { %4378 = vmatprep.subr.bf16.mxu0 %v4377_v21  ;;  %v2253_v21 = vld [vmem:[#allocation17 + $0x10b0] sm:$0xff]  ;;  %v4393_v62 = vpack.c.bf16 %v2256_v12, %v2250_v9  ;;  %v1724_v9 = vld [vmem:[#allocation17 + $0x28] sm:$0xff]  ;;  %v1730_v12 = vld [vmem:[#allocation17 + $0x58] sm:$0xff] }
 0x4d3   :  { %v1784_v55 = vld [vmem:[#allocation17 + $0x208] sm:$0xff] }
 0x4d4   :  { %4188 = vmatpush1.bf16.msra.mxu1 %v4187_v48  ;;  %v2262_v48 = vld [vmem:[#allocation17 + $0x10f8] sm:$0xff] }
 0x4d5   :  { %4380 = vmatpush1.bf16.msra.mxu0 %v4379_v29  ;;  %4190 = vmatprep.subr.bf16.mxu1 %v4189_v0  ;;  %v2268_v29 = vld [vmem:[#allocation17 + $0x1128] sm:$0xff]  ;;  %v4203_v0 = vpack.c.bf16 %v2253_v21, %v2247_v49  ;;  %v1723_v49 = vld [vmem:[#allocation17 + $0x20] sm:$0xff]  ;;  %v1729_v21 = vld [vmem:[#allocation17 + $0x50] sm:$0xff] }
 0x4d6   :  { %4382 = vmatprep.subr.bf16.mxu0 %v4381_v32  ;;  %v2265_v32 = vld [vmem:[#allocation17 + $0x1110] sm:$0xff]  ;;  %v4397_v60 = vpack.c.bf16 %v2268_v29, %v2262_v48  ;;  %v4411_v50 = vpack.c.bf16 %v1729_v21, %v1723_v49  ;;  %v1748_v29 = vld [vmem:[#allocation17 + $0xe8] sm:$0xff]  ;;  %v1819_v21 = vld [vmem:[#allocation17 + $0x320] sm:$0xff] }
 0x4d7   :  { %v1741_v48 = vld [vmem:[#allocation17 + $0xb0] sm:$0xff] }
 0x4d8   :  { %4192 = vmatpush1.bf16.msra.mxu1 %v4191_v42  ;;  %v2274_v42 = vld [vmem:[#allocation17 + $0x1158] sm:$0xff] }
 0x4d9   :  { %4384 = vmatpush1.bf16.msra.mxu0 %v4383_v44  ;;  %4194 = vmatprep.subr.bf16.mxu1 %v4193_v45  ;;  %v2280_v44 = vld [vmem:[#allocation17 + $0x1188] sm:$0xff]  ;;  %v4207_v45 = vpack.c.bf16 %v2265_v32, %v2259_v31  ;;  %v1747_v31 = vld [vmem:[#allocation17 + $0xe0] sm:$0xff]  ;;  %v1753_v32 = vld [vmem:[#allocation17 + $0x110] sm:$0xff] }
 0x4da   :  { %4386 = vmatprep.subr.bf16.mxu0 %v4385_v54  ;;  %v2277_v54 = vld [vmem:[#allocation17 + $0x1170] sm:$0xff]  ;;  %v4401_v56 = vpack.c.bf16 %v2280_v44, %v2274_v42  ;;  %v4419_v6 = vpack.c.bf16 %v1753_v32, %v1747_v31  ;;  %v1772_v44 = vld [vmem:[#allocation17 + $0x1a8] sm:$0xff]  ;;  %v1843_v32 = vld [vmem:[#allocation17 + $0x3e0] sm:$0xff] }
 0x4db   :  { %v1765_v42 = vld [vmem:[#allocation17 + $0x170] sm:$0xff] }
 0x4dc   :  { %4196 = vmatpush1.bf16.msra.mxu1 %v4195_v25  ;;  %v2286_v25 = vld [vmem:[#allocation17 + $0x11b8] sm:$0xff] }
 0x4dd   :  { %4388 = vmatpush1.bf16.msra.mxu0 %v4387_v30  ;;  %4198 = vmatprep.subr.bf16.mxu1 %v4197_v61  ;;  %v2292_v30 = vld [vmem:[#allocation17 + $0x11e8] sm:$0xff]  ;;  %v4211_v61 = vpack.c.bf16 %v2277_v54, %v2271_v46  ;;  %v1771_v46 = vld [vmem:[#allocation17 + $0x1a0] sm:$0xff]  ;;  %v1777_v54 = vld [vmem:[#allocation17 + $0x1d0] sm:$0xff] }
 0x4de   :  { %4390 = vmatprep.subr.bf16.mxu0 %v4389_v63  ;;  %v2289_v63 = vld [vmem:[#allocation17 + $0x11d0] sm:$0xff]  ;;  %v4405_v7 = vpack.c.bf16 %v2292_v30, %v2286_v25  ;;  %v4427_v17 = vpack.c.bf16 %v1777_v54, %v1771_v46  ;;  %v1796_v25 = vld [vmem:[#allocation17 + $0x268] sm:$0xff]  ;;  %v1802_v30 = vld [vmem:[#allocation17 + $0x298] sm:$0xff] }
 0x4df   :  { %v1867_v54 = vld [vmem:[#allocation17 + $0x4a0] sm:$0xff] }
 0x4e0   :  { %4200 = vmatpush1.bf16.msra.mxu1 %v4199_v1  ;;  %v4215_v1 = vpack.c.bf16 %v2289_v63, %v2283_v16  ;;  %v1801_v16 = vld [vmem:[#allocation17 + $0x290] sm:$0xff]  ;;  %v1808_v63 = vld [vmem:[#allocation17 + $0x2c8] sm:$0xff] }
 0x4e1   :  { %4392 = vmatpush1.bf16.msra.mxu0 %v4391_v4  ;;  %4202 = vmatprep.subr.bf16.mxu1 %v4201_v5  ;;  %v4407_v4 = vpack.c.bf16 %v2291_v8, %v2285_v2  ;;  %v4409_v5 = vpack.c.bf16 %v1730_v12, %v1724_v9  ;;  %v1814_v2 = vld [vmem:[#allocation17 + $0x2f8] sm:$0xff]  ;;  %v1807_v9 = vld [vmem:[#allocation17 + $0x2c0] sm:$0xff]  ;;  %v1813_v12 = vld [vmem:[#allocation17 + $0x2f0] sm:$0xff] }
 0x4e2   :  { %4394 = vmatprep.subr.bf16.mxu0 %v4393_v62  ;;  %v1742_v62 = vld [vmem:[#allocation17 + $0xb8] sm:$0xff]  ;;  %v4437_v8 = vpack.c.bf16 %v1814_v2, %v1808_v63  ;;  %v1897_v63 = vld [vmem:[#allocation17 + $0x590] sm:$0xff]  ;;  %v1904_v2 = vld [vmem:[#allocation17 + $0x5c8] sm:$0xff] }
 0x4e3   :  { %v4413_v26 = vpack.c.bf16 %v1742_v62, %v1736_v23  ;;  %v1825_v23 = vld [vmem:[#allocation17 + $0x350] sm:$0xff]  ;;  %v1832_v62 = vld [vmem:[#allocation17 + $0x388] sm:$0xff] }
 0x4e4   :  { %4204 = vmatpush1.bf16.msra.mxu1 %v4203_v0  ;;  %v1754_v0 = vld [vmem:[#allocation17 + $0x118] sm:$0xff] }
 0x4e5   :  { %4396 = vmatpush1.bf16.msra.mxu0 %v4395_v3  ;;  %4206 = vmatprep.subr.bf16.mxu1 %v4205_v47  ;;  %v4415_v3 = vpack.c.bf16 %v1741_v48, %v1735_v27  ;;  %v4417_v47 = vpack.c.bf16 %v1754_v0, %v1748_v29  ;;  %v1831_v48 = vld [vmem:[#allocation17 + $0x380] sm:$0xff]  ;;  %v1837_v29 = vld [vmem:[#allocation17 + $0x3b0] sm:$0xff]  ;;  %v1844_v0 = vld [vmem:[#allocation17 + $0x3e8] sm:$0xff] }
 0x4e6   :  { %4398 = vmatprep.subr.bf16.mxu0 %v4397_v60  ;;  %v1766_v60 = vld [vmem:[#allocation17 + $0x178] sm:$0xff] }
 0x4e7   :  { %v4421_v39 = vpack.c.bf16 %v1766_v60, %v1760_v34  ;;  %v1849_v34 = vld [vmem:[#allocation17 + $0x410] sm:$0xff]  ;;  %v1856_v60 = vld [vmem:[#allocation17 + $0x448] sm:$0xff] }
 0x4e8   :  { %4208 = vmatpush1.bf16.msra.mxu1 %v4207_v45  ;;  %v1778_v45 = vld [vmem:[#allocation17 + $0x1d8] sm:$0xff] }
 0x4e9   :  { %4400 = vmatpush1.bf16.msra.mxu0 %v4399_v51  ;;  %4210 = vmatprep.subr.bf16.mxu1 %v4209_v52  ;;  %v4423_v51 = vpack.c.bf16 %v1765_v42, %v1759_v41  ;;  %v4425_v52 = vpack.c.bf16 %v1778_v45, %v1772_v44  ;;  %v1855_v42 = vld [vmem:[#allocation17 + $0x440] sm:$0xff]  ;;  %v1861_v44 = vld [vmem:[#allocation17 + $0x470] sm:$0xff]  ;;  %v1868_v45 = vld [vmem:[#allocation17 + $0x4a8] sm:$0xff] }
 0x4ea   :  { %4402 = vmatprep.subr.bf16.mxu0 %v4401_v56  ;;  %v1790_v56 = vld [vmem:[#allocation17 + $0x238] sm:$0xff] }
 0x4ec   :  { %4212 = vmatpush1.bf16.msra.mxu1 %v4211_v61  ;;  %v4431_v61 = vpack.c.bf16 %v1789_v57, %v1783_v10  ;;  %v1879_v57 = vld [vmem:[#allocation17 + $0x500] sm:$0xff] }
 0x4ed   :  { %4404 = vmatpush1.bf16.msra.mxu0 %v4403_v59  ;;  %4214 = vmatprep.subr.bf16.mxu1 %v4213_v24  ;;  %v4433_v59 = vpack.c.bf16 %v1802_v30, %v1796_v25  ;;  %v1795_v24 = vld [vmem:[#allocation17 + $0x260] sm:$0xff]  ;;  %v1885_v25 = vld [vmem:[#allocation17 + $0x530] sm:$0xff]  ;;  %v1892_v30 = vld [vmem:[#allocation17 + $0x568] sm:$0xff] }
 0x4ee   :  { %4406 = vmatprep.subr.bf16.mxu0 %v4405_v7  ;;  %v4435_v7 = vpack.c.bf16 %v1801_v16, %v1795_v24  ;;  %v1891_v16 = vld [vmem:[#allocation17 + $0x560] sm:$0xff] }
 0x4f0   :  { %4216 = vmatpush1.bf16.msra.mxu1 %v4215_v1  ;;  %v1820_v1 = vld [vmem:[#allocation17 + $0x328] sm:$0xff] }
 0x4f1   :  { %4408 = vmatpush1.bf16.msra.mxu0 %v4407_v4  ;;  %4410 = vmatprep.subr.bf16.mxu1 %v4409_v5  ;;  %v1826_v4 = vld [vmem:[#allocation17 + $0x358] sm:$0xff]  ;;  %v4439_v5 = vpack.c.bf16 %v1813_v12, %v1807_v9  ;;  %v1903_v12 = vld [vmem:[#allocation17 + $0x5c0] sm:$0xff] }
 0x4f2   :  { %v4441_v49 = vpack.c.bf16 %v1826_v4, %v1820_v1  ;;  %v1909_v1 = vld [vmem:[#allocation17 + $0x5f0] sm:$0xff]  ;;  %v1916_v4 = vld [vmem:[#allocation17 + $0x628] sm:$0xff] }
 0x4f3   :  { %2546 = vmatmul.mubr.f32.vlgmr.msra.gmra.mrb[4].mxu1 %v5463_v20 }
 0x4f4   :  { %2777 = vmatmul.mubr.f32.vlgmr.msra.gmra.mrb[8].mxu0 %v5463_v20  ;;  %2551 = vmatprep.mubr.f32.mxu1 %v5479_v43 }
 0x4f5   :  { %2782 = vmatprep.mubr.f32.mxu0 %v5479_v43  ;;  %4412 = vmatpush1.bf16.msra.mxu1 %v4411_v50  ;;  %v1838_v50 = vld [vmem:[#allocation17 + $0x3b8] sm:$0xff] }
 0x4f6   :  { %4414 = vmatprep.subr.bf16.mxu1 %v4413_v26  ;;  %v4443_v26 = vpack.c.bf16 %v1825_v23, %v1819_v21  ;;  %v4445_v27 = vpack.c.bf16 %v1838_v50, %v1832_v62  ;;  %v1915_v23 = vld [vmem:[#allocation17 + $0x620] sm:$0xff]  ;;  %v1921_v62 = vld [vmem:[#allocation17 + $0x650] sm:$0xff]  ;;  %v1928_v50 = vld [vmem:[#allocation17 + $0x688] sm:$0xff] }
 0x4f7   :  { %2552 = vmatmul.mubr.f32.gmra.mrb[6].mxu1 %v5482_v33 }
 0x4f8   :  { %2783 = vmatmul.mubr.f32.gmra.mrb[10].mxu0 %v5482_v33  ;;  %2853 = vmatprep.mubr.f32.mxu1 %v5433_v38  ;;  %v4429_v38 = vpack.c.bf16 %v1790_v56, %v1784_v55  ;;  %v1873_v55 = vld [vmem:[#allocation17 + $0x4d0] sm:$0xff]  ;;  %v1880_v56 = vld [vmem:[#allocation17 + $0x508] sm:$0xff] }
 0x4f9   :  { %4416 = vmatpush1.bf16.msra.mxu1 %v4415_v3  ;;  %v1850_v3 = vld [vmem:[#allocation17 + $0x418] sm:$0xff] }
 0x4fa   :  { %4418 = vmatprep.subr.bf16.mxu1 %v4417_v47  ;;  %v4447_v47 = vpack.c.bf16 %v1837_v29, %v1831_v48  ;;  %v4449_v31 = vpack.c.bf16 %v1850_v3, %v1844_v0  ;;  %v1927_v29 = vld [vmem:[#allocation17 + $0x680] sm:$0xff]  ;;  %v1933_v0 = vld [vmem:[#allocation17 + $0x6b0] sm:$0xff]  ;;  %v1940_v3 = vld [vmem:[#allocation17 + $0x6e8] sm:$0xff] }
 0x4fd   :  { %4420 = vmatpush1.bf16.msra.mxu1 %v4419_v6  ;;  %v1862_v6 = vld [vmem:[#allocation17 + $0x478] sm:$0xff] }
 0x4fe   :  { %4422 = vmatprep.subr.bf16.mxu1 %v4421_v39  ;;  %v4451_v39 = vpack.c.bf16 %v1849_v34, %v1843_v32  ;;  %v4453_v41 = vpack.c.bf16 %v1862_v6, %v1856_v60  ;;  %v1939_v34 = vld [vmem:[#allocation17 + $0x6e0] sm:$0xff]  ;;  %v1945_v60 = vld [vmem:[#allocation17 + $0x710] sm:$0xff]  ;;  %v1952_v6 = vld [vmem:[#allocation17 + $0x748] sm:$0xff] }
 0x501   :  { %4424 = vmatpush1.bf16.msra.mxu1 %v4423_v51  ;;  %v1874_v51 = vld [vmem:[#allocation17 + $0x4d8] sm:$0xff] }
 0x502   :  { %4426 = vmatprep.subr.bf16.mxu1 %v4425_v52  ;;  %v4455_v52 = vpack.c.bf16 %v1861_v44, %v1855_v42  ;;  %v4457_v46 = vpack.c.bf16 %v1874_v51, %v1868_v45  ;;  %v4483_v42 = vpack.c.bf16 %v1945_v60, %v1939_v34  ;;  %v1951_v44 = vld [vmem:[#allocation17 + $0x740] sm:$0xff]  ;;  %v3106_v45 = vld [vmem:[#allocation10 + $0x48] sm:$0xff] }
 0x503   :  { %v2042_v34 = vld [vmem:[#allocation17 + $0xa18] sm:$0xff] }
 0x504   :  { %v5512_v60 = vld [vmem:[%s5586_s9] sm:$0xff] }
 0x505   :  { %4428 = vmatpush1.bf16.msra.mxu1 %v4427_v17  ;;  %v1886_v17 = vld [vmem:[#allocation17 + $0x538] sm:$0xff]  ;;  %vm3111_vm0 = vcmp.gt.f32.partialorder %v5512_v60, 0.0 }
 0x506   :  { %4430 = vmatprep.subr.bf16.mxu1 %v4429_v38  ;;  %v4459_v38 = vpack.c.bf16 %v1873_v55, %v1867_v54  ;;  %v4461_v10 = vpack.c.bf16 %v1886_v17, %v1880_v56  ;;  %v1964_v54 = vld [vmem:[#allocation17 + $0x7a8] sm:$0xff]  ;;  %v1970_v55 = vld [vmem:[#allocation17 + $0x7d8] sm:$0xff] }
 0x509   :  { %4432 = vmatpush1.bf16.msra.mxu1 %v4431_v61  ;;  %v1898_v61 = vld [vmem:[#allocation17 + $0x598] sm:$0xff] }
 0x50a   :  { %4434 = vmatprep.subr.bf16.mxu1 %v4433_v59  ;;  %v4463_v59 = vpack.c.bf16 %v1885_v25, %v1879_v57  ;;  %v4465_v24 = vpack.c.bf16 %v1898_v61, %v1892_v30  ;;  %v1982_v57 = vld [vmem:[#allocation17 + $0x838] sm:$0xff]  ;;  %v1975_v61 = vld [vmem:[#allocation17 + $0x800] sm:$0xff] }
 0x50d   :  { %4436 = vmatpush1.bf16.msra.mxu1 %v4435_v7  ;;  %v1910_v7 = vld [vmem:[#allocation17 + $0x5f8] sm:$0xff] }
 0x50e   :  { %4438 = vmatprep.subr.bf16.mxu1 %v4437_v8  ;;  %v4467_v8 = vpack.c.bf16 %v1897_v63, %v1891_v16  ;;  %v4469_v9 = vpack.c.bf16 %v1910_v7, %v1904_v2  ;;  %v1994_v16 = vld [vmem:[#allocation17 + $0x898] sm:$0xff]  ;;  %v1987_v7 = vld [vmem:[#allocation17 + $0x860] sm:$0xff] }
 0x511   :  { %4440 = vmatpush1.bf16.msra.mxu1 %v4439_v5  ;;  %v1922_v5 = vld [vmem:[#allocation17 + $0x658] sm:$0xff] }
 0x512   :  { %4442 = vmatprep.subr.bf16.mxu1 %v4441_v49  ;;  %v4471_v49 = vpack.c.bf16 %v1909_v1, %v1903_v12  ;;  %v4473_v21 = vpack.c.bf16 %v1922_v5, %v1916_v4  ;;  %v2006_v12 = vld [vmem:[#allocation17 + $0x8f8] sm:$0xff]  ;;  %v1999_v5 = vld [vmem:[#allocation17 + $0x8c0] sm:$0xff] }
 0x515   :  { %4444 = vmatpush1.bf16.msra.mxu1 %v4443_v26  ;;  %v1934_v26 = vld [vmem:[#allocation17 + $0x6b8] sm:$0xff] }
 0x516   :  { %4446 = vmatprep.subr.bf16.mxu1 %v4445_v27  ;;  %v4475_v27 = vpack.c.bf16 %v1921_v62, %v1915_v23  ;;  %v4477_v48 = vpack.c.bf16 %v1934_v26, %v1928_v50  ;;  %v2018_v23 = vld [vmem:[#allocation17 + $0x958] sm:$0xff]  ;;  %v2011_v26 = vld [vmem:[#allocation17 + $0x920] sm:$0xff] }
 0x519   :  { %4448 = vmatpush1.bf16.msra.mxu1 %v4447_v47  ;;  %v1946_v47 = vld [vmem:[#allocation17 + $0x718] sm:$0xff] }
 0x51a   :  { %4450 = vmatprep.subr.bf16.mxu1 %v4449_v31  ;;  %v4479_v31 = vpack.c.bf16 %v1933_v0, %v1927_v29  ;;  %v4481_v32 = vpack.c.bf16 %v1946_v47, %v1940_v3  ;;  %v2030_v29 = vld [vmem:[#allocation17 + $0x9b8] sm:$0xff]  ;;  %v2023_v47 = vld [vmem:[#allocation17 + $0x980] sm:$0xff] }
 0x51d   :  { %4452 = vmatpush1.bf16.msra.mxu1 %v4451_v39  ;;  %v1958_v39 = vld [vmem:[#allocation17 + $0x778] sm:$0xff] }
 0x51e   :  { %4454 = vmatprep.subr.bf16.mxu1 %v4453_v41  ;;  %v3100_v41 = vld [vmem:[#allocation10 + $0x18] sm:$0xff] }
 0x51f   :  { %v4605_v51 = vpack.c.bf16 %v3106_v45, %v3100_v41 }
 0x521   :  { %4456 = vmatpush1.bf16.msra.mxu1 %v4455_v52  ;;  %v3099_v52 = vld [vmem:[#allocation10 + $0x10] sm:$0xff]  ;;  %4606 = vmatprep.subr.bf16.mxu0 %v4605_v51 }
 0x522   :  { %4458 = vmatprep.subr.bf16.mxu1 %v4457_v46  ;;  %v3105_v46 = vld [vmem:[#allocation10 + $0x40] sm:$0xff] }
 0x523   :  { %v4607_v56 = vpack.c.bf16 %v3105_v46, %v3099_v52 }
 0x525   :  { %4460 = vmatpush1.bf16.msra.mxu1 %v4459_v38  ;;  %4608 = vmatpush1.bf16.xpose.msra.mxu0 %v4607_v56  ;;  %v1963_v38 = vld [vmem:[#allocation17 + $0x7a0] sm:$0xff] }
 0x526   :  { %4462 = vmatprep.subr.bf16.mxu1 %v4461_v10  ;;  %v1976_v10 = vld [vmem:[#allocation17 + $0x808] sm:$0xff] }
 0x527   :  { %v4493_v30 = vpack.c.bf16 %v1982_v57, %v1976_v10  ;;  %v2066_v10 = vld [vmem:[#allocation17 + $0xad8] sm:$0xff] }
 0x529   :  { %4464 = vmatpush1.bf16.msra.mxu1 %v4463_v59  ;;  %v1981_v59 = vld [vmem:[#allocation17 + $0x830] sm:$0xff] }
 0x52a   :  { %4466 = vmatprep.subr.bf16.mxu1 %v4465_v24  ;;  %v1988_v24 = vld [vmem:[#allocation17 + $0x868] sm:$0xff]  ;;  %v4495_v63 = vpack.c.bf16 %v1981_v59, %v1975_v61  ;;  %v2065_v61 = vld [vmem:[#allocation17 + $0xad0] sm:$0xff] }
 0x52b   :  { %v4497_v2 = vpack.c.bf16 %v1994_v16, %v1988_v24  ;;  %v2072_v59 = vld [vmem:[#allocation17 + $0xb08] sm:$0xff]  ;;  %v2078_v24 = vld [vmem:[#allocation17 + $0xb38] sm:$0xff] }
 0x52d   :  { %4468 = vmatpush1.bf16.msra.mxu1 %v4467_v8  ;;  %v1993_v8 = vld [vmem:[#allocation17 + $0x890] sm:$0xff] }
 0x52e   :  { %4470 = vmatprep.subr.bf16.mxu1 %v4469_v9  ;;  %v2000_v9 = vld [vmem:[#allocation17 + $0x8c8] sm:$0xff]  ;;  %v4499_v1 = vpack.c.bf16 %v1993_v8, %v1987_v7  ;;  %v2077_v7 = vld [vmem:[#allocation17 + $0xb30] sm:$0xff] }
 0x52f   :  { %v4501_v4 = vpack.c.bf16 %v2006_v12, %v2000_v9  ;;  %v2084_v8 = vld [vmem:[#allocation17 + $0xb68] sm:$0xff]  ;;  %v2090_v9 = vld [vmem:[#allocation17 + $0xb98] sm:$0xff] }
 0x531   :  { %4472 = vmatpush1.bf16.msra.mxu1 %v4471_v49  ;;  %v2005_v49 = vld [vmem:[#allocation17 + $0x8f0] sm:$0xff] }
 0x532   :  { %4474 = vmatprep.subr.bf16.mxu1 %v4473_v21  ;;  %v2012_v21 = vld [vmem:[#allocation17 + $0x928] sm:$0xff]  ;;  %v4503_v62 = vpack.c.bf16 %v2005_v49, %v1999_v5  ;;  %v2089_v5 = vld [vmem:[#allocation17 + $0xb90] sm:$0xff] }
 0x533   :  { %v4505_v50 = vpack.c.bf16 %v2018_v23, %v2012_v21  ;;  %v2096_v49 = vld [vmem:[#allocation17 + $0xbc8] sm:$0xff]  ;;  %v2102_v21 = vld [vmem:[#allocation17 + $0xbf8] sm:$0xff] }
 0x534   :  { %2854 = vmatmul.mubr.f32.vlgmr.msra.gmra.mrb[8].mxu1 %v5435_v40  ;;  %v4485_v40 = vpack.c.bf16 %v1958_v39, %v1952_v6  ;;  %v5517_v6 = vld [vmem:[%s5586_s9 + $0x8] sm:$0xff]  ;;  %v3102_v39 = vld [vmem:[#allocation10 + $0x28] sm:$0xff] }
 0x535   :  { %2859 = vmatprep.mubr.f32.mxu1 %v5453_v22  ;;  %4476 = vmatpush1.bf16.msra.mxu1 %v4475_v27  ;;  %v1957_v22 = vld [vmem:[#allocation17 + $0x770] sm:$0xff]  ;;  %vm3112_vm1 = vcmp.gt.f32.partialorder %v5517_v6, 0.0 }
 0x536   :  { %4478 = vmatprep.subr.bf16.mxu1 %v4477_v48  ;;  %v4487_v17 = vpack.c.bf16 %v1957_v22, %v1951_v44  ;;  %v2017_v27 = vld [vmem:[#allocation17 + $0x950] sm:$0xff]  ;;  %v2024_v48 = vld [vmem:[#allocation17 + $0x988] sm:$0xff] }
 0x537   :  { %v4507_v0 = vpack.c.bf16 %v2017_v27, %v2011_v26  ;;  %v4509_v3 = vpack.c.bf16 %v2030_v29, %v2024_v48  ;;  %v3108_v44 = vld [vmem:[#allocation10 + $0x58] sm:$0xff]  ;;  %v2041_v22 = vld [vmem:[#allocation17 + $0xa10] sm:$0xff]  ;;  %v2114_v48 = vld [vmem:[#allocation17 + $0xc58] sm:$0xff] }
 0x538   :  { %2860 = vmatmul.mubr.f32.gmra.mrb[10].mxu1 %v5455_v37  ;;  %v4489_v37 = vpack.c.bf16 %v1970_v55, %v1964_v54  ;;  %v5525_v46 = vpack.c.bf16 %v3108_v44, %v3102_v39  ;;  %v2048_v54 = vld [vmem:[#allocation17 + $0xa48] sm:$0xff]  ;;  %v2054_v55 = vld [vmem:[#allocation17 + $0xa78] sm:$0xff]  ;;  %v2101_v26 = vld [vmem:[#allocation17 + $0xbf0] sm:$0xff] }
 0x539   :  { %4480 = vmatpush1.bf16.msra.mxu1 %v4479_v31  ;;  %2930 = vmatprep.mubr.f32.mxu1 %v5470_v15  ;;  %v1969_v15 = vld [vmem:[#allocation17 + $0x7d0] sm:$0xff]  ;;  %v2108_v27 = vld [vmem:[#allocation17 + $0xc28] sm:$0xff] }
 0x53a   :  { %4482 = vmatprep.subr.bf16.mxu1 %v4481_v32  ;;  %v4491_v25 = vpack.c.bf16 %v1969_v15, %v1963_v38  ;;  %v2029_v31 = vld [vmem:[#allocation17 + $0x9b0] sm:$0xff]  ;;  %v2036_v32 = vld [vmem:[#allocation17 + $0x9e8] sm:$0xff]  ;;  %4610 = vmatprep.subr.bf16.mxu0 %v5525_v46 }
 0x53b   :  { %v4511_v41 = vpack.c.bf16 %v2029_v31, %v2023_v47  ;;  %v4513_v45 = vpack.c.bf16 %v2042_v34, %v2036_v32  ;;  %v2053_v38 = vld [vmem:[#allocation17 + $0xa70] sm:$0xff]  ;;  %v2060_v15 = vld [vmem:[#allocation17 + $0xaa8] sm:$0xff]  ;;  %v2126_v32 = vld [vmem:[#allocation17 + $0xcb8] sm:$0xff] }
 0x53c   :  { %v2113_v47 = vld [vmem:[#allocation17 + $0xc50] sm:$0xff]  ;;  %v2120_v31 = vld [vmem:[#allocation17 + $0xc88] sm:$0xff] }
 0x53d   :  { %4484 = vmatpush1.bf16.msra.mxu1 %v4483_v42  ;;  %v5029_v42 = vmov 0   ;;  %v4541_v39 = vpack.c.bf16 %v2126_v32, %v2120_v31  ;;  %v2132_v44 = vld [vmem:[#allocation17 + $0xce8] sm:$0xff]  ;;  %v2215_v31 = vld [vmem:[#allocation17 + $0xf80] sm:$0xff]  ;;  %v2221_v32 = vld [vmem:[#allocation17 + $0xfb0] sm:$0xff] }
 0x53e   :  { %4486 = vmatprep.subr.bf16.mxu1 %v4485_v40  ;;  %4712 = vset.pattern.permute.xlu1 %v5029_v42  ;;  %v2035_v40 = vld [vmem:[#allocation17 + $0x9e0] sm:$0xff]  ;;  %v3115_v51 = vsel %vm3111_vm0, 1, %v5029_v42  ;;  %v3116_v52 = vsel %vm3112_vm1, 1, %v5029_v42 }
 0x53f   :  { %4711 = vset.pattern.permute.xlu0 %v5029_v42  ;;  %3118 = vperm.xlu1 %4712, %v3115_v51   ;;  %v4515_v56 = vpack.c.bf16 %v2041_v22, %v2035_v40  ;;  %v2125_v42 = vld [vmem:[#allocation17 + $0xcb0] sm:$0xff]  ;;  %v2131_v51 = vld [vmem:[#allocation17 + $0xce0] sm:$0xff] }
 0x540   :  { %3121 = vperm.xlu0 %4711, %v3116_v52   ;;  %v2137_v52 = vld [vmem:[#allocation17 + $0xd10] sm:$0xff] }
 0x541   :  { %4488 = vmatpush1.bf16.msra.mxu1 %v4487_v17  ;;  %v4517_v17 = vpack.c.bf16 %v2054_v55, %v2048_v54  ;;  %v2144_v54 = vld [vmem:[#allocation17 + $0xd48] sm:$0xff]  ;;  %v2150_v55 = vld [vmem:[#allocation17 + $0xd78] sm:$0xff] }
 0x542   :  { %4490 = vmatprep.subr.bf16.mxu1 %v4489_v37  ;;  %v2047_v37 = vld [vmem:[#allocation17 + $0xa40] sm:$0xff] }
 0x543   :  { %v4519_v57 = vpack.c.bf16 %v2053_v38, %v2047_v37  ;;  %v2143_v37 = vld [vmem:[#allocation17 + $0xd40] sm:$0xff]  ;;  %v2156_v38 = vld [vmem:[#allocation17 + $0xda8] sm:$0xff] }
 0x545   :  { %4492 = vmatpush1.bf16.msra.mxu1 %v4491_v25  ;;  %v4521_v25 = vpack.c.bf16 %v2066_v10, %v2060_v15 }
 0x546   :  { %4494 = vmatprep.subr.bf16.mxu1 %v4493_v30  ;;  %v2059_v30 = vld [vmem:[#allocation17 + $0xaa0] sm:$0xff] }
 0x547   :  { %v4523_v16 = vpack.c.bf16 %v2065_v61, %v2059_v30  ;;  %v2168_v30 = vld [vmem:[#allocation17 + $0xe08] sm:$0xff]  ;;  %v2174_v61 = vld [vmem:[#allocation17 + $0xe38] sm:$0xff] }
 0x549   :  { %4496 = vmatpush1.bf16.msra.mxu1 %v4495_v63  ;;  %v4525_v63 = vpack.c.bf16 %v2078_v24, %v2072_v59  ;;  %v4557_v59 = vpack.c.bf16 %v2174_v61, %v2168_v30  ;;  %v2173_v24 = vld [vmem:[#allocation17 + $0xe30] sm:$0xff]  ;;  %v2263_v30 = vld [vmem:[#allocation17 + $0x1100] sm:$0xff] }
 0x54a   :  { %4498 = vmatprep.subr.bf16.mxu1 %v4497_v2  ;;  %v2071_v2 = vld [vmem:[#allocation17 + $0xb00] sm:$0xff]  ;;  %v2269_v61 = vld [vmem:[#allocation17 + $0x1130] sm:$0xff] }
 0x54b   :  { %v4527_v12 = vpack.c.bf16 %v2077_v7, %v2071_v2 }
 0x54d   :  { %4500 = vmatpush1.bf16.msra.mxu1 %v4499_v1  ;;  %v4529_v1 = vpack.c.bf16 %v2090_v9, %v2084_v8  ;;  %v2179_v8 = vld [vmem:[#allocation17 + $0xe60] sm:$0xff]  ;;  %v2185_v9 = vld [vmem:[#allocation17 + $0xe90] sm:$0xff] }
 0x54e   :  { %4502 = vmatprep.subr.bf16.mxu1 %v4501_v4  ;;  %v2083_v4 = vld [vmem:[#allocation17 + $0xb60] sm:$0xff] }
 0x54f   :  { %v4531_v23 = vpack.c.bf16 %v2089_v5, %v2083_v4  ;;  %v4563_v4 = vpack.c.bf16 %v2185_v9, %v2179_v8 }
 0x551   :  { %4504 = vmatpush1.bf16.msra.mxu1 %v4503_v62  ;;  %v4533_v62 = vpack.c.bf16 %v2102_v21, %v2096_v49  ;;  %v2191_v49 = vld [vmem:[#allocation17 + $0xec0] sm:$0xff]  ;;  %v2197_v21 = vld [vmem:[#allocation17 + $0xef0] sm:$0xff] }
 0x552   :  { %4506 = vmatprep.subr.bf16.mxu1 %v4505_v50  ;;  %v2095_v50 = vld [vmem:[#allocation17 + $0xbc0] sm:$0xff] }
 0x553   :  { %v4535_v29 = vpack.c.bf16 %v2101_v26, %v2095_v50  ;;  %v4567_v50 = vpack.c.bf16 %v2197_v21, %v2191_v49 }
 0x555   :  { %4508 = vmatpush1.bf16.msra.mxu1 %v4507_v0  ;;  %v4537_v0 = vpack.c.bf16 %v2114_v48, %v2108_v27  ;;  %v2203_v27 = vld [vmem:[#allocation17 + $0xf20] sm:$0xff]  ;;  %v2209_v48 = vld [vmem:[#allocation17 + $0xf50] sm:$0xff] }
 0x556   :  { %4510 = vmatprep.subr.bf16.mxu1 %v4509_v3  ;;  %v2107_v3 = vld [vmem:[#allocation17 + $0xc20] sm:$0xff] }
 0x557   :  { %v4539_v34 = vpack.c.bf16 %v2113_v47, %v2107_v3  ;;  %v4571_v3 = vpack.c.bf16 %v2209_v48, %v2203_v27 }
 0x559   :  { %4512 = vmatpush1.bf16.msra.mxu1 %v4511_v41  ;;  %v2119_v41 = vld [vmem:[#allocation17 + $0xc80] sm:$0xff] }
 0x55a   :  { %4514 = vmatprep.subr.bf16.mxu1 %v4513_v45  ;;  %v2138_v45 = vld [vmem:[#allocation17 + $0xd18] sm:$0xff]  ;;  %v4543_v40 = vpack.c.bf16 %v2125_v42, %v2119_v41  ;;  %v4575_v41 = vpack.c.bf16 %v2221_v32, %v2215_v31 }
 0x55b   :  { %v4545_v22 = vpack.c.bf16 %v2138_v45, %v2132_v44  ;;  %v2227_v44 = vld [vmem:[#allocation17 + $0xfe0] sm:$0xff]  ;;  %v2233_v45 = vld [vmem:[#allocation17 + $0x1010] sm:$0xff] }
 0x55c   :  { %v3107_v31 = vld [vmem:[#allocation10 + $0x50] sm:$0xff] }
 0x55d   :  { %4516 = vmatpush1.bf16.msra.mxu1 %v4515_v56  ;;  %v4547_v56 = vpack.c.bf16 %v2137_v52, %v2131_v51  ;;  %v4579_v51 = vpack.c.bf16 %v2233_v45, %v2227_v44 }
 0x55e   :  { %4518 = vmatprep.subr.bf16.mxu1 %v4517_v17  ;;  %v4549_v17 = vpack.c.bf16 %v2150_v55, %v2144_v54  ;;  %v2239_v54 = vld [vmem:[#allocation17 + $0x1040] sm:$0xff]  ;;  %v2245_v55 = vld [vmem:[#allocation17 + $0x1070] sm:$0xff] }
 0x561   :  { %4520 = vmatpush1.bf16.msra.mxu1 %v4519_v57  ;;  %v2155_v57 = vld [vmem:[#allocation17 + $0xda0] sm:$0xff] }
 0x562   :  { %4522 = vmatprep.subr.bf16.mxu1 %v4521_v25  ;;  %v2161_v25 = vld [vmem:[#allocation17 + $0xdd0] sm:$0xff] }
 0x565   :  { %4524 = vmatpush1.bf16.msra.mxu1 %v4523_v16  ;;  %v2180_v16 = vld [vmem:[#allocation17 + $0xe68] sm:$0xff] }
 0x566   :  { %4526 = vmatprep.subr.bf16.mxu1 %v4525_v63  ;;  %v2186_v63 = vld [vmem:[#allocation17 + $0xe98] sm:$0xff] }
 0x567   :  { %v4561_v7 = vpack.c.bf16 %v2186_v63, %v2180_v16  ;;  %v2275_v16 = vld [vmem:[#allocation17 + $0x1160] sm:$0xff]  ;;  %v2281_v63 = vld [vmem:[#allocation17 + $0x1190] sm:$0xff] }
 0x568   :  { %v4595_v8 = vpack.c.bf16 %v2281_v63, %v2275_v16 }
 0x569   :  { %4528 = vmatpush1.bf16.msra.mxu1 %v4527_v12  ;;  %v2192_v12 = vld [vmem:[#allocation17 + $0xec8] sm:$0xff] }
 0x56a   :  { %4530 = vmatprep.subr.bf16.mxu1 %v4529_v1  ;;  %v2198_v1 = vld [vmem:[#allocation17 + $0xef8] sm:$0xff] }
 0x56b   :  { %v4565_v5 = vpack.c.bf16 %v2198_v1, %v2192_v12  ;;  %v2287_v12 = vld [vmem:[#allocation17 + $0x11c0] sm:$0xff]  ;;  %v2293_v1 = vld [vmem:[#allocation17 + $0x11f0] sm:$0xff] }
 0x56c   :  { %v4599_v49 = vpack.c.bf16 %v2293_v1, %v2287_v12  ;;  %v3025_v1 = vld [vmem:[#allocation8 + $0x28] sm:$0xff] }
 0x56d   :  { %4532 = vmatpush1.bf16.msra.mxu1 %v4531_v23  ;;  %v2204_v23 = vld [vmem:[#allocation17 + $0xf28] sm:$0xff] }
 0x56e   :  { %4534 = vmatprep.subr.bf16.mxu1 %v4533_v62  ;;  %v2210_v62 = vld [vmem:[#allocation17 + $0xf58] sm:$0xff] }
 0x56f   :  { %v4569_v26 = vpack.c.bf16 %v2210_v62, %v2204_v23  ;;  %v3097_v23 = vld [vmem:[#allocation10] sm:$0xff]  ;;  %v3103_v62 = vld [vmem:[#allocation10 + $0x30] sm:$0xff] }
 0x571   :  { %4536 = vmatpush1.bf16.msra.mxu1 %v4535_v29  ;;  %v2216_v29 = vld [vmem:[#allocation17 + $0xf88] sm:$0xff] }
 0x572   :  { %4538 = vmatprep.subr.bf16.mxu1 %v4537_v0  ;;  %v2222_v0 = vld [vmem:[#allocation17 + $0xfb8] sm:$0xff] }
 0x573   :  { %v4573_v47 = vpack.c.bf16 %v2222_v0, %v2216_v29 }
 0x574   :  { %2931 = vmatmul.mubr.f32.vlgmr.msra.gmra.mrb[8].mxu1 %v5441_v53  ;;  %v2149_v53 = vld [vmem:[#allocation17 + $0xd70] sm:$0xff] }
 0x575   :  { %2936 = vmatprep.mubr.f32.mxu1 %v5488_v28  ;;  %4540 = vmatpush1.bf16.msra.mxu1 %v4539_v34  ;;  %v2162_v28 = vld [vmem:[#allocation17 + $0xdd8] sm:$0xff]  ;;  %v4551_v15 = vpack.c.bf16 %v2149_v53, %v2143_v37  ;;  %v2228_v34 = vld [vmem:[#allocation17 + $0xfe8] sm:$0xff]  ;;  %v4583_v37 = vpack.c.bf16 %v2245_v55, %v2239_v54 }
 0x576   :  { %4542 = vmatprep.subr.bf16.mxu1 %v4541_v39  ;;  %v4553_v10 = vpack.c.bf16 %v2162_v28, %v2156_v38  ;;  %v2234_v39 = vld [vmem:[#allocation17 + $0x1018] sm:$0xff]  ;;  %v2251_v38 = vld [vmem:[#allocation17 + $0x10a0] sm:$0xff]  ;;  %v2257_v28 = vld [vmem:[#allocation17 + $0x10d0] sm:$0xff] }
 0x577   :  { %v4577_v42 = vpack.c.bf16 %v2234_v39, %v2228_v34  ;;  %v3027_v55 = vld [vmem:[#allocation8 + $0x38] sm:$0xff] }
 0x578   :  { %2937 = vmatmul.mubr.f32.gmra.mrb[10].mxu1 %v5458_v14  ;;  %v4555_v14 = vpack.c.bf16 %v2161_v25, %v2155_v57  ;;  %v4587_v57 = vpack.c.bf16 %v2257_v28, %v2251_v38  ;;  %v3028_v28 = vld [vmem:[#allocation8 + $0x40] sm:$0xff] }
 0x579   :  { %4544 = vmatpush1.bf16.msra.mxu1 %v4543_v40  ;;  %3007 = vmatprep.mubr.f32.mxu1 %v5448_v58  ;;  %v2167_v58 = vld [vmem:[#allocation17 + $0xe00] sm:$0xff]  ;;  %v2240_v40 = vld [vmem:[#allocation17 + $0x1048] sm:$0xff] }
 0x57a   :  { %4546 = vmatprep.subr.bf16.mxu1 %v4545_v22  ;;  %v4559_v2 = vpack.c.bf16 %v2173_v24, %v2167_v58  ;;  %v2246_v22 = vld [vmem:[#allocation17 + $0x1078] sm:$0xff]  ;;  %v4591_v58 = vpack.c.bf16 %v2269_v61, %v2263_v30 }
 0x57b   :  { %v4581_v52 = vpack.c.bf16 %v2246_v22, %v2240_v40  ;;  %v3023_v22 = vld [vmem:[#allocation8 + $0x18] sm:$0xff]  ;;  %v3029_v30 = vld [vmem:[#allocation8 + $0x48] sm:$0xff] }
 0x57d   :  { %4548 = vmatpush1.bf16.msra.mxu1 %v4547_v56  ;;  %v2252_v56 = vld [vmem:[#allocation17 + $0x10a8] sm:$0xff] }
 0x57e   :  { %4550 = vmatprep.subr.bf16.mxu1 %v4549_v17  ;;  %v2258_v17 = vld [vmem:[#allocation17 + $0x10d8] sm:$0xff] }
 0x57f   :  { %v4585_v53 = vpack.c.bf16 %v2258_v17, %v2252_v56 }
 0x581   :  { %4552 = vmatpush1.bf16.msra.mxu1 %v4551_v15  ;;  %v2264_v15 = vld [vmem:[#allocation17 + $0x1108] sm:$0xff] }
 0x582   :  { %4554 = vmatprep.subr.bf16.mxu1 %v4553_v10  ;;  %v2270_v10 = vld [vmem:[#allocation17 + $0x1138] sm:$0xff] }
 0x583   :  { %v4589_v25 = vpack.c.bf16 %v2270_v10, %v2264_v15 }
 0x585   :  { %4556 = vmatpush1.bf16.msra.mxu1 %v4555_v14  ;;  %v2276_v14 = vld [vmem:[#allocation17 + $0x1168] sm:$0xff] }
 0x586   :  { %4558 = vmatprep.subr.bf16.mxu1 %v4557_v59  ;;  %v2282_v59 = vld [vmem:[#allocation17 + $0x1198] sm:$0xff] }
 0x587   :  { %v4593_v24 = vpack.c.bf16 %v2282_v59, %v2276_v14 }
 0x589   :  { %4560 = vmatpush1.bf16.msra.mxu1 %v4559_v2  ;;  %v2288_v2 = vld [vmem:[#allocation17 + $0x11c8] sm:$0xff] }
 0x58a   :  { %4562 = vmatprep.subr.bf16.mxu1 %v4561_v7  ;;  %v2294_v7 = vld [vmem:[#allocation17 + $0x11f8] sm:$0xff] }
 0x58b   :  { %v4597_v9 = vpack.c.bf16 %v2294_v7, %v2288_v2 }
 0x58d   :  { %4564 = vmatpush1.bf16.msra.mxu1 %v4563_v4  ;;  %v3098_v4 = vld [vmem:[#allocation10 + $0x8] sm:$0xff] }
 0x58e   :  { %4566 = vmatprep.subr.bf16.mxu1 %v4565_v5  ;;  %v3104_v5 = vld [vmem:[#allocation10 + $0x38] sm:$0xff] }
 0x58f   :  { %v4601_v21 = vpack.c.bf16 %v3104_v5, %v3098_v4 }
 0x591   :  { %4568 = vmatpush1.bf16.msra.mxu1 %v4567_v50  ;;  %v4603_v50 = vpack.c.bf16 %v3103_v62, %v3097_v23  ;;  %v3030_v23 = vld [vmem:[#allocation8 + $0x50] sm:$0xff] }
 0x592   :  { %4570 = vmatprep.subr.bf16.mxu1 %v4569_v26  ;;  %v2295_v26 = vld [vmem:[#allocation19] sm:$0x3f] }
 0x593   :  { %v2300_v27 = vrot.slane %v2295_v26, %v5286_v11  ;;  %v2308_v48 = vrot.slane %v2295_v26, %v5291_v18  ;;  %v2304_v29 = vrot.slane %v2295_v26, %v5288_v13  ;;  %v2312_v0 = vrot.slane %v2295_v26, %v5295_v19  ;;  %v3026_v13 = vld [vmem:[#allocation8 + $0x30] sm:$0xff] }
 0x594   :  { %v2316_v63 = vrot.slane %v2295_v26, %v5298_v35  ;;  %v2320_v2 = vrot.slane %v2295_v26, %v5300_v36 }
 0x595   :  { %4572 = vmatpush1.bf16.msra.mxu1 %v4571_v3 }
 0x596   :  { %4574 = vmatprep.subr.bf16.mxu1 %v4573_v47  ;;  %v3020_v47 = vld [vmem:[#allocation8] sm:$0xff] }
 0x599   :  { %4576 = vmatpush1.bf16.msra.mxu1 %v4575_v41  ;;  %v3022_v41 = vld [vmem:[#allocation8 + $0x10] sm:$0xff] }
 0x59a   :  { %4578 = vmatprep.subr.bf16.mxu1 %v4577_v42 }
 0x59d   :  { %4580 = vmatpush1.bf16.msra.mxu1 %v4579_v51 }
 0x59e   :  { %4582 = vmatprep.subr.bf16.mxu1 %v4581_v52 }
 0x5a1   :  { %4584 = vmatpush1.bf16.msra.mxu1 %v4583_v37 }
 0x5a2   :  { %4586 = vmatprep.subr.bf16.mxu1 %v4585_v53 }
 0x5a5   :  { %4588 = vmatpush1.bf16.msra.mxu1 %v4587_v57 }
 0x5a6   :  { %4590 = vmatprep.subr.bf16.mxu1 %v4589_v25 }
 0x5a9   :  { %4592 = vmatpush1.bf16.msra.mxu1 %v4591_v58 }
 0x5aa   :  { %4594 = vmatprep.subr.bf16.mxu1 %v4593_v24 }
 0x5ad   :  { %4596 = vmatpush1.bf16.msra.mxu1 %v4595_v8  ;;  %v3024_v8 = vld [vmem:[#allocation8 + $0x20] sm:$0xff] }
 0x5ae   :  { %4598 = vmatprep.subr.bf16.mxu1 %v4597_v9 }
 0x5b1   :  { %4600 = vmatpush1.bf16.msra.mxu1 %v4599_v49 }
 0x5b2   :  { %4602 = vmatprep.subr.bf16.mxu1 %v4601_v21 }
 0x5b4   :  { %3008 = vmatmul.mubr.f32.vlgmr.msra.gmra.mrb[8].mxu1 %v5463_v20  ;;  %v3101_v20 = vld [vmem:[#allocation10 + $0x20] sm:$0xff] }
 0x5b5   :  { %3013 = vmatprep.mubr.f32.mxu1 %v5479_v43  ;;  %v4611_v45 = vpack.c.bf16 %v3107_v31, %v3101_v20  ;;  %v3447_v31 = vld [vmem:[#allocation20] ss:$0 sm:$0xff] }
 0x5b8   :  { %3014 = vmatmul.mubr.f32.gmra.mrb[10].mxu1 %v5482_v33  ;;  %v3021_v33 = vld [vmem:[#allocation8 + $0x8] sm:$0xff] }
 0x5ba   :  { %4604 = vmatpush1.bf16.xpose.msra.mxu1 %v4603_v50 }
 0x5bb   :  { %4613 = vmatprep.subr.bf16.mxu1 %v5525_v46 }
 0x5c6   :  { %v2547_v3 = vpop.f32.mrb[4].mxu1 }
 0x5c7   :  { %v4627_v43 = vadd.f32 %v2547_v3, %v2300_v27  ;;  %v2778_v32 = vpop.f32.mrb[8].mxu0  ;;  %v2549_v34 = vpop.f32.mrb[5].mxu1 }
 0x5c8   :  { %v4631_v39 = vadd.f32 %v2778_v32, %v2308_v48  ;;  %v4628_v46 = vadd.f32 %v2549_v34, %v2304_v29  ;;  %v2780_v42 = vpop.f32.mrb[9].mxu0 }
 0x5c9   :  { %v3032_v44 = vmul.f32 %v4627_v43, %v3020_v47  ;;  %v4632_v11 = vadd.f32 %v2780_v42, %v2312_v0  ;;  %v3122_v47 = vpop.permute.xlu0 %3121 }
 0x5ca   :  { %v3033_v18 = vmul.f32 %v4628_v46, %v3021_v33  ;;  %v2553_v40 = vpop.f32.mrb[6].mxu1  ;;  %3203 = vmatprep.mubr.f32.mxu1 %v4628_v46  ;;  %v3034_v19 = vmul.f32 %v4631_v39, %v3022_v41  ;;  %vm3124_vm2 = vcmp.eq.s32.totalorder %v3122_v47, 1 }
 0x5cb   :  { %v4629_v51 = vadd.f32 %v2553_v40, %v2300_v27  ;;  %v2784_v52 = vpop.f32.mrb[10].mxu0  ;;  %3278 = vmatprep.mubr.f32.mxu0 %v4632_v11  ;;  %v2555_v54 = vpop.f32.mrb[7].mxu1  ;;  %3204 = vmatmul.mubr.f32.vlgmr.msra.gmra.mrb[12].mxu1 %v4627_v43  ;;  %v3035_v10 = vmul.f32 %v4632_v11, %v3023_v22  ;;  %v3031_v27 = vld [vmem:[#allocation8 + $0x58] sm:$0xff]  ;;  %v5030_v11 = vmov -inf  }
 0x5cc   :  { %v3044_v56 = vadd.f32 %v3033_v18, %v3032_v44  ;;  %v4633_v17 = vadd.f32 %v2784_v52, %v2308_v48  ;;  %v4630_v37 = vadd.f32 %v2555_v54, %v2304_v29  ;;  %v2786_v53 = vpop.f32.mrb[11].mxu0  ;;  %3279 = vmatmul.mubr.f32.vlgmr.msra.gmra.mrb[12].mxu0 %v4631_v39  ;;  %4614 = vmatpush1.bf16.xpose.msra.mxu1 %v4611_v45  ;;  %v3448_v43 = vld [vmem:[#allocation22] ss:$0 sm:$0xff] }
 0x5cd   :  { %v3038_v38 = vmul.f32 %v4629_v51, %v3026_v13  ;;  %v4634_v15 = vadd.f32 %v2786_v53, %v2312_v0  ;;  %4612 = vmatpush1.bf16.xpose.msra.mxu0 %v4611_v45  ;;  %v3138_v34 = vsel %vm3124_vm2, %v3447_v31, %v3448_v43  ;;  %3081 = vst.msk [vmem:[#allocation4] sm:$0xff] %vm3066_vm3, %v5030_v11  ;;  %3082 = vst.msk [vmem:[#allocation4 + $0x8] sm:$0xff] %vm3066_vm3, %v5030_v11  ;;  %v3119_v45 = vpop.permute.xlu1 %3118  ;;  %v3432_v11 = vld [vmem:[%s5589_s12 + $0x8] sm:$0xff] }
 0x5ce   :  { %v3045_v57 = vadd.f32 %v3044_v56, %v3034_v19  ;;  %v3039_v25 = vmul.f32 %v4630_v37, %v3027_v55  ;;  %3208 = vmatprep.mubr.f32.mxu1 %v4630_v37  ;;  %v3040_v14 = vmul.f32 %v4633_v17, %v3028_v28  ;;  %vm3123_vm4 = vcmp.eq.s32.totalorder %v3119_v45, 1 }
 0x5cf   :  { %3283 = vmatprep.mubr.f32.mxu0 %v4634_v15  ;;  %3209 = vmatmul.mubr.f32.gmra.mrb[14].mxu1 %v4629_v51  ;;  %v3041_v58 = vmul.f32 %v4634_v15, %v3029_v30  ;;  %v3137_v18 = vsel %vm3123_vm4, %v3447_v31, %v3448_v43 }
 0x5d0   :  { %v3046_v61 = vadd.f32 %v3045_v57, %v3035_v10  ;;  %v3051_v59 = vadd.f32 %v3039_v25, %v3038_v38  ;;  %3284 = vmatmul.mubr.f32.gmra.mrb[14].mxu0 %v4633_v17  ;;  %v5031_v17 = vmov 0.0  }
 0x5d1   :  { %3083 = vst.msk [vmem:[#allocation5] sm:$0xff] %vm3066_vm3, %v5031_v17  ;;  %3084 = vst.msk [vmem:[#allocation5 + $0x8] sm:$0xff] %vm3066_vm3, %v5031_v17 }
 0x5d2   :  { %v3052_v24 = vadd.f32 %v3051_v59, %v3040_v14 }
 0x5d4   :  { %v3053_v16 = vadd.f32 %v3052_v24, %v3041_v58  ;;  %v3364_v37 = vld [vmem:[#allocation4] sm:$0xff]  ;;  %v3365_v28 = vld [vmem:[#allocation4 + $0x8] sm:$0xff] }
 0x687   :  { %v3009_v7 = vpop.f32.mrb[8].mxu1 }
 0x688   :  { %v4635_v9 = vadd.f32 %v3009_v7, %v2316_v63  ;;  %v3011_v12 = vpop.f32.mrb[9].mxu1 }
 0x689   :  { %v4636_v4 = vadd.f32 %v3011_v12, %v2320_v2 }
 0x68a   :  { %v3036_v5 = vmul.f32 %v4635_v9, %v3024_v8 }
 0x68b   :  { %v3037_v49 = vmul.f32 %v4636_v4, %v3025_v1  ;;  %v3015_v21 = vpop.f32.mrb[10].mxu1  ;;  %3353 = vmatprep.mubr.f32.mxu0 %v4636_v4  ;;  %v3381_v1 = vld [vmem:[#allocation5] sm:$0xff] }
 0x68c   :  { %v4637_v62 = vadd.f32 %v3015_v21, %v2316_v63  ;;  %v3017_v50 = vpop.f32.mrb[11].mxu1  ;;  %3354 = vmatmul.mubr.f32.vlgmr.msra.gmra.mrb[12].mxu0 %v4635_v9  ;;  %v3047_v48 = vadd.f32 %v3046_v61, %v3036_v5  ;;  %v3382_v21 = vld [vmem:[#allocation5 + $0x8] sm:$0xff] }
 0x68d   :  { %v4638_v29 = vadd.f32 %v3017_v50, %v2320_v2 }
 0x68e   :  { %v3042_v35 = vmul.f32 %v4637_v62, %v3030_v23  ;;  %v5542_v0 = vadd.f32 %v3047_v48, %v3037_v49  ;;  %v5032_v48 = vmov -10000.0  }
 0x68f   :  { %v3043_v36 = vmul.f32 %v4638_v29, %v3031_v27  ;;  %3358 = vmatprep.mubr.f32.mxu1 %v4638_v29  ;;  %v3062_v29 = vsel %vm3111_vm0, 0.0, %v5032_v48 }
 0x690   :  { %3359 = vmatmul.mubr.f32.vlgmr.msra.gmra.mrb[16].mxu1 %v4637_v62  ;;  %v3054_v26 = vadd.f32 %v3053_v16, %v3042_v35 }
 0x692   :  { %v3055_v3 = vadd.f32 %v3054_v26, %v3043_v36  ;;  %v3063_v26 = vsel %vm3112_vm1, 0.0, %v5032_v48 }
 0x69e   :  { %v3205_v20 = vpop.f32.mrb[12].mxu1 }
 0x69f   :  { %v3207_v32 = vpop.f32.mrb[13].mxu1  ;;  %v3206_v40 = vadd.f32 %v3205_v20, %v3137_v18 }
 0x6a2   :  { %v3210_v33 = vpop.f32.mrb[14].mxu1 }
 0x6a3   :  { %v3211_v39 = vadd.f32 %v3210_v33, %v3138_v34  ;;  %v3285_v41 = vpop.f32.mrb[14].mxu0  ;;  %v3212_v46 = vpop.f32.mrb[15].mxu1  ;;  %v3431_v33 = vld [vmem:[%s5589_s12] sm:$0xff] }
 0x6a4   :  { %v3287_v42 = vpop.f32.mrb[15].mxu0 }
 0x6a5   :  { %v3286_v44 = vadd.f32 %v3285_v41, %v3211_v39 }
 0x75f   :  { %v3355_v13 = vpop.f32.mrb[12].mxu0 }
 0x760   :  { %v4640_v19 = vadd.f32 %v3355_v13, %v3206_v40  ;;  %v3357_v22 = vpop.f32.mrb[13].mxu0 }
 0x762   :  { %v3367_v51 = vsel %vm3366_vm5, %v4640_v19, -inf }
 0x763   :  { %v3360_v52 = vpop.f32.mrb[16].mxu1  ;;  %3368 = vmax.xlane.f32.xlu1 %v3367_v51 }
 0x764   :  { %v3361_v54 = vadd.f32 %v3360_v52, %v3286_v44  ;;  %v3362_v55 = vpop.f32.mrb[17].mxu1 }
 0x766   :  { %v3370_v56 = vsel %vm3366_vm5, %v3361_v54, -inf }
 0x767   :  { %3371 = vmax.xlane.f32.xlu0 %v3370_v56 }
 0x7f0   :  { %v3369_v53 = vpop.xlane.xlu1 %3368 }
 0x7f1   :  { %v3373_v38 = vmax.f32 %v3364_v37, %v3369_v53 }
 0x7f3   :  { %v3375_v15 = vsub.f32 %v3364_v37, %v3373_v38  ;;  %3412 = vst.msk [vmem:[#allocation4] sm:$0xff] %vm3066_vm3, %v3373_v38  ;;  %3387 = vperm.xlu1 %4712, %v3373_v38  }
 0x7f4   :  { %v3372_v10 = vpop.xlane.xlu0 %3371 }
 0x7f5   :  { %v3374_v57 = vmax.f32 %v3365_v28, %v3372_v10  ;;  %v3377_v8 = vmul.f32 1.442695, %v3375_v15 }
 0x7f7   :  { %v3376_v25 = vsub.f32 %v3365_v28, %v3374_v57  ;;  %3413 = vst.msk [vmem:[#allocation4 + $0x8] sm:$0xff] %vm3066_vm3, %v3374_v57  ;;  %3392 = vperm.xlu1 %4712, %v3374_v57  }
 0x7f9   :  { %v3379_v9 = vmul.f32 1.442695, %v3376_v25 }
 0x7fa   :  { %v3417_v43 = vld [vmem:[#allocation4] sm:$0xff] }
 0x7fe   :  { %v3418_v46 = vld [vmem:[#allocation4 + $0x8] sm:$0xff] }
 0x872   :  { %v3388_v30 = vpop.permute.xlu1 %3387 }
 0x873   :  { %v3395_v61 = vsub.f32 %v4640_v19, %v3388_v30 }
 0x875   :  { %v3397_v14 = vmul.f32 1.442695, %v3395_v61 }
 0x876   :  { %v3393_v59 = vpop.permute.xlu1 %3392 }
 0x877   :  { %4741 = vpow2.f32 %v3397_v14  ;;  %v3396_v58 = vsub.f32 %v3361_v54, %v3393_v59 }
 0x879   :  { %v3399_v24 = vmul.f32 1.442695, %v3396_v58 }
 0x87b   :  { %4743 = vpow2.f32 %v3399_v24 }
 0x87c   :  { %4745 = vpow2.f32 %v3377_v8 }
 0x87d   :  { %4747 = vpow2.f32 %v3379_v9 }
 0x881   :  { %v4742_v16 = vpop.eup %4741 }
 0x882   :  { %v3401_v63 = vsel %vm3366_vm5, %v4742_v16, 0.0 }
 0x883   :  { %3402 = vadd.xlane.f32.xlu1 %v3401_v63 }
 0x885   :  { %v4744_v2 = vpop.eup %4743 }
 0x886   :  { %v3404_v7 = vsel %vm3366_vm5, %v4744_v2, 0.0  ;;  %v4746_v12 = vpop.eup %4745 }
 0x887   :  { %3405 = vadd.xlane.f32.xlu0 %v3404_v7  ;;  %v3383_v4 = vmul.f32 %v4746_v12, %v3381_v1  ;;  %v4748_v5 = vpop.eup %4747 }
 0x888   :  { %v3384_v62 = vmul.f32 %v4748_v5, %v3382_v21 }
 0x88b   :  { %3049 = vadd.xlane.f32.xlu0 %v5542_v0 }
 0x88f   :  { %3056 = vadd.xlane.f32.xlu0 %v3055_v3 }
 0x910   :  { %v3403_v49 = vpop.xlane.xlu1 %3402 }
 0x911   :  { %v3407_v23 = vadd.f32 %v3403_v49, %v3383_v4 }
 0x913   :  { %3410 = vst.msk [vmem:[#allocation5] sm:$0xff] %vm3066_vm3, %v3407_v23 }
 0x914   :  { %v3406_v50 = vpop.xlane.xlu0 %3405 }
 0x915   :  { %v3408_v27 = vadd.f32 %v3406_v50, %v3384_v62 }
 0x917   :  { %3411 = vst.msk [vmem:[#allocation5 + $0x8] sm:$0xff] %vm3066_vm3, %v3408_v27 }
 0x918   :  { %v3050_v35 = vpop.xlane.xlu0 %3049 }
 0x919   :  { %v3064_v0 = vadd.f32 %v3062_v29, %v3050_v35 }
 0x91a   :  { %v3419_v36 = vld [vmem:[#allocation5] sm:$0xff] }
 0x91b   :  { %4749 = vlog2.f32 %v3419_v36  ;;  %3067 = vst.msk [vmem:[#allocation3] sm:$0xff] %vm3066_vm3, %v3064_v0 }
 0x91c   :  { %v3057_v3 = vpop.xlane.xlu0 %3056 }
 0x91d   :  { %v3065_v47 = vadd.f32 %v3063_v26, %v3057_v3 }
 0x91e   :  { %v3420_v20 = vld [vmem:[#allocation5 + $0x8] sm:$0xff] }
 0x91f   :  { %4751 = vlog2.f32 %v3420_v20  ;;  %3068 = vst.msk [vmem:[#allocation3 + $0x8] sm:$0xff] %vm3066_vm3, %v3065_v47 }
 0x922   :  { %v3427_v6 = vld [vmem:[#allocation3] sm:$0xff] }
 0x925   :  { %v4750_v31 = vpop.eup %4749 }
 0x926   :  { %v3422_v60 = vmul.f32 0.6931472, %v4750_v31  ;;  %v3428_v45 = vld [vmem:[#allocation3 + $0x8] sm:$0xff] }
 0x928   :  { %v3425_v32 = vadd.f32 %v3422_v60, %v3417_v43 }
 0x929   :  { %v4752_v34 = vpop.eup %4751 }
 0x92a   :  { %v3429_v39 = vsub.f32 %v3425_v32, %v3427_v6  ;;  %v3424_v41 = vmul.f32 0.6931472, %v4752_v34 }
 0x92c   :  { %v3433_v42 = vmul.f32 %v3431_v33, %v3429_v39  ;;  %v3426_v44 = vadd.f32 %v3424_v41, %v3418_v46 }
 0x92e   :  { %3435 = vst.msk [vmem:[%s5590_s13] sm:$0xff] %vm3066_vm3, %v3433_v42  ;;  %v3430_v18 = vsub.f32 %v3426_v44, %v3428_v45 }
 0x930   :  { %v3434_v40 = vmul.f32 %v3432_v11, %v3430_v18 }
 0x932   :  { %3436 = vst.msk [vmem:[%s5590_s13 + $0x8] sm:$0xff] %vm3066_vm3, %v3434_v40 }
 0x933   :  { %3441 = vsyncpa [#allocation7], 1 }
 0x934   :  { %3442 = vsyncpa [#allocation9], 1 }
 0x935   :  { %3443 = vsyncpa [#allocation12], 1 }
 0x936   :  { %3444 = vsyncpa [#allocation15], 1 }
 0x937   :  { %3445 = vsyncpa [#allocation18], 1 }
 0x938   :  { %3446 = vsyncpa [#allocation21], 1 }

</bundles_post_ra>
